<compile_context>
chip_gen: v7x
topology: tpu7x:2x2x1
jax: 0.10.0
libtpu: 0.0.40
codegen_flags: <defaults>
</compile_context>

<pallas_src>
import functools
import random

import jax
import jax.numpy as jnp
from jax.experimental import pallas as pl
from jax.experimental.pallas import tpu as pltpu


def _round_up(x, m):
    return (x + m - 1) // m * m


def _choose_tile_s(b_pad, h_pad, s_real, budget_bytes=40 << 20):
    """Largest S tile (multiple of 128, <= 2048) whose double-buffered bf16
    encoder slab plus f32 broadcast temporaries fit the VMEM budget."""
    per_s = b_pad * h_pad * 12          # 2x bf16 tile buffers + ~2x f32 temps
    t = (budget_bytes // per_s) // 128 * 128
    t = max(128, min(int(t), 2048))
    return min(t, _round_up(s_real, 128))


# --------------------------------------------------------------------------
# Kernel 1: fused GRU cell + S-tiled coverage attention (online softmax)
# --------------------------------------------------------------------------
def decoder_attn_kernel(
    w_cov_ref,      # SMEM (1,)        f32  coverage weight
    emb_ref,        # (B, H)           f32  embedded decoder token
    h_ref,          # (B, H)           f32  previous GRU hidden
    enc_ref,        # (B, TS, H)       bf16 encoder-output tile (streamed over S)
    cov_ref,        # (B, TS)          f32  incoming-coverage tile
    w_ih_ref,       # (H, 3H)          bf16 fused GRU input weights  [r|z|n]
    w_hh_ref,       # (H, 3H)          bf16 fused GRU hidden weights [r|z|n]
    b_ih_ref,       # (1, 3H)          f32
    b_hh_ref,       # (1, 3H)          f32
    w_attn_h_ref,   # (H, H)           bf16 attention combine (hidden half)
    w_attn_c_ref,   # (H, H)           bf16 attention combine (context half)
    b_attn_ref,     # (1, H)           f32
    # outputs
    h_new_ref,      # (B, H)           f32
    attn_out_ref,   # (B, H)           bf16 (consumed by projection kernel)
    scores_ref,     # (B, TS)          f32  masked attention-score tile
    # scratch (persists across the S grid)
    q_sc,           # (B, H)           bf16 h_new query
    m_sc,           # (B, 1)           f32  online-softmax running max
    l_sc,           # (B, 1)           f32  online-softmax running sum
    ctx_sc,         # (B, H)           f32  unnormalized context accumulator
    *, s_real,      # static python int: real source length (masks padded S)
):
    s_idx = pl.program_id(0)
    h_dim = h_ref.shape[-1]
    ts = enc_ref.shape[1]

    # ---- grid step 0: fused GRU cell (two wide MXU matmuls) ----------------
    @pl.when(s_idx == 0)
    def _():
        x = emb_ref[...]
        h = h_ref[...]
        gi = jnp.dot(x.astype(jnp.bfloat16), w_ih_ref[...],
                     preferred_element_type=jnp.float32) + b_ih_ref[...]
        gh = jnp.dot(h.astype(jnp.bfloat16), w_hh_ref[...],
                     preferred_element_type=jnp.float32) + b_hh_ref[...]
        # H is padded to a multiple of 128 -> gate slices are lane-aligned.
        r = jax.nn.sigmoid(gi[:, 0:h_dim] + gh[:, 0:h_dim])
        z = jax.nn.sigmoid(gi[:, h_dim:2 * h_dim] + gh[:, h_dim:2 * h_dim])
        n = jnp.tanh(gi[:, 2 * h_dim:3 * h_dim] + r * gh[:, 2 * h_dim:3 * h_dim])
        h_new = (1.0 - z) * n + z * h
        h_new_ref[...] = h_new
        q_sc[...] = h_new.astype(jnp.bfloat16)
        m_sc[...] = jnp.full_like(m_sc, -1e30)
        l_sc[...] = jnp.zeros_like(l_sc)
        ctx_sc[...] = jnp.zeros_like(ctx_sc)

    # ---- coverage dot attention on this S tile (online softmax) ------------
    enc = enc_ref[...].astype(jnp.float32)                 # (B, TS, H)
    q = q_sc[...].astype(jnp.float32)                      # (B, H)
    # VPU broadcast-multiply + reduce (avoids M=1 batched MXU matmuls)
    raw = jnp.sum(q[:, None, :] * enc, axis=-1)            # (B, TS)
    pos = s_idx * ts + jax.lax.broadcasted_iota(jnp.int32, raw.shape, 1)
    valid = pos < s_real
    scores = jnp.where(valid, raw + w_cov_ref[0] * cov_ref[...], -1e30)
    scores_ref[...] = scores

    m_prev = m_sc[...]
    m_new = jnp.maximum(m_prev, jnp.max(scores, axis=-1, keepdims=True))
    alpha = jnp.exp(m_prev - m_new)
    p = jnp.exp(scores - m_new)                            # masked entries -> 0
    l_sc[...] = alpha * l_sc[...] + jnp.sum(p, axis=-1, keepdims=True)
    ctx_sc[...] = alpha * ctx_sc[...] + jnp.sum(p[:, :, None] * enc, axis=1)
    m_sc[...] = m_new

    # ---- last grid step: normalize + attention combine (no concat) ---------
    @pl.when(s_idx == pl.num_programs(0) - 1)
    def _():
        ctx = (ctx_sc[...] / l_sc[...]).astype(jnp.bfloat16)
        pre = (jnp.dot(q_sc[...], w_attn_h_ref[...],
                       preferred_element_type=jnp.float32)
               + jnp.dot(ctx, w_attn_c_ref[...],
                         preferred_element_type=jnp.float32)
               + b_attn_ref[...])
        attn_out_ref[...] = jnp.tanh(pre).astype(attn_out_ref.dtype)


# --------------------------------------------------------------------------
# Kernel 2: output projection, tiled over V (streams Wout from HBM)
# --------------------------------------------------------------------------
def projection_kernel(attn_out_ref, wout_ref, dec_out_ref):
    # TODO(synk): int8 (v5e/v6e) / fp8 (v7x) Wout with per-column scales would
    # halve the HBM weight stream that bounds this kernel.
    dec_out_ref[...] = jnp.dot(attn_out_ref[...], wout_ref[...],
                               preferred_element_type=jnp.float32)


# --------------------------------------------------------------------------
# Parameter init: deterministic, synthetic, already padded / fused / bf16.
# All weight padding & casting happens ONCE here (never per decode step).
# --------------------------------------------------------------------------
def init_params(key, hidden_size, data_size):
    H, V = hidden_size, data_size
    H_pad = _round_up(H, 128)
    V_pad = _round_up(V, 2048) if V > 2048 else _round_up(V, 256)

    ks = jax.random.split(key, 10)
    u = lambda k, shape, s=0.1: jax.random.uniform(k, shape, jnp.float32, -s, s)

    def pad2(w, r, c):
        return jnp.pad(w, ((0, r - w.shape[0]), (0, c - w.shape[1])))

    # GRU weights, PyTorch gate order r|z|n, pre-transposed for x @ W; each
    # gate zero-padded into its own lane-aligned H_pad-wide block.
    def gru_w(k):
        gates = [pad2(u(kk, (H, H)), H_pad, H_pad) for kk in jax.random.split(k, 3)]
        return jnp.concatenate(gates, axis=1).astype(jnp.bfloat16)

    def gru_b(k):
        gates = [pad2(u(kk, (1, H)), 1, H_pad) for kk in jax.random.split(k, 3)]
        return jnp.concatenate(gates, axis=1)

    return dict(
        embedding=pad2(u(ks[0], (V, H), 1.0), V, H_pad),         # (V, H_pad) f32
        w_ih=gru_w(ks[1]), w_hh=gru_w(ks[2]),
        b_ih=gru_b(ks[3]), b_hh=gru_b(ks[4]),
        # attention combine tanh(h @ Wh + ctx @ Wc + b), stored as two halves
        w_attn_h=pad2(u(ks[5], (H, H)), H_pad, H_pad).astype(jnp.bfloat16),
        w_attn_c=pad2(u(ks[6], (H, H)), H_pad, H_pad).astype(jnp.bfloat16),
        b_attn=pad2(u(ks[7], (1, H)), 1, H_pad),
        w_cov=u(ks[8], (1,)),
        # dec_out Linear(H, V, bias=False), pre-transposed and pre-padded
        wout=pad2(u(ks[9], (H, V)), H_pad, V_pad).astype(jnp.bfloat16),
    )


# --------------------------------------------------------------------------
# Per-sequence encoder prep: done ONCE, reused for every decode step.
# --------------------------------------------------------------------------
def prepare_encoder(enc_output, h_pad):
    S, B, H = enc_output.shape
    B_pad = _round_up(B, 8)
    tile_s = _choose_tile_s(B_pad, h_pad, S)
    S_pad = _round_up(S, tile_s)
    enc = jnp.transpose(enc_output, (1, 0, 2))                   # (B, S, H)
    enc_p = jnp.pad(enc, ((0, B_pad - B), (0, S_pad - S), (0, h_pad - H)))
    return dict(enc=enc_p.astype(jnp.bfloat16), S=S, B=B, tile_s=tile_s)


# --------------------------------------------------------------------------
# One decode step (everything big already prepared).
# --------------------------------------------------------------------------
def decoder_step(params, enc_prep, tokens, dec_hidden, coverage, dec_coverage=True):
    emb_tab = params["embedding"]                 # (V, H_pad) f32
    V, H_pad = emb_tab.shape
    H = dec_hidden.shape[-1]
    B = tokens.shape[0]

    enc_p = enc_prep["enc"]                       # (B_pad, S_pad, H_pad) bf16
    B_pad, S_pad, _ = enc_p.shape
    tile_s = enc_prep["tile_s"]
    S = enc_prep["S"]
    assert enc_prep["B"] == B and enc_p.shape[2] == H_pad

    # small per-step operands only
    emb_p = jnp.pad(jnp.take(emb_tab, tokens, axis=0), ((0, B_pad - B), (0, 0)))
    h0_p = jnp.pad(dec_hidden[0], ((0, B_pad - B), (0, H_pad - H)))
    cov = coverage if coverage is not None else jnp.zeros((B, S), jnp.float32)
    cov_p = jnp.pad(cov, ((0, B_pad - B), (0, S_pad - S)))

    num_s_tiles = S_pad // tile_s

    # ---- kernel 1: fused GRU + S-tiled coverage attention ------------------
    wb = (params["w_ih"].size + params["w_hh"].size
          + params["w_attn_h"].size + params["w_attn_c"].size) * 2   # bf16 bytes
    vmem1 = int(2 * wb
                + 4 * B_pad * H_pad * 4                  # emb + h (x2 buffers)
                + 2 * B_pad * tile_s * H_pad * 2         # enc tile, double-buffered
                + 4 * B_pad * tile_s * 4                 # cov in + scores out
                + 2 * B_pad * tile_s * H_pad * 4         # f32 broadcast temporaries
                + 16 * B_pad * H_pad                     # outputs + scratch
                + (4 << 20))
    vmem1 = min(max(vmem1, 32 << 20), 100 << 20)

    const2 = lambda s: (0, 0)
    h_new_p, attn_out_p, scores_p = pl.pallas_call(
        functools.partial(decoder_attn_kernel, s_real=S),
        out_shape=(
            jax.ShapeDtypeStruct((B_pad, H_pad), jnp.float32),    # new hidden
            jax.ShapeDtypeStruct((B_pad, H_pad), jnp.bfloat16),   # attn_out
            jax.ShapeDtypeStruct((B_pad, S_pad), jnp.float32),    # masked scores
        ),
        grid_spec=pltpu.PrefetchScalarGridSpec(
            num_scalar_prefetch=0,
            grid=(num_s_tiles,),
            in_specs=[
                pl.BlockSpec(memory_space=pltpu.MemorySpace.SMEM),           # w_cov
                pl.BlockSpec((B_pad, H_pad), const2),                        # emb
                pl.BlockSpec((B_pad, H_pad), const2),                        # h
                pl.BlockSpec((B_pad, tile_s, H_pad), lambda s: (0, s, 0)),   # enc
                pl.BlockSpec((B_pad, tile_s), lambda s: (0, s)),             # cov
                pl.BlockSpec((H_pad, 3 * H_pad), const2),                    # w_ih
                pl.BlockSpec((H_pad, 3 * H_pad), const2),                    # w_hh
                pl.BlockSpec((1, 3 * H_pad), const2),                        # b_ih
                pl.BlockSpec((1, 3 * H_pad), const2),                        # b_hh
                pl.BlockSpec((H_pad, H_pad), const2),                        # w_attn_h
                pl.BlockSpec((H_pad, H_pad), const2),                        # w_attn_c
                pl.BlockSpec((1, H_pad), const2),                            # b_attn
            ],
            out_specs=(
                pl.BlockSpec((B_pad, H_pad), const2),
                pl.BlockSpec((B_pad, H_pad), const2),
                pl.BlockSpec((B_pad, tile_s), lambda s: (0, s)),
            ),
            scratch_shapes=[
                pltpu.VMEM((B_pad, H_pad), jnp.bfloat16),    # q (h_new bf16)
                pltpu.VMEM((B_pad, 1), jnp.float32),         # running max
                pltpu.VMEM((B_pad, 1), jnp.float32),         # running sum
                pltpu.VMEM((B_pad, H_pad), jnp.float32),     # context accumulator
            ],
        ),
        compiler_params=pltpu.CompilerParams(
            dimension_semantics=("arbitrary",),
            vmem_limit_bytes=vmem1),
    )(params["w_cov"], emb_p, h0_p, enc_p, cov_p,
      params["w_ih"], params["w_hh"], params["b_ih"], params["b_hh"],
      params["w_attn_h"], params["w_attn_c"], params["b_attn"])

    # ---- kernel 2: output projection, streamed & tiled over V --------------
    wout = params["wout"]                          # (H_pad, V_pad) bf16, pre-padded
    V_pad = wout.shape[1]
    tile_v = min(2048, V_pad)
    grid_v = V_pad // tile_v
    vmem2 = int(2 * H_pad * tile_v * 2 + 2 * B_pad * tile_v * 4
                + 2 * B_pad * H_pad * 2 + (2 << 20))
    vmem2 = min(max(vmem2, 32 << 20), 100 << 20)

    dec_out_p = pl.pallas_call(
        projection_kernel,
        out_shape=jax.ShapeDtypeStruct((B_pad, V_pad), jnp.float32),
        grid=(grid_v,),
        in_specs=[
            pl.BlockSpec((B_pad, H_pad), lambda j: (0, 0)),     # resident activations
            pl.BlockSpec((H_pad, tile_v), lambda j: (0, j)),    # streamed weight tiles
        ],
        out_specs=pl.BlockSpec((B_pad, tile_v), lambda j: (0, j)),
        compiler_params=pltpu.CompilerParams(
            dimension_semantics=("parallel",),
            vmem_limit_bytes=vmem2),
        cost_estimate=pl.CostEstimate(
            flops=2 * B_pad * H_pad * V_pad,
            transcendentals=0,
            bytes_accessed=B_pad * H_pad * 2 + H_pad * V_pad * 2
                           + B_pad * V_pad * 4),
    )(attn_out_p, wout)

    # ---- unpad & repack into the PyTorch module's return layout ------------
    dec_out = dec_out_p[:B, :V]                    # (T*B, V) f32 logits
    dec_hidden_new = h_new_p[:B, :H][None]         # (1, B, H)
    # exact softmax over the real S positions (padded cols sliced away)
    dec_cov = jax.nn.softmax(scores_p[:B, :S], axis=-1)

    if dec_coverage:
        coverage_out = dec_cov if coverage is None else dec_cov + coverage
    else:
        coverage_out = coverage
    return dec_out, dec_hidden_new, dec_cov, coverage_out


# --------------------------------------------------------------------------
# Forward wrapper (mirrors Decoder.forward for a single decoding step T=1)
# --------------------------------------------------------------------------
def decoder_forward(params, pre_t, dec_hidden, enc_output, teach, g_t, coverage,
                    dec_coverage=True, enc_prep=None):
    T, B = pre_t.shape
    assert T == 1, "single decoding step (T=1) supported"
    if enc_prep is None:
        # callers should precompute this once per sequence and reuse it
        enc_prep = prepare_encoder(enc_output, params["embedding"].shape[1])
    # teacher-forcing token selection (host-side python, like the PyTorch module)
    if g_t is None:
        tokens = pre_t
    elif random.random() <= teach:
        tokens = g_t
    else:
        tokens = pre_t
    return decoder_step(params, enc_prep, tokens[0], dec_hidden, coverage,
                        dec_coverage=dec_coverage)


# --------------------------------------------------------------------------
if __name__ == "__main__":
    B, H, S, V, T = 2, 32, 8, 64, 1

    key = jax.random.PRNGKey(0)
    k_par, k_tok, k_hid, k_enc = jax.random.split(key, 4)

    params = init_params(k_par, hidden_size=H, data_size=V)

    pre_t = jax.random.randint(k_tok, (T, B), 0, V, dtype=jnp.int32)
    dec_hidden = jax.random.normal(k_hid, (1, B, H), jnp.float32)
    enc_output = jax.random.normal(k_enc, (S, B, H), jnp.float32)

    # per-sequence prep, done once and reused across decode steps
    enc_prep = prepare_encoder(enc_output, params["embedding"].shape[1])

    dec_out, dec_hidden_new, dec_cov, coverage = decoder_forward(
        params, pre_t, dec_hidden, enc_output,
        teach=1.0, g_t=None, coverage=None, dec_coverage=True,
        enc_prep=enc_prep)

    # second step: reuses prep and exercises the coverage accumulation path
    dec_out2, dec_hidden2, dec_cov2, coverage2 = decoder_forward(
        params, pre_t, dec_hidden_new, enc_output,
        teach=1.0, g_t=None, coverage=coverage, dec_coverage=True,
        enc_prep=enc_prep)

    jax.block_until_ready((dec_out, dec_hidden_new, dec_cov, coverage,
                           dec_out2, dec_hidden2, dec_cov2, coverage2))

    assert dec_out.shape == (T * B, V)
    assert dec_hidden_new.shape == (1, B, H)
    assert dec_cov.shape == (B, S)
    assert coverage.shape == (B, S)
    assert dec_out2.shape == (T * B, V)
    assert coverage2.shape == (B, S)
    assert bool(jnp.all(jnp.isfinite(dec_out)))
    assert bool(jnp.all(jnp.isfinite(dec_out2)))
    # attention distribution over the real S positions sums to 1 (exact softmax)
    assert bool(jnp.allclose(jnp.sum(dec_cov, axis=-1), 1.0, atol=1e-3))
    assert bool(jnp.allclose(jnp.sum(dec_cov2, axis=-1), 1.0, atol=1e-3))
    # coverage accumulates: cov_2 = dec_cov_2 + dec_cov_1
    assert bool(jnp.allclose(coverage2, dec_cov2 + dec_cov, atol=1e-5))

    print("KERNEL_OK")
</pallas_src>

<mosaic_0001>
module attributes {stable_mosaic.version = 11 : i64} {
  func.func @decoder_attn_kernel(%arg0: i32, %arg1: memref<1xf32, #tpu.memory_space<smem>>, %arg2: memref<8x128xf32, #tpu.memory_space<vmem>>, %arg3: memref<8x128xf32, #tpu.memory_space<vmem>>, %arg4: memref<8x128x128xbf16, #tpu.memory_space<vmem>>, %arg5: memref<8x128xf32, #tpu.memory_space<vmem>>, %arg6: memref<128x384xbf16, #tpu.memory_space<vmem>>, %arg7: memref<128x384xbf16, #tpu.memory_space<vmem>>, %arg8: memref<1x384xf32, #tpu.memory_space<vmem>>, %arg9: memref<1x384xf32, #tpu.memory_space<vmem>>, %arg10: memref<128x128xbf16, #tpu.memory_space<vmem>>, %arg11: memref<128x128xbf16, #tpu.memory_space<vmem>>, %arg12: memref<1x128xf32, #tpu.memory_space<vmem>>, %arg13: memref<8x128xf32, #tpu.memory_space<vmem>>, %arg14: memref<8x128xbf16, #tpu.memory_space<vmem>>, %arg15: memref<8x128xf32, #tpu.memory_space<vmem>>, %arg16: memref<8x128xbf16, #tpu.memory_space<vmem>>, %arg17: memref<8x1xf32, #tpu.memory_space<vmem>>, %arg18: memref<8x1xf32, #tpu.memory_space<vmem>>, %arg19: memref<8x128xf32, #tpu.memory_space<vmem>>) attributes {dimension_semantics = [#tpu.dimension_semantics<arbitrary>], iteration_bounds = array<i64: 1>, scalar_prefetch = 0 : i64, scratch_operands = 4 : i64, tpu.core_type = #tpu.core_type<tc>, window_params = [{transform_indices = @transform_0, window_bounds = array<i64: 1>}, {pipeline_mode = #tpu.pipeline_mode<synchronous>, transform_indices = @transform_1, window_bounds = array<i64: 8, 128>}, {pipeline_mode = #tpu.pipeline_mode<synchronous>, transform_indices = @transform_2, window_bounds = array<i64: 8, 128>}, {transform_indices = @transform_3, window_bounds = array<i64: 8, 128, 128>}, {transform_indices = @transform_4, window_bounds = array<i64: 8, 128>}, {pipeline_mode = #tpu.pipeline_mode<synchronous>, transform_indices = @transform_5, window_bounds = array<i64: 128, 384>}, {pipeline_mode = #tpu.pipeline_mode<synchronous>, transform_indices = @transform_6, window_bounds = array<i64: 128, 384>}, {pipeline_mode = #tpu.pipeline_mode<synchronous>, transform_indices = @transform_7, window_bounds = array<i64: 1, 384>}, {pipeline_mode = #tpu.pipeline_mode<synchronous>, transform_indices = @transform_8, window_bounds = array<i64: 1, 384>}, {pipeline_mode = #tpu.pipeline_mode<synchronous>, transform_indices = @transform_9, window_bounds = array<i64: 128, 128>}, {pipeline_mode = #tpu.pipeline_mode<synchronous>, transform_indices = @transform_10, window_bounds = array<i64: 128, 128>}, {pipeline_mode = #tpu.pipeline_mode<synchronous>, transform_indices = @transform_11, window_bounds = array<i64: 1, 128>}, {pipeline_mode = #tpu.pipeline_mode<synchronous>, transform_indices = @transform_12, window_bounds = array<i64: 8, 128>}, {pipeline_mode = #tpu.pipeline_mode<synchronous>, transform_indices = @transform_13, window_bounds = array<i64: 8, 128>}, {transform_indices = @transform_14, window_bounds = array<i64: 8, 128>}]} {
    %c0_i32 = arith.constant 0 : i32
    %0 = arith.cmpi eq, %arg0, %c0_i32 : i32
    %1 = arith.extui %0 : i1 to i32
    %c0_i32_0 = arith.constant 0 : i32
    %2 = arith.cmpi ne, %1, %c0_i32_0 : i32
    scf.if %2 {
      %c0_28 = arith.constant 0 : index
      %c0_29 = arith.constant 0 : index
      %53 = vector.load %arg2[%c0_28, %c0_29] : memref<8x128xf32, #tpu.memory_space<vmem>>, vector<8x128xf32>
      %c0_30 = arith.constant 0 : index
      %c0_31 = arith.constant 0 : index
      %54 = vector.load %arg3[%c0_30, %c0_31] : memref<8x128xf32, #tpu.memory_space<vmem>>, vector<8x128xf32>
      %55 = arith.truncf %53 : vector<8x128xf32> to vector<8x128xbf16>
      %c0_32 = arith.constant 0 : index
      %c0_33 = arith.constant 0 : index
      %56 = vector.load %arg6[%c0_32, %c0_33] : memref<128x384xbf16, #tpu.memory_space<vmem>>, vector<128x384xbf16>
      %cst_34 = arith.constant dense<0.000000e+00> : vector<8x384xf32>
      %57 = tpu.matmul %55, %56, %cst_34 {dimension_numbers = #tpu.dot_dimension_numbers<[1], [0], [0], [1], [0, 0, 1, 1], [], []>} : vector<8x128xbf16>, vector<128x384xbf16>, vector<8x384xf32> -> vector<8x384xf32>
      %c0_35 = arith.constant 0 : index
      %c0_36 = arith.constant 0 : index
      %58 = vector.load %arg8[%c0_35, %c0_36] : memref<1x384xf32, #tpu.memory_space<vmem>>, vector<1x384xf32>
      %59 = vector.broadcast %58 : vector<1x384xf32> to vector<8x384xf32>
      %60 = arith.addf %57, %59 : vector<8x384xf32>
      %61 = arith.truncf %54 : vector<8x128xf32> to vector<8x128xbf16>
      %c0_37 = arith.constant 0 : index
      %c0_38 = arith.constant 0 : index
      %62 = vector.load %arg7[%c0_37, %c0_38] : memref<128x384xbf16, #tpu.memory_space<vmem>>, vector<128x384xbf16>
      %cst_39 = arith.constant dense<0.000000e+00> : vector<8x384xf32>
      %63 = tpu.matmul %61, %62, %cst_39 {dimension_numbers = #tpu.dot_dimension_numbers<[1], [0], [0], [1], [0, 0, 1, 1], [], []>} : vector<8x128xbf16>, vector<128x384xbf16>, vector<8x384xf32> -> vector<8x384xf32>
      %c0_40 = arith.constant 0 : index
      %c0_41 = arith.constant 0 : index
      %64 = vector.load %arg9[%c0_40, %c0_41] : memref<1x384xf32, #tpu.memory_space<vmem>>, vector<1x384xf32>
      %65 = vector.broadcast %64 : vector<1x384xf32> to vector<8x384xf32>
      %66 = arith.addf %63, %65 : vector<8x384xf32>
      %67 = vector.extract_strided_slice %60 {offsets = [0, 0], sizes = [8, 128], strides = [1, 1]} : vector<8x384xf32> to vector<8x128xf32>
      %68 = vector.extract_strided_slice %66 {offsets = [0, 0], sizes = [8, 128], strides = [1, 1]} : vector<8x384xf32> to vector<8x128xf32>
      %69 = arith.addf %67, %68 : vector<8x128xf32>
      %70 = arith.negf %69 : vector<8x128xf32>
      %71 = math.exp %70 : vector<8x128xf32>
      %cst_42 = arith.constant 1.000000e+00 : f32
      %72 = vector.broadcast %cst_42 : f32 to vector<8x128xf32>
      %73 = arith.addf %72, %71 : vector<8x128xf32>
      %74 = arith.divf %72, %73 : vector<8x128xf32>
      %75 = vector.extract_strided_slice %60 {offsets = [0, 128], sizes = [8, 128], strides = [1, 1]} : vector<8x384xf32> to vector<8x128xf32>
      %76 = vector.extract_strided_slice %66 {offsets = [0, 128], sizes = [8, 128], strides = [1, 1]} : vector<8x384xf32> to vector<8x128xf32>
      %77 = arith.addf %75, %76 : vector<8x128xf32>
      %78 = arith.negf %77 : vector<8x128xf32>
      %79 = math.exp %78 : vector<8x128xf32>
      %cst_43 = arith.constant 1.000000e+00 : f32
      %80 = vector.broadcast %cst_43 : f32 to vector<8x128xf32>
      %81 = arith.addf %80, %79 : vector<8x128xf32>
      %82 = arith.divf %80, %81 : vector<8x128xf32>
      %83 = vector.extract_strided_slice %60 {offsets = [0, 256], sizes = [8, 128], strides = [1, 1]} : vector<8x384xf32> to vector<8x128xf32>
      %84 = vector.extract_strided_slice %66 {offsets = [0, 256], sizes = [8, 128], strides = [1, 1]} : vector<8x384xf32> to vector<8x128xf32>
      %85 = arith.mulf %74, %84 : vector<8x128xf32>
      %86 = arith.addf %83, %85 : vector<8x128xf32>
      %87 = math.tanh %86 : vector<8x128xf32>
      %cst_44 = arith.constant 1.000000e+00 : f32
      %88 = vector.broadcast %cst_44 : f32 to vector<8x128xf32>
      %89 = arith.subf %88, %82 : vector<8x128xf32>
      %90 = arith.mulf %89, %87 : vector<8x128xf32>
      %91 = arith.mulf %82, %54 : vector<8x128xf32>
      %92 = arith.addf %90, %91 : vector<8x128xf32>
      %c0_45 = arith.constant 0 : index
      %c0_46 = arith.constant 0 : index
      %93 = vector.load %arg13[%c0_45, %c0_46] : memref<8x128xf32, #tpu.memory_space<vmem>>, vector<8x128xf32>
      tpu.vector_store %arg13[%c0_45, %c0_46], %92 {strides = array<i32>} : memref<8x128xf32, #tpu.memory_space<vmem>>, vector<8x128xf32>,
      %94 = arith.truncf %92 : vector<8x128xf32> to vector<8x128xbf16>
      %c0_47 = arith.constant 0 : index
      %c0_48 = arith.constant 0 : index
      %95 = vector.load %arg16[%c0_47, %c0_48] : memref<8x128xbf16, #tpu.memory_space<vmem>>, vector<8x128xbf16>
      tpu.vector_store %arg16[%c0_47, %c0_48], %94 {strides = array<i32>} : memref<8x128xbf16, #tpu.memory_space<vmem>>, vector<8x128xbf16>,
      %cst_49 = arith.constant -1.000000e+30 : f32
      %96 = vector.broadcast %cst_49 : f32 to vector<8x1xf32>
      %c0_50 = arith.constant 0 : index
      %c0_51 = arith.constant 0 : index
      %97 = vector.load %arg17[%c0_50, %c0_51] : memref<8x1xf32, #tpu.memory_space<vmem>>, vector<8x1xf32>
      tpu.vector_store %arg17[%c0_50, %c0_51], %96 {strides = array<i32>} : memref<8x1xf32, #tpu.memory_space<vmem>>, vector<8x1xf32>,
      %cst_52 = arith.constant 0.000000e+00 : f32
      %98 = vector.broadcast %cst_52 : f32 to vector<8x1xf32>
      %c0_53 = arith.constant 0 : index
      %c0_54 = arith.constant 0 : index
      %99 = vector.load %arg18[%c0_53, %c0_54] : memref<8x1xf32, #tpu.memory_space<vmem>>, vector<8x1xf32>
      tpu.vector_store %arg18[%c0_53, %c0_54], %98 {strides = array<i32>} : memref<8x1xf32, #tpu.memory_space<vmem>>, vector<8x1xf32>,
      %cst_55 = arith.constant 0.000000e+00 : f32
      %100 = vector.broadcast %cst_55 : f32 to vector<8x128xf32>
      %c0_56 = arith.constant 0 : index
      %c0_57 = arith.constant 0 : index
      %101 = vector.load %arg19[%c0_56, %c0_57] : memref<8x128xf32, #tpu.memory_space<vmem>>, vector<8x128xf32>
      tpu.vector_store %arg19[%c0_56, %c0_57], %100 {strides = array<i32>} : memref<8x128xf32, #tpu.memory_space<vmem>>, vector<8x128xf32>,
    } else {
    }
    %c0 = arith.constant 0 : index
    %c0_1 = arith.constant 0 : index
    %c0_2 = arith.constant 0 : index
    %3 = vector.load %arg4[%c0, %c0_1, %c0_2] : memref<8x128x128xbf16, #tpu.memory_space<vmem>>, vector<8x128x128xbf16>
    %4 = arith.extf %3 : vector<8x128x128xbf16> to vector<8x128x128xf32>
    %c0_3 = arith.constant 0 : index
    %c0_4 = arith.constant 0 : index
    %5 = vector.load %arg16[%c0_3, %c0_4] : memref<8x128xbf16, #tpu.memory_space<vmem>>, vector<8x128xbf16>
    %6 = arith.extf %5 : vector<8x128xbf16> to vector<8x128xf32>
    %7 = vector.shape_cast %6 : vector<8x128xf32> to vector<8x1x128xf32>
    %8 = vector.broadcast %7 : vector<8x1x128xf32> to vector<8x128x128xf32>
    %9 = arith.mulf %8, %4 : vector<8x128x128xf32>
    %cst = arith.constant dense<0.000000e+00> : vector<8x128xf32>
    %10 = vector.multi_reduction <add>, %9, %cst [2] : vector<8x128x128xf32> to vector<8x128xf32>
    %c128_i32 = arith.constant 128 : i32
    %11 = arith.muli %arg0, %c128_i32 : i32
    %12 = tpu.iota {dimensions = array<i32: 1>} : vector<8x128xi32>
    %13 = vector.broadcast %11 : i32 to vector<8x128xi32>
    %14 = arith.addi %13, %12 : vector<8x128xi32>
    %c8_i32 = arith.constant 8 : i32
    %15 = vector.broadcast %c8_i32 : i32 to vector<8x128xi32>
    %16 = arith.cmpi slt, %14, %15 : vector<8x128xi32>
    %c0_5 = arith.constant 0 : index
    %17 = memref.load %arg1[%c0_5] : memref<1xf32, #tpu.memory_space<smem>>
    %c0_6 = arith.constant 0 : index
    %c0_7 = arith.constant 0 : index
    %18 = vector.load %arg5[%c0_6, %c0_7] : memref<8x128xf32, #tpu.memory_space<vmem>>, vector<8x128xf32>
    %19 = vector.broadcast %17 : f32 to vector<8x128xf32>
    %20 = arith.mulf %19, %18 : vector<8x128xf32>
    %21 = arith.addf %10, %20 : vector<8x128xf32>
    %cst_8 = arith.constant -1.000000e+30 : f32
    %22 = vector.broadcast %cst_8 : f32 to vector<8x128xf32>
    %23 = arith.select %16, %21, %22 : vector<8x128xi1>, vector<8x128xf32>
    %c0_9 = arith.constant 0 : index
    %c0_10 = arith.constant 0 : index
    %24 = vector.load %arg15[%c0_9, %c0_10] : memref<8x128xf32, #tpu.memory_space<vmem>>, vector<8x128xf32>
    tpu.vector_store %arg15[%c0_9, %c0_10], %23 {strides = array<i32>} : memref<8x128xf32, #tpu.memory_space<vmem>>, vector<8x128xf32>,
    %c0_11 = arith.constant 0 : index
    %c0_12 = arith.constant 0 : index
    %25 = vector.load %arg17[%c0_11, %c0_12] : memref<8x1xf32, #tpu.memory_space<vmem>>, vector<8x1xf32>
    %cst_13 = arith.constant dense<0xFF800000> : vector<8xf32>
    %26 = vector.multi_reduction <maximumf>, %23, %cst_13 [1] : vector<8x128xf32> to vector<8xf32>
    %27 = vector.shape_cast %26 : vector<8xf32> to vector<8x1xf32>
    %28 = arith.maximumf %25, %27 : vector<8x1xf32>
    %29 = arith.subf %25, %28 : vector<8x1xf32>
    %30 = math.exp %29 : vector<8x1xf32>
    %31 = vector.broadcast %28 : vector<8x1xf32> to vector<8x128xf32>
    %32 = arith.subf %23, %31 : vector<8x128xf32>
    %33 = math.exp %32 : vector<8x128xf32>
    %c0_14 = arith.constant 0 : index
    %c0_15 = arith.constant 0 : index
    %34 = vector.load %arg18[%c0_14, %c0_15] : memref<8x1xf32, #tpu.memory_space<vmem>>, vector<8x1xf32>
    %35 = arith.mulf %30, %34 : vector<8x1xf32>
    %cst_16 = arith.constant dense<0.000000e+00> : vector<8xf32>
    %36 = vector.multi_reduction <add>, %33, %cst_16 [1] : vector<8x128xf32> to vector<8xf32>
    %37 = vector.shape_cast %36 : vector<8xf32> to vector<8x1xf32>
    %38 = arith.addf %35, %37 : vector<8x1xf32>
    %c0_17 = arith.constant 0 : index
    %c0_18 = arith.constant 0 : index
    %39 = vector.load %arg18[%c0_17, %c0_18] : memref<8x1xf32, #tpu.memory_space<vmem>>, vector<8x1xf32>
    tpu.vector_store %arg18[%c0_17, %c0_18], %38 {strides = array<i32>} : memref<8x1xf32, #tpu.memory_space<vmem>>, vector<8x1xf32>,
    %c0_19 = arith.constant 0 : index
    %c0_20 = arith.constant 0 : index
    %40 = vector.load %arg19[%c0_19, %c0_20] : memref<8x128xf32, #tpu.memory_space<vmem>>, vector<8x128xf32>
    %41 = vector.broadcast %30 : vector<8x1xf32> to vector<8x128xf32>
    %42 = arith.mulf %41, %40 : vector<8x128xf32>
    %43 = vector.shape_cast %33 : vector<8x128xf32> to vector<8x128x1xf32>
    %44 = vector.broadcast %43 : vector<8x128x1xf32> to vector<8x128x128xf32>
    %45 = arith.mulf %44, %4 : vector<8x128x128xf32>
    %cst_21 = arith.constant dense<0.000000e+00> : vector<8x128xf32>
    %46 = vector.multi_reduction <add>, %45, %cst_21 [1] : vector<8x128x128xf32> to vector<8x128xf32>
    %47 = arith.addf %42, %46 : vector<8x128xf32>
    %c0_22 = arith.constant 0 : index
    %c0_23 = arith.constant 0 : index
    %48 = vector.load %arg19[%c0_22, %c0_23] : memref<8x128xf32, #tpu.memory_space<vmem>>, vector<8x128xf32>
    tpu.vector_store %arg19[%c0_22, %c0_23], %47 {strides = array<i32>} : memref<8x128xf32, #tpu.memory_space<vmem>>, vector<8x128xf32>,
    %c0_24 = arith.constant 0 : index
    %c0_25 = arith.constant 0 : index
    %49 = vector.load %arg17[%c0_24, %c0_25] : memref<8x1xf32, #tpu.memory_space<vmem>>, vector<8x1xf32>
    tpu.vector_store %arg17[%c0_24, %c0_25], %28 {strides = array<i32>} : memref<8x1xf32, #tpu.memory_space<vmem>>, vector<8x1xf32>,
    %c0_i32_26 = arith.constant 0 : i32
    %50 = arith.cmpi eq, %arg0, %c0_i32_26 : i32
    %51 = arith.extui %50 : i1 to i32
    %c0_i32_27 = arith.constant 0 : i32
    %52 = arith.cmpi ne, %51, %c0_i32_27 : i32
    scf.if %52 {
      %c0_28 = arith.constant 0 : index
      %c0_29 = arith.constant 0 : index
      %53 = vector.load %arg19[%c0_28, %c0_29] : memref<8x128xf32, #tpu.memory_space<vmem>>, vector<8x128xf32>
      %c0_30 = arith.constant 0 : index
      %c0_31 = arith.constant 0 : index
      %54 = vector.load %arg18[%c0_30, %c0_31] : memref<8x1xf32, #tpu.memory_space<vmem>>, vector<8x1xf32>
      %55 = vector.broadcast %54 : vector<8x1xf32> to vector<8x128xf32>
      %56 = arith.divf %53, %55 : vector<8x128xf32>
      %57 = arith.truncf %56 : vector<8x128xf32> to vector<8x128xbf16>
      %c0_32 = arith.constant 0 : index
      %c0_33 = arith.constant 0 : index
      %58 = vector.load %arg16[%c0_32, %c0_33] : memref<8x128xbf16, #tpu.memory_space<vmem>>, vector<8x128xbf16>
      %c0_34 = arith.constant 0 : index
      %c0_35 = arith.constant 0 : index
      %59 = vector.load %arg10[%c0_34, %c0_35] : memref<128x128xbf16, #tpu.memory_space<vmem>>, vector<128x128xbf16>
      %cst_36 = arith.constant dense<0.000000e+00> : vector<8x128xf32>
      %60 = tpu.matmul %58, %59, %cst_36 {dimension_numbers = #tpu.dot_dimension_numbers<[1], [0], [0], [1], [0, 0, 1, 1], [], []>} : vector<8x128xbf16>, vector<128x128xbf16>, vector<8x128xf32> -> vector<8x128xf32>
      %c0_37 = arith.constant 0 : index
      %c0_38 = arith.constant 0 : index
      %61 = vector.load %arg11[%c0_37, %c0_38] : memref<128x128xbf16, #tpu.memory_space<vmem>>, vector<128x128xbf16>
      %cst_39 = arith.constant dense<0.000000e+00> : vector<8x128xf32>
      %62 = tpu.matmul %57, %61, %cst_39 {dimension_numbers = #tpu.dot_dimension_numbers<[1], [0], [0], [1], [0, 0, 1, 1], [], []>} : vector<8x128xbf16>, vector<128x128xbf16>, vector<8x128xf32> -> vector<8x128xf32>
      %63 = arith.addf %60, %62 : vector<8x128xf32>
      %c0_40 = arith.constant 0 : index
      %c0_41 = arith.constant 0 : index
      %64 = vector.load %arg12[%c0_40, %c0_41] : memref<1x128xf32, #tpu.memory_space<vmem>>, vector<1x128xf32>
      %65 = vector.broadcast %64 : vector<1x128xf32> to vector<8x128xf32>
      %66 = arith.addf %63, %65 : vector<8x128xf32>
      %67 = math.tanh %66 : vector<8x128xf32>
      %68 = arith.truncf %67 : vector<8x128xf32> to vector<8x128xbf16>
      %c0_42 = arith.constant 0 : index
      %c0_43 = arith.constant 0 : index
      %69 = vector.load %arg14[%c0_42, %c0_43] : memref<8x128xbf16, #tpu.memory_space<vmem>>, vector<8x128xbf16>
      tpu.vector_store %arg14[%c0_42, %c0_43], %68 {strides = array<i32>} : memref<8x128xbf16, #tpu.memory_space<vmem>>, vector<8x128xbf16>,
    } else {
    }
    return
  }
  func.func @transform_0(%arg0: i32) -> i32 {
    %c0_i32 = arith.constant 0 : i32
    %c0_i32_0 = arith.constant 0 : i32
    return %c0_i32 : i32
  }
  func.func @transform_1(%arg0: i32) -> (i32, i32) {
    %c0_i32 = arith.constant 0 : i32
    %c0_i32_0 = arith.constant 0 : i32
    %c0_i32_1 = arith.constant 0 : i32
    return %c0_i32, %c0_i32_0 : i32, i32
  }
  func.func @transform_2(%arg0: i32) -> (i32, i32) {
    %c0_i32 = arith.constant 0 : i32
    %c0_i32_0 = arith.constant 0 : i32
    %c0_i32_1 = arith.constant 0 : i32
    return %c0_i32, %c0_i32_0 : i32, i32
  }
  func.func @transform_3(%arg0: i32) -> (i32, i32, i32) {
    %c0_i32 = arith.constant 0 : i32
    %c0_i32_0 = arith.constant 0 : i32
    %c0_i32_1 = arith.constant 0 : i32
    return %c0_i32, %arg0, %c0_i32_0 : i32, i32, i32
  }
  func.func @transform_4(%arg0: i32) -> (i32, i32) {
    %c0_i32 = arith.constant 0 : i32
    %c0_i32_0 = arith.constant 0 : i32
    return %c0_i32, %arg0 : i32, i32
  }
  func.func @transform_5(%arg0: i32) -> (i32, i32) {
    %c0_i32 = arith.constant 0 : i32
    %c0_i32_0 = arith.constant 0 : i32
    %c0_i32_1 = arith.constant 0 : i32
    return %c0_i32, %c0_i32_0 : i32, i32
  }
  func.func @transform_6(%arg0: i32) -> (i32, i32) {
    %c0_i32 = arith.constant 0 : i32
    %c0_i32_0 = arith.constant 0 : i32
    %c0_i32_1 = arith.constant 0 : i32
    return %c0_i32, %c0_i32_0 : i32, i32
  }
  func.func @transform_7(%arg0: i32) -> (i32, i32) {
    %c0_i32 = arith.constant 0 : i32
    %c0_i32_0 = arith.constant 0 : i32
    %c0_i32_1 = arith.constant 0 : i32
    return %c0_i32, %c0_i32_0 : i32, i32
  }
  func.func @transform_8(%arg0: i32) -> (i32, i32) {
    %c0_i32 = arith.constant 0 : i32
    %c0_i32_0 = arith.constant 0 : i32
    %c0_i32_1 = arith.constant 0 : i32
    return %c0_i32, %c0_i32_0 : i32, i32
  }
  func.func @transform_9(%arg0: i32) -> (i32, i32) {
    %c0_i32 = arith.constant 0 : i32
    %c0_i32_0 = arith.constant 0 : i32
    %c0_i32_1 = arith.constant 0 : i32
    return %c0_i32, %c0_i32_0 : i32, i32
  }
  func.func @transform_10(%arg0: i32) -> (i32, i32) {
    %c0_i32 = arith.constant 0 : i32
    %c0_i32_0 = arith.constant 0 : i32
    %c0_i32_1 = arith.constant 0 : i32
    return %c0_i32, %c0_i32_0 : i32, i32
  }
  func.func @transform_11(%arg0: i32) -> (i32, i32) {
    %c0_i32 = arith.constant 0 : i32
    %c0_i32_0 = arith.constant 0 : i32
    %c0_i32_1 = arith.constant 0 : i32
    return %c0_i32, %c0_i32_0 : i32, i32
  }
  func.func @transform_12(%arg0: i32) -> (i32, i32) {
    %c0_i32 = arith.constant 0 : i32
    %c0_i32_0 = arith.constant 0 : i32
    %c0_i32_1 = arith.constant 0 : i32
    return %c0_i32, %c0_i32_0 : i32, i32
  }
  func.func @transform_13(%arg0: i32) -> (i32, i32) {
    %c0_i32 = arith.constant 0 : i32
    %c0_i32_0 = arith.constant 0 : i32
    %c0_i32_1 = arith.constant 0 : i32
    return %c0_i32, %c0_i32_0 : i32, i32
  }
  func.func @transform_14(%arg0: i32) -> (i32, i32) {
    %c0_i32 = arith.constant 0 : i32
    %c0_i32_0 = arith.constant 0 : i32
    return %c0_i32, %arg0 : i32, i32
  }
}

</mosaic_0001>

<bundles_post_ra>
// kernel: tpu_custom_call.1
= control target key start
LH: loop header
LB: loop body
LE: loop exit
PB: predicated region body
PF: predicated region fallthrough
CT: control target
= control target key end

     0   :  { %21 = vsyncpa [#allocation8], 0  ;;  %s8518_s0 = inlined_call_operand.<no memory space> [shape: f32[1], index: 0, kind: input, shape index: {}]   ;;  %s8519_s1 = inlined_call_operand.hbm [shape: f32[8,128], index: 1, kind: input, shape index: {}]   ;;  %s8520_s2 = inlined_call_operand.hbm [shape: f32[8,128], index: 2, kind: input, shape index: {}]   ;;  %s8521_s3 = inlined_call_operand.hbm [shape: bf16[8,128,128], index: 3, kind: input, shape index: {}]   ;;  %s8522_s4 = inlined_call_operand.vmem [shape: f32[8,128], index: 4, kind: input, shape index: {}]   ;;  %s8523_s5 = inlined_call_operand.hbm [shape: bf16[128,384], index: 5, kind: input, shape index: {}]   ;;  %s8524_s6 = inlined_call_operand.hbm [shape: bf16[128,384], index: 6, kind: input, shape index: {}]   ;;  %s8525_s7 = inlined_call_operand.vmem [shape: f32[1,384], index: 7, kind: input, shape index: {}]   ;;  %s8526_s8 = inlined_call_operand.vmem [shape: f32[1,384], index: 8, kind: input, shape index: {}]   ;;  %s8527_s9 = inlined_call_operand.hbm [shape: bf16[128,128], index: 9, kind: input, shape index: {}]   ;;  %s8528_s10 = inlined_call_operand.hbm [shape: bf16[128,128], index: 10, kind: input, shape index: {}]   ;;  %s8529_s11 = inlined_call_operand.vmem [shape: f32[1,128], index: 11, kind: input, shape index: {}]   ;;  %s8530_s12 = inlined_call_operand.hbm [shape: f32[8,128], index: 12, kind: output, shape index: {0}]   ;;  %s8531_s13 = inlined_call_operand.hbm [shape: bf16[8,128], index: 13, kind: output, shape index: {1}]   ;;  %s8532_s14 = inlined_call_operand.hbm [shape: f32[8,128], index: 14, kind: output, shape index: {2}]  }
   0x1   :  { %22 = vsyncpa [#allocation11], 0 }
   0x2   :  { %23 = vsyncpa [#allocation14], 0 }
   0x3   :  { %24 = vsyncpa [#allocation17], 0 }
   0x4   :  { %25 = vsyncpa [#allocation9], 0 }
   0x5   :  { %26 = vsyncpa [#allocation21], 0  ;;  %s5436_s29 = smov [#allocation10]   ;;  %s5437_s15 = smov [#allocation13]  }
   0x6   :  { %s45_s30 = sshll.u32 %s5436_s29, 4  ;;  %s68_s16 = sshll.u32 %s5437_s15, 4  ;;  %s46_s30 = int_to_ptr.vmem [resolvable:$true] %s45_s30  ;;  %s5530_s16 = int_to_ptr.vmem [resolvable:$true] %s68_s16 }
   0x7   :  { %s5204_s19 = scalar_lea.hbm %s8520_s2, 128 }
   0x8   :  { %p5205_p0 = scmp.ne.s32.totalorder %s8520_s2, %s5204_s19  ;;  %p5208_p1 = scmp.lt.u32.totalorder %s5204_s19, %s8520_s2 }
   0xa   :  { %p5210_p2 = pnand %p5208_p1, %p5205_p0 }
   0xc   :  { %5213 = shalt.err (!%p5210_p2)
}
   0xd   :  { %s5214_s24 = scalar_lea.vmem %s46_s30, 128  ;;  %p5219_p4 = scmp.lt.s32.totalorder %s46_s30, %s46_s30 }
   0xe   :  { %p5215_p3 = scmp.ne.s32.totalorder %s46_s30, %s5214_s24  ;;  %p5220_p5 = scmp.lt.s32.totalorder %s5214_s24, %s5214_s24 }
  0x10   :  { %p5221_p6 = por %p5220_p5, %p5219_p4 }
  0x12   :  { %p5222_p7 = pnand %p5221_p6, %p5215_p3 }
  0x14   :  { %5225 = shalt.err (!%p5222_p7)
}
  0x15   :  { %48 = dma.hbm_to_vmem [thread:$0]  %s8520_s2, 128, %s46_s30, [#allocation11]  }
  0x16   :  { %s5226_s29 = scalar_lea.hbm %s8523_s5, 3072 }
  0x17   :  { %p5227_p8 = scmp.ne.s32.totalorder %s8523_s5, %s5226_s29  ;;  %p5230_p9 = scmp.lt.u32.totalorder %s5226_s29, %s8523_s5 }
  0x19   :  { %p5232_p10 = pnand %p5230_p9, %p5227_p8 }
  0x1b   :  { %5235 = shalt.err (!%p5232_p10)
}
  0x1c   :  { %s5236_s20 = scalar_lea.vmem %s5530_s16, 3072  ;;  %p5241_p12 = scmp.lt.s32.totalorder %s5530_s16, %s5530_s16 }
  0x1d   :  { %p5237_p11 = scmp.ne.s32.totalorder %s5530_s16, %s5236_s20  ;;  %p5242_p13 = scmp.lt.s32.totalorder %s5236_s20, %s5236_s20 }
  0x1f   :  { %p5243_p0 = por %p5242_p13, %p5241_p12 }
  0x21   :  { %p5244_p1 = pnand %p5243_p0, %p5237_p11 }
  0x23   :  { %5247 = shalt.err (!%p5244_p1)
}
  0x24   :  { %s5438_s2 = smov 192   ;;  %s5439_s30 = smov 12  }
  0x25   :  { %74 = dma.hbm_to_vmem [thread:$0]  %s8523_s5, 3072, %s5530_s16, [#allocation14], %s5438_s2, %s5438_s2, %s5439_s30  }
  0x26   :  { %s5440_s23 = smov [#allocation16]   ;;  %s5441_s25 = smov [#allocation7]  }
  0x27   :  { %s96_s24 = sshll.u32 %s5440_s23, 4  ;;  %s35_s26 = sshll.u32 %s5441_s25, 4  ;;  %s97_s24 = int_to_ptr.vmem [resolvable:$true] %s96_s24  ;;  %s36_s26 = int_to_ptr.vmem [resolvable:$true] %s35_s26 }
  0x28   :  { %s5248_s29 = scalar_lea.hbm %s8527_s9, 1024 }
  0x29   :  { %p5249_p2 = scmp.ne.s32.totalorder %s8527_s9, %s5248_s29  ;;  %p5252_p3 = scmp.lt.u32.totalorder %s5248_s29, %s8527_s9 }
  0x2b   :  { %p5254_p4 = pnand %p5252_p3, %p5249_p2 }
  0x2d   :  { %5257 = shalt.err (!%p5254_p4)
}
  0x2e   :  { %s5258_s5 = scalar_lea.vmem %s97_s24, 1024  ;;  %p5263_p6 = scmp.lt.s32.totalorder %s97_s24, %s97_s24 }
  0x2f   :  { %p5259_p5 = scmp.ne.s32.totalorder %s97_s24, %s5258_s5  ;;  %p5264_p7 = scmp.lt.s32.totalorder %s5258_s5, %s5258_s5 }
  0x31   :  { %p5265_p8 = por %p5264_p7, %p5263_p6 }
  0x33   :  { %p5266_p9 = pnand %p5265_p8, %p5259_p5 }
  0x35   :  { %5269 = shalt.err (!%p5266_p9)
}
  0x36   :  { %s5442_s16 = smov 64   ;;  %s5443_s20 = smov 4  }
  0x37   :  { %102 = dma.hbm_to_vmem [thread:$0]  %s8527_s9, 1024, %s97_s24, [#allocation17], %s5442_s16, %s5442_s16, %s5443_s20  }
  0x38   :  { %s5270_s27 = scalar_lea.hbm %s8519_s1, 128 }
  0x39   :  { %p5271_p10 = scmp.ne.s32.totalorder %s8519_s1, %s5270_s27  ;;  %p5274_p11 = scmp.lt.u32.totalorder %s5270_s27, %s8519_s1 }
  0x3b   :  { %p5276_p12 = pnand %p5274_p11, %p5271_p10 }
  0x3d   :  { %5279 = shalt.err (!%p5276_p12)
}
  0x3e   :  { %s5280_s18 = scalar_lea.vmem %s36_s26, 128  ;;  %p5285_p0 = scmp.lt.s32.totalorder %s36_s26, %s36_s26 }
  0x3f   :  { %p5281_p13 = scmp.ne.s32.totalorder %s36_s26, %s5280_s18  ;;  %p5286_p1 = scmp.lt.s32.totalorder %s5280_s18, %s5280_s18 }
  0x41   :  { %p5287_p2 = por %p5286_p1, %p5285_p0 }
  0x43   :  { %p5288_p3 = pnand %p5287_p2, %p5281_p13 }
  0x45   :  { %5291 = shalt.err (!%p5288_p3)
}
  0x46   :  { %38 = dma.hbm_to_vmem [thread:$0]  %s8519_s1, 128, %s36_s26, [#allocation8]  }
  0x47   :  { %s5444_s19 = smov [#allocation12]   ;;  %s5445_s21 = smov [#allocation15]  }
  0x48   :  { %s54_s5 = sshll.u32 %s5444_s19, 4  ;;  %s80_s22 = sshll.u32 %s5445_s21, 4  ;;  %s55_s5 = int_to_ptr.vmem [resolvable:$true] %s54_s5  ;;  %s5591_s22 = int_to_ptr.vmem [resolvable:$true] %s80_s22 }
  0x49   :  { %s5292_s27 = scalar_lea.hbm %s8521_s3, 8192 }
  0x4a   :  { %p5293_p4 = scmp.ne.s32.totalorder %s8521_s3, %s5292_s27  ;;  %p5296_p5 = scmp.lt.u32.totalorder %s5292_s27, %s8521_s3 }
  0x4c   :  { %p5298_p6 = pnand %p5296_p5, %p5293_p4 }
  0x4e   :  { %5301 = shalt.err (!%p5298_p6)
}
  0x4f   :  { %s5302_s1 = scalar_lea.vmem %s55_s5, 8192  ;;  %p5307_p8 = scmp.lt.s32.totalorder %s55_s5, %s55_s5 }
  0x50   :  { %p5303_p7 = scmp.ne.s32.totalorder %s55_s5, %s5302_s1  ;;  %p5308_p9 = scmp.lt.s32.totalorder %s5302_s1, %s5302_s1 }
  0x52   :  { %p5309_p10 = por %p5308_p9, %p5307_p8 }
  0x54   :  { %p5310_p11 = pnand %p5309_p10, %p5303_p7 }
  0x56   :  { %5313 = shalt.err (!%p5310_p11)
}
  0x57   :  { %60 = dma.hbm_to_vmem [thread:$0]  %s8521_s3, 8192, %s55_s5, [#allocation11], %s5442_s16, %s5442_s16, %s5443_s20  }
  0x58   :  { %s5314_s19 = scalar_lea.hbm %s8524_s6, 3072 }
  0x59   :  { %p5315_p12 = scmp.ne.s32.totalorder %s8524_s6, %s5314_s19  ;;  %p5318_p13 = scmp.lt.u32.totalorder %s5314_s19, %s8524_s6 }
  0x5b   :  { %p5320_p0 = pnand %p5318_p13, %p5315_p12 }
  0x5d   :  { %5323 = shalt.err (!%p5320_p0)
}
  0x5e   :  { %s5324_s28 = scalar_lea.vmem %s5591_s22, 3072  ;;  %p5329_p2 = scmp.lt.s32.totalorder %s5591_s22, %s5591_s22 }
  0x5f   :  { %p5325_p1 = scmp.ne.s32.totalorder %s5591_s22, %s5324_s28  ;;  %p5330_p3 = scmp.lt.s32.totalorder %s5324_s28, %s5324_s28 }
  0x61   :  { %p5331_p4 = por %p5330_p3, %p5329_p2 }
  0x63   :  { %p5332_p5 = pnand %p5331_p4, %p5325_p1 }
  0x65   :  { %5335 = shalt.err (!%p5332_p5)
}
  0x66   :  { %86 = dma.hbm_to_vmem [thread:$0]  %s8524_s6, 3072, %s5591_s22, [#allocation14], %s5438_s2, %s5438_s2, %s5439_s30  }
  0x67   :  { %s5446_s29 = smov [#allocation18]   ;;  %s5336_s26 = scalar_lea.hbm %s8528_s10, 1024 }
  0x68   :  { %s108_s15 = sshll.u32 %s5446_s29, 4  ;;  %p5337_p6 = scmp.ne.s32.totalorder %s8528_s10, %s5336_s26  ;;  %s109_s15 = int_to_ptr.vmem [resolvable:$true] %s108_s15 }
  0x69   :  { %p5340_p7 = scmp.lt.u32.totalorder %s5336_s26, %s8528_s10 }
  0x6b   :  { %p5342_p8 = pnand %p5340_p7, %p5337_p6 }
  0x6d   :  { %5345 = shalt.err (!%p5342_p8)
}
  0x6e   :  { %s5346_s21 = scalar_lea.vmem %s109_s15, 1024  ;;  %p5351_p10 = scmp.lt.s32.totalorder %s109_s15, %s109_s15 }
  0x6f   :  { %p5347_p9 = scmp.ne.s32.totalorder %s109_s15, %s5346_s21  ;;  %p5352_p11 = scmp.lt.s32.totalorder %s5346_s21, %s5346_s21 }
  0x71   :  { %p5353_p12 = por %p5352_p11, %p5351_p10 }
  0x73   :  { %p5354_p13 = pnand %p5353_p12, %p5347_p9 }
  0x75   :  { %5357 = shalt.err (!%p5354_p13)
}
  0x76   :  { %114 = dma.hbm_to_vmem [thread:$0]  %s8528_s10, 1024, %s109_s15, [#allocation17], %s5442_s16, %s5442_s16, %s5443_s20  }
  0x77   :  { %5424 = dma.done.wait [#allocation8], 128  }
  0x78   :  { %5425 = vsyncadd [#allocation8], 4294967168 }
  0x79   :  { %5426 = dma.done.wait [#allocation11], 8320  }
  0x7a   :  { %5427 = vsyncadd [#allocation11], 4294958976 }
  0x7b   :  { %5428 = dma.done.wait [#allocation14], 6144  }
  0x7c   :  { %5429 = vsyncadd [#allocation14], 4294961152 }
  0x7d   :  { %5430 = dma.done.wait [#allocation17], 2048  }
  0x7e   :  { %5431 = vsyncadd [#allocation17], 4294965248  ;;  %v8572_v0 = vmov 0.0   ;;  %v5448_v1 = vmov 0   ;;  %vm5449_vm0 = vmmov 0   ;;  %v8571_v22 = vlaneseq  ;;  %v143_v24 = vld [vmem:[#allocation7] sm:$0xff] }
  0x7f   :  { %4997 = vmatprep.subr.bf16.mxu1 %v8572_v0  ;;  %355 = vmatprep.mubr.bf16.mxu0 %v5448_v1  ;;  %v5106_v2 = vld [vmem:[#allocation13 + $0x4] ss:$12 sps:$4 sm:$0xff]   ;;  %v5108_v3 = vld [vmem:[#allocation13] ss:$12 sps:$4 sm:$0xff]   ;;  %v5109_v4 = vld [vmem:[#allocation13 + $0x1c] ss:$12 sps:$4 sm:$0xff]   ;;  %v145_v28 = vpack.c.bf16 %v143_v24, %v143_v24  ;;  %v1431_v36 = vstv %s8518_s0 }
  0x80   :  { %5013 = vmatprep.mubr.msk.bf16.mxu1 %vm5449_vm0, %v8572_v0  ;;  %5105 = vset.pattern.permute.xlu1 %v5448_v1  ;;  %v5111_v5 = vld [vmem:[#allocation13 + $0x18] ss:$12 sps:$4 sm:$0xff]   ;;  %v5112_v6 = vld [vmem:[#allocation13 + $0x34] ss:$12 sps:$4 sm:$0xff]   ;;  %v5114_v7 = vld [vmem:[#allocation13 + $0x30] ss:$12 sps:$4 sm:$0xff]  }
  0x81   :  { %5104 = vset.pattern.permute.xlu0 %v5448_v1  ;;  %323 = vmatprep.subr.bf16.mxu0 %v5106_v2  ;;  %v5115_v8 = vld [vmem:[#allocation13 + $0x4c] ss:$12 sps:$4 sm:$0xff]   ;;  %v5126_v9 = vld [vmem:[#allocation13 + $0x8] ss:$12 sps:$4 sm:$0xff]   ;;  %v5118_v11 = vld [vmem:[#allocation13 + $0x64] ss:$12 sps:$4 sm:$0xff]  }
  0x82   :  { %324 = vmatpush1.bf16.msra.mxu0 %v5108_v3  ;;  %v5117_v10 = vld [vmem:[#allocation13 + $0x48] ss:$12 sps:$4 sm:$0xff]   ;;  %4998 = vmatpush3.bf16.msra.mxu1 %v5126_v9  ;;  %v5130_v12 = vld [vmem:[#allocation13 + $0x20] ss:$12 sps:$4 sm:$0xff]   ;;  %v5132_v14 = vld [vmem:[#allocation13 + $0x38] ss:$12 sps:$4 sm:$0xff]  }
  0x83   :  { %325 = vmatprep.subr.bf16.mxu0 %v5109_v4  ;;  %4999 = vmatprep.subr.bf16.mxu1 %v8572_v0  ;;  %v5120_v13 = vld [vmem:[#allocation13 + $0x60] ss:$12 sps:$4 sm:$0xff]   ;;  %v5121_v15 = vld [vmem:[#allocation13 + $0x7c] ss:$12 sps:$4 sm:$0xff]   ;;  %v5123_v16 = vld [vmem:[#allocation13 + $0x78] ss:$12 sps:$4 sm:$0xff]  }
  0x84   :  { %v5136_v17 = vld [vmem:[#allocation13 + $0x50] ss:$12 sps:$4 sm:$0xff]   ;;  %v5124_v18 = vld [vmem:[#allocation13 + $0x94] ss:$12 sps:$4 sm:$0xff]   ;;  %v5128_v21 = vld [vmem:[#allocation13 + $0xac] ss:$12 sps:$4 sm:$0xff]  }
  0x85   :  { %v5127_v19 = vld [vmem:[#allocation13 + $0x90] ss:$12 sps:$4 sm:$0xff]   ;;  %v5140_v20 = vld [vmem:[#allocation13 + $0x68] ss:$12 sps:$4 sm:$0xff]   ;;  %v5144_v25 = vld [vmem:[#allocation13 + $0x80] ss:$12 sps:$4 sm:$0xff]  }
  0x86   :  { %326 = vmatpush1.bf16.msra.mxu0 %v5111_v5  ;;  %5000 = vmatpush3.bf16.msra.mxu1 %v5130_v12  ;;  %v5131_v23 = vld [vmem:[#allocation13 + $0xa8] ss:$12 sps:$4 sm:$0xff]   ;;  %v5135_v26 = vld [vmem:[#allocation15 + $0x4] ss:$12 sps:$4 sm:$0xff]   ;;  %v5655_v27 = vshrl.u32 %v8571_v22, 7  ;;  %v1430_v40 = vld [vmem:[%s8522_s4] sm:$0xff] }
  0x87   :  { %327 = vmatprep.subr.bf16.mxu0 %v5112_v6  ;;  %5001 = vmatprep.subr.bf16.mxu1 %v8572_v0  ;;  %v5133_v29 = vld [vmem:[#allocation15] ss:$12 sps:$4 sm:$0xff]   ;;  %v5148_v30 = vld [vmem:[#allocation13 + $0x98] ss:$12 sps:$4 sm:$0xff]   ;;  %v5139_v31 = vld [vmem:[#allocation15 + $0x1c] ss:$12 sps:$4 sm:$0xff]   ;;  %v5669_v41 = vmul.f32 %v1431_v36, %v1430_v40 }
  0x88   :  { %8801 = vst [vmem:[#allocation29_spill] sm:$0xff] %v5655_v27  ;;  %v5659_v32 = vsub.s32 0, %v5655_v27  ;;  %v5137_v33 = vld [vmem:[#allocation15 + $0x18] ss:$12 sps:$4 sm:$0xff]   ;;  %v5152_v34 = vld [vmem:[#allocation13 + $0xb0] ss:$12 sps:$4 sm:$0xff]  }
  0x89   :  { %v5143_v35 = vld [vmem:[#allocation15 + $0x34] ss:$12 sps:$4 sm:$0xff]   ;;  %v5141_v37 = vld [vmem:[#allocation15 + $0x30] ss:$12 sps:$4 sm:$0xff]   ;;  %v5147_v38 = vld [vmem:[#allocation15 + $0x4c] ss:$12 sps:$4 sm:$0xff]  }
  0x8a   :  { %328 = vmatpush1.bf16.msra.mxu0 %v5114_v7  ;;  %5002 = vmatpush3.bf16.msra.mxu1 %v5132_v14  ;;  %8802 = vst [vmem:[#allocation30_spill] sm:$0xff] %v5659_v32  ;;  %v5159_v39 = vld [vmem:[#allocation15 + $0x8] ss:$12 sps:$4 sm:$0xff]   ;;  %v5163_v43 = vld [vmem:[#allocation15 + $0x20] ss:$12 sps:$4 sm:$0xff]   ;;  %v5674_v44 = vrot.slane %v5669_v41, %v5659_v32  ;;  %v5690_v56 = vld [vmem:[#allocation10] sm:$0xff] }
  0x8b   :  { %329 = vmatprep.subr.bf16.mxu0 %v5115_v8  ;;  %5003 = vmatprep.subr.bf16.mxu1 %v8572_v0  ;;  %v5145_v42 = vld [vmem:[#allocation15 + $0x48] ss:$12 sps:$4 sm:$0xff]   ;;  %v5151_v45 = vld [vmem:[#allocation15 + $0x64] ss:$12 sps:$4 sm:$0xff]   ;;  %v5149_v46 = vld [vmem:[#allocation15 + $0x60] ss:$12 sps:$4 sm:$0xff]   ;;  %v404_v58 = vpack.c.bf16 %v5690_v56, %v5690_v56 }
  0x8c   :  { %v5164_v47 = vld [vmem:[#allocation15 + $0x38] ss:$12 sps:$4 sm:$0xff]   ;;  %1443 = vbcast.lane.b32.xlu1 %v5674_v44, 264  ;;  %v5155_v48 = vld [vmem:[#allocation15 + $0x7c] ss:$12 sps:$4 sm:$0xff]   ;;  %1439 = vbcast.lane.b32.xlu0 %v5674_v44, 256 }
  0x8d   :  { %v5153_v49 = vld [vmem:[#allocation15 + $0x78] ss:$12 sps:$4 sm:$0xff]   ;;  %v5165_v50 = vld [vmem:[#allocation15 + $0x50] ss:$12 sps:$4 sm:$0xff]   ;;  %v5158_v51 = vld [vmem:[#allocation15 + $0x94] ss:$12 sps:$4 sm:$0xff]  }
  0x8e   :  { %330 = vmatpush1.bf16.msra.mxu0 %v5117_v10  ;;  %5004 = vmatpush3.bf16.msra.mxu1 %v5136_v17  ;;  %v5156_v52 = vld [vmem:[#allocation15 + $0x90] ss:$12 sps:$4 sm:$0xff]   ;;  %v5166_v53 = vld [vmem:[#allocation15 + $0x68] ss:$12 sps:$4 sm:$0xff]   ;;  %v5162_v54 = vld [vmem:[#allocation15 + $0xac] ss:$12 sps:$4 sm:$0xff]  }
  0x8f   :  { %331 = vmatprep.subr.bf16.mxu0 %v5118_v11  ;;  %5005 = vmatprep.subr.bf16.mxu1 %v8572_v0  ;;  %v5160_v55 = vld [vmem:[#allocation15 + $0xa8] ss:$12 sps:$4 sm:$0xff]   ;;  %v5167_v57 = vld [vmem:[#allocation15 + $0x80] ss:$12 sps:$4 sm:$0xff]   ;;  %v5168_v59 = vld [vmem:[#allocation15 + $0x98] ss:$12 sps:$4 sm:$0xff]  }
  0x90   :  { %1447 = vbcast.lane.b32.xlu1 %v5674_v44, 272  ;;  %1455 = vbcast.lane.b32.xlu0 %v5674_v44, 288  ;;  %v5702_v60 = vsub.s32 1, %v5655_v27  ;;  %v5169_v61 = vld [vmem:[#allocation15 + $0xb0] ss:$12 sps:$4 sm:$0xff]   ;;  %v5717_v63 = vsub.s32 2, %v5655_v27 }
  0x91   :  { %v5170_v2 = vld [vmem:[#allocation16] sm:$0xff]   ;;  %v5171_v3 = vld [vmem:[#allocation16 + $0x8] sm:$0xff]   ;;  %v5172_v4 = vld [vmem:[#allocation16 + $0x10] sm:$0xff]   ;;  %vm8797_vm1 = vcmask 7168   ;;  %vm2747_vm2 = vcmask 130112   ;;  %vm2754_vm3 = vcmask 195712  }
  0x92   :  { %332 = vmatpush1.bf16.msra.mxu0 %v5120_v13  ;;  %5006 = vmatpush3.bf16.msra.mxu1 %v5140_v20  ;;  %8803 = vst [vmem:[#allocation31_spill] sm:$0xff] %v5702_v60  ;;  %v1504_v62 = vrot.slane %v5669_v41, %v5702_v60  ;;  %8804 = vst [vmem:[#allocation32_spill] sm:$0xff] %v5717_v63  ;;  %v5173_v5 = vld [vmem:[#allocation16 + $0x18] sm:$0xff]   ;;  %v5174_v6 = vld [vmem:[#allocation16 + $0x20] sm:$0xff]   ;;  %vm2761_vm4 = vcmask 261312   ;;  %vm2768_vm5 = vcmask 326912  }
  0x93   :  { %333 = vmatprep.subr.bf16.mxu0 %v5121_v15  ;;  %5007 = vmatprep.subr.bf16.mxu1 %v8572_v0  ;;  %v5175_v7 = vld [vmem:[#allocation16 + $0x28] sm:$0xff]   ;;  %v5176_v8 = vld [vmem:[#allocation16 + $0x30] sm:$0xff]   ;;  %v5177_v9 = vld [vmem:[#allocation16 + $0x38] sm:$0xff]   ;;  %vm2775_vm6 = vcmask 392512   ;;  %vm2782_vm7 = vcmask 458112   ;;  %vm2789_vm8 = vcmask 523712  }
  0x94   :  { %1451 = vbcast.lane.b32.xlu1 %v5674_v44, 280  ;;  %1463 = vbcast.lane.b32.xlu0 %v5674_v44, 304  ;;  %v437_v14 = vld [vmem:[%s8526_s8] sm:$0x7]  ;;  %v6036_v22 = vld [vmem:[#allocation12 + $0xa8] sm:$0xff]   ;;  %vm2796_vm9 = vcmask 589312  }
  0x95   :  { %v178_v15 = vld [vmem:[%s8525_s7] sm:$0x7]  ;;  %v442_v17 = vrot.slane %v437_v14, %v5659_v32  ;;  %8827 = vst [vmem:[#allocation55_spill] sm:$0xff] %v6036_v22  ;;  %vm2803_vm10 = vcmask 654912   ;;  %vm2810_vm11 = vcmask 720512   ;;  %vm2817_vm12 = vcmask 786112  }
  0x96   :  { %334 = vmatpush1.bf16.msra.mxu0 %v5123_v16  ;;  %5008 = vmatpush3.bf16.msra.mxu1 %v5144_v25  ;;  %v183_v16 = vrot.slane %v178_v15, %v5659_v32  ;;  %vm8798_vm13 = vcmask 851712   ;;  %vm2831_vm14 = vcmask 917312   ;;  %vm2838_vm15 = vcmask 982912   ;;  %s5452_s7 = smov [#allocation19]  }
  0x97   :  { %335 = vmatprep.subr.bf16.mxu0 %v5124_v18  ;;  %5009 = vmatprep.subr.bf16.mxu1 %v8572_v0  ;;  %v187_v18 = vrot.slane %v178_v15, %v5702_v60  ;;  %s4536_s8 = sshll.u32 %s5452_s7, 4  ;;  %s4537_s8 = int_to_ptr.vmem [resolvable:$true] %s4536_s8 }
  0x98   :  { %1459 = vbcast.lane.b32.xlu1 %v5674_v44, 296  ;;  %1471 = vbcast.lane.b32.xlu0 %v5674_v44, 320  ;;  %v5077_v20 = vadd.f32 %v442_v17, %v183_v16  ;;  %s5358_s25 = scalar_lea.vmem %s4537_s8, 128  ;;  %p5363_p1 = scmp.lt.s32.totalorder %s4537_s8, %s4537_s8 }
  0x99   :  { %p5359_p0 = scmp.ne.s32.totalorder %s4537_s8, %s5358_s25  ;;  %p5364_p2 = scmp.lt.s32.totalorder %s5358_s25, %s5358_s25 }
  0x9a   :  { %336 = vmatpush1.bf16.msra.mxu0 %v5127_v19  ;;  %5010 = vmatpush3.bf16.msra.mxu1 %v5148_v30  ;;  %v446_v19 = vrot.slane %v437_v14, %v5702_v60 }
  0x9b   :  { %337 = vmatprep.subr.bf16.mxu0 %v5128_v21  ;;  %5011 = vmatprep.subr.bf16.mxu1 %v8572_v0  ;;  %p5365_p3 = por %p5364_p2, %p5363_p1 }
  0x9c   :  { %1467 = vbcast.lane.b32.xlu1 %v5674_v44, 312  ;;  %1479 = vbcast.lane.b32.xlu0 %v5674_v44, 336 }
  0x9d   :  { %p5366_p4 = pnand %p5365_p3, %p5359_p0 }
  0x9e   :  { %338 = vmatpush1.bf16.msra.mxu0 %v5131_v23  ;;  %5012 = vmatpush3.bf16.msra.mxu1 %v5152_v34  ;;  %v5079_v23 = vadd.f32 %v446_v19, %v187_v18  ;;  %v5788_v19 = vld [vmem:[#allocation12 + $0x10] sm:$0xff]  }
  0x9f   :  { %582 = vmatprep.subr.bf16.mxu0 %v5135_v26  ;;  %5017 = vmatprep.subr.bf16.mxu1 %v8572_v0  ;;  %8807 = vst [vmem:[#allocation35_spill] sm:$0xff] %v5788_v19 }
  0xa0   :  { %1475 = vbcast.lane.b32.xlu1 %v5674_v44, 328  ;;  %1487 = vbcast.lane.b32.xlu0 %v5674_v44, 352 }
  0xa1   :  { %356 = vmatmul.mubr.bf16.vlgmr.msra.gmra.mrb[0].mxu0 %v145_v28  ;;  %5014 = vmatmul.mubr.bf16.vlgmr.msra.gmra.mrb[0].mxu1 %v145_v28 }
  0xa2   :  { %583 = vmatpush1.bf16.msra.mxu0 %v5133_v29  ;;  %614 = vmatprep.mubr.bf16.mxu0 %v5448_v1  ;;  %v5721_v1 = vrot.slane %v5669_v41, %v5717_v63 }
  0xa3   :  { %584 = vmatprep.subr.bf16.mxu0 %v5139_v31  ;;  %5018 = vmatpush3.bf16.msra.mxu1 %v5159_v39  ;;  %v450_v39 = vrot.slane %v437_v14, %v5717_v63 }
  0xa4   :  { %5019 = vmatprep.subr.bf16.mxu1 %v8572_v0  ;;  %5033 = vmatprep.mubr.msk.bf16.mxu1 %vm5449_vm0, %v8572_v0 }
  0xa5   :  { %1483 = vbcast.lane.b32.xlu1 %v5674_v44, 344  ;;  %1495 = vbcast.lane.b32.xlu0 %v5674_v44, 368 }
  0xa6   :  { %585 = vmatpush1.bf16.msra.mxu0 %v5137_v33 }
  0xa7   :  { %586 = vmatprep.subr.bf16.mxu0 %v5143_v35  ;;  %5020 = vmatpush3.bf16.msra.mxu1 %v5163_v43 }
  0xa8   :  { %5021 = vmatprep.subr.bf16.mxu1 %v8572_v0 }
  0xa9   :  { %1491 = vbcast.lane.b32.xlu1 %v5674_v44, 360  ;;  %1506 = vbcast.lane.b32.xlu0 %v1504_v62, 256 }
  0xaa   :  { %587 = vmatpush1.bf16.msra.mxu0 %v5141_v37 }
  0xab   :  { %588 = vmatprep.subr.bf16.mxu0 %v5147_v38  ;;  %5022 = vmatpush3.bf16.msra.mxu1 %v5164_v47 }
  0xac   :  { %5023 = vmatprep.subr.bf16.mxu1 %v8572_v0 }
  0xad   :  { %1499 = vbcast.lane.b32.xlu1 %v5674_v44, 376  ;;  %1514 = vbcast.lane.b32.xlu0 %v1504_v62, 272 }
  0xae   :  { %589 = vmatpush1.bf16.msra.mxu0 %v5145_v42  ;;  %v191_v42 = vrot.slane %v178_v15, %v5717_v63  ;;  %v6249_v63 = vld [vmem:[#allocation12 + $0xe8] sm:$0xff]  }
  0xaf   :  { %590 = vmatprep.subr.bf16.mxu0 %v5151_v45  ;;  %5024 = vmatpush3.bf16.msra.mxu1 %v5165_v50  ;;  %8865 = vst [vmem:[#allocation93_spill] sm:$0xff] %v6249_v63  ;;  %v8687_v60 = vunpack.c.l.bf16 %v6249_v63 }
  0xb0   :  { %5025 = vmatprep.subr.bf16.mxu1 %v8572_v0 }
  0xb1   :  { %1510 = vbcast.lane.b32.xlu1 %v1504_v62, 264  ;;  %1522 = vbcast.lane.b32.xlu0 %v1504_v62, 288 }
  0xb2   :  { %591 = vmatpush1.bf16.msra.mxu0 %v5149_v46 }
  0xb3   :  { %592 = vmatprep.subr.bf16.mxu0 %v5155_v48  ;;  %5026 = vmatpush3.bf16.msra.mxu1 %v5166_v53 }
  0xb4   :  { %5027 = vmatprep.subr.bf16.mxu1 %v8572_v0 }
  0xb5   :  { %1518 = vbcast.lane.b32.xlu1 %v1504_v62, 280  ;;  %1530 = vbcast.lane.b32.xlu0 %v1504_v62, 304 }
  0xb6   :  { %593 = vmatpush1.bf16.msra.mxu0 %v5153_v49 }
  0xb7   :  { %594 = vmatprep.subr.bf16.mxu0 %v5158_v51  ;;  %5028 = vmatpush3.bf16.msra.mxu1 %v5167_v57  ;;  %v5450_v57 = vmov 1966171168  }
  0xb8   :  { %5029 = vmatprep.subr.bf16.mxu1 %v8572_v0 }
  0xb9   :  { %1526 = vbcast.lane.b32.xlu1 %v1504_v62, 296  ;;  %1538 = vbcast.lane.b32.xlu0 %v1504_v62, 320 }
  0xba   :  { %595 = vmatpush1.bf16.msra.mxu0 %v5156_v52 }
  0xbb   :  { %596 = vmatprep.subr.bf16.mxu0 %v5162_v54  ;;  %5030 = vmatpush3.bf16.msra.mxu1 %v5168_v59 }
  0xbc   :  { %5031 = vmatprep.subr.bf16.mxu1 %v8572_v0 }
  0xbd   :  { %1534 = vbcast.lane.b32.xlu1 %v1504_v62, 312  ;;  %1546 = vbcast.lane.b32.xlu0 %v1504_v62, 336 }
  0xbe   :  { %597 = vmatpush1.bf16.msra.mxu0 %v5160_v55 }
  0xbf   :  { %5037 = vmatprep.subr.bf16.mxu0 %v8572_v0  ;;  %5032 = vmatpush3.bf16.msra.mxu1 %v5169_v61 }
  0xc0   :  { %5057 = vmatprep.subr.bf16.mxu1 %v8572_v0 }
  0xc1   :  { %615 = vmatmul.mubr.bf16.vlgmr.msra.gmra.mrb[0].mxu0 %v404_v58  ;;  %1542 = vbcast.lane.b32.xlu1 %v1504_v62, 328 }
  0xc2   :  { %5053 = vmatprep.mubr.msk.bf16.mxu0 %vm5449_vm0, %v8572_v0  ;;  %5034 = vmatmul.mubr.bf16.vlgmr.msra.gmra.mrb[4].mxu1 %v404_v58  ;;  %v952_v58 = vunpack.c.l.s4 %v5450_v57 }
  0xc3   :  { %5073 = vmatprep.mubr.msk.bf16.mxu1 %vm5449_vm0, %v8572_v0  ;;  %1554 = vbcast.lane.b32.xlu0 %v1504_v62, 352  ;;  %vm2845_vm0 = vcmask 1048512  }
  0xc4   :  { %5058 = vmatpush3.bf16.msra.mxu1 %v5170_v2  ;;  %v953_v59 = vunpack.c.0.s8 %v952_v58 }
  0xc5   :  { %1550 = vbcast.lane.b32.xlu1 %v1504_v62, 344  ;;  %5059 = vmatprep.subr.bf16.mxu1 %v8572_v0 }
  0xc6   :  { %v5757_v61 = vsub.s32 %v953_v59, %v5655_v27 }
  0xc7   :  { %1562 = vbcast.lane.b32.xlu0 %v1504_v62, 368 }
  0xc8   :  { %5060 = vmatpush3.bf16.msra.mxu1 %v5171_v3 }
  0xc9   :  { %1558 = vbcast.lane.b32.xlu1 %v1504_v62, 360  ;;  %5061 = vmatprep.subr.bf16.mxu1 %v8572_v0 }
  0xcb   :  { %1573 = vbcast.lane.b32.xlu0 %v5721_v1, 256 }
  0xcc   :  { %5062 = vmatpush3.bf16.msra.mxu1 %v5172_v4 }
  0xcd   :  { %1566 = vbcast.lane.b32.xlu1 %v1504_v62, 376  ;;  %5063 = vmatprep.subr.bf16.mxu1 %v8572_v0 }
  0xcf   :  { %1581 = vbcast.lane.b32.xlu0 %v5721_v1, 272 }
  0xd0   :  { %5064 = vmatpush3.bf16.msra.mxu1 %v5173_v5 }
  0xd1   :  { %1577 = vbcast.lane.b32.xlu1 %v5721_v1, 264  ;;  %5065 = vmatprep.subr.bf16.mxu1 %v8572_v0 }
  0xd3   :  { %1589 = vbcast.lane.b32.xlu0 %v5721_v1, 288 }
  0xd4   :  { %5066 = vmatpush3.bf16.msra.mxu1 %v5174_v6  ;;  %v5760_v6 = vld [vmem:[#allocation12 + $0x8] sm:$0xff]  }
  0xd5   :  { %1585 = vbcast.lane.b32.xlu1 %v5721_v1, 280  ;;  %5067 = vmatprep.subr.bf16.mxu1 %v8572_v0  ;;  %8805 = vst [vmem:[#allocation33_spill] sm:$0xff] %v5760_v6  ;;  %v8563_v17 = vunpack.c.h.bf16 %v5760_v6 }
  0xd7   :  { %1597 = vbcast.lane.b32.xlu0 %v5721_v1, 304 }
  0xd8   :  { %5068 = vmatpush3.bf16.msra.mxu1 %v5175_v7 }
  0xd9   :  { %1593 = vbcast.lane.b32.xlu1 %v5721_v1, 296  ;;  %5069 = vmatprep.subr.bf16.mxu1 %v8572_v0 }
  0xdb   :  { %1605 = vbcast.lane.b32.xlu0 %v5721_v1, 320 }
  0xdc   :  { %5070 = vmatpush3.bf16.msra.mxu1 %v5176_v8 }
  0xdd   :  { %1601 = vbcast.lane.b32.xlu1 %v5721_v1, 312  ;;  %5071 = vmatprep.subr.bf16.mxu1 %v8572_v0 }
  0xdf   :  { %1613 = vbcast.lane.b32.xlu0 %v5721_v1, 336 }
  0xe0   :  { %5072 = vmatpush3.bf16.msra.mxu1 %v5177_v9  ;;  %v8566_v9 = vunpack.c.l.bf16 %v5760_v6 }
  0xe1   :  { %1609 = vbcast.lane.b32.xlu1 %v5721_v1, 328 }
  0xe3   :  { %1621 = vbcast.lane.b32.xlu0 %v5721_v1, 352 }
  0xe5   :  { %1617 = vbcast.lane.b32.xlu1 %v5721_v1, 344 }
 0x174   :  { %v398_v10 = vpop.f32.mrb[0].mxu1 }
 0x175   :  { %v5015_v11 = vpop.f32.mrb[1].mxu1  ;;  %v399_v46 = vadd.f32 %v398_v10, %v191_v42 }
 0x176   :  { %v401_v12 = vpop.f32.mrb[2].mxu1 }
 0x177   :  { %v5016_v13 = vpop.f32.mrb[3].mxu1 }
 0x194   :  { %v616_v21 = vpop.f32.mrb[0].mxu0 }
 0x195   :  { %v5078_v24 = vadd.f32 %v5077_v20, %v616_v21  ;;  %v618_v25 = vpop.f32.mrb[1].mxu0  ;;  %v657_v33 = vpop.f32.mrb[4].mxu1 }
 0x196   :  { %v620_v26 = vpop.f32.mrb[2].mxu0  ;;  %v5080_v30 = vadd.f32 %v5079_v23, %v618_v25  ;;  %v5035_v34 = vpop.f32.mrb[5].mxu1  ;;  %v658_v44 = vadd.f32 %v657_v33, %v450_v39  ;;  %v8556_v23 = vunpack.c.h.bf16 %v5788_v19  ;;  %v5798_v25 = vld [vmem:[#allocation12 + $0x18] sm:$0xff]   ;;  %v5810_v33 = vld [vmem:[#allocation12 + $0x20] sm:$0xff]  }
 0x197   :  { %v4623_v28 = vmul.f32 -1.442695, %v5078_v24  ;;  %v621_v29 = vpop.f32.mrb[3].mxu0  ;;  %v660_v35 = vpop.f32.mrb[6].mxu1  ;;  %v8562_v24 = vunpack.c.l.bf16 %v5788_v19  ;;  %8808 = vst [vmem:[#allocation36_spill] sm:$0xff] %v5798_v25  ;;  %8809 = vst [vmem:[#allocation37_spill] sm:$0xff] %v5810_v33 }
 0x198   :  { %v4624_v31 = vmul.f32 -1.442695, %v5080_v30  ;;  %v5036_v36 = vpop.f32.mrb[7].mxu1  ;;  %v5800_v26 = vpop.permute.xlu1 %1443  ;;  %v8547_v30 = vunpack.c.h.bf16 %v5798_v25 }
 0x199   :  { %5186 = vpow2.f32 %v4623_v28  ;;  %v8539_v36 = vunpack.c.h.bf16 %v5810_v33  ;;  %v5822_v39 = vpop.permute.xlu0 %1439 }
 0x19a   :  { %5188 = vpow2.f32 %v4624_v31  ;;  %v8555_v31 = vunpack.c.l.bf16 %v5798_v25 }
 0x1a3   :  { %v5187_v37 = vpop.eup %5186 }
 0x1a4   :  { %v667_v38 = vadd.f32 1.0, %v5187_v37  ;;  %v5189_v40 = vpop.eup %5188  ;;  %v8541_v37 = vunpack.c.l.bf16 %v5810_v33  ;;  %v6116_v33 = vld [vmem:[#allocation12 + $0x118] sm:$0xff]  }
 0x1a5   :  { %v674_v43 = vadd.f32 1.0, %v5189_v40  ;;  %v5824_v40 = vld [vmem:[#allocation12 + $0x28] sm:$0xff]   ;;  %8841 = vst [vmem:[#allocation69_spill] sm:$0xff] %v6116_v33 }
 0x1a6   :  { %5190 = vrcp.f32 %v667_v38  ;;  %v5820_v38 = vpop.permute.xlu1 %1447  ;;  %8810 = vst [vmem:[#allocation38_spill] sm:$0xff] %v5824_v40 }
 0x1a7   :  { %5192 = vrcp.f32 %v674_v43 }
 0x1b0   :  { %v5191_v45 = vpop.eup %5190 }
 0x1b1   :  { %v677_v47 = vmul.f32 %v5191_v45, %v658_v44  ;;  %v5193_v49 = vpop.eup %5192  ;;  %v8537_v44 = vunpack.c.h.bf16 %v5824_v40  ;;  %v8538_v45 = vunpack.c.l.bf16 %v5824_v40 }
 0x1b2   :  { %v680_v50 = vsub.f32 1.0, %v5193_v49  ;;  %v682_v52 = vmul.f32 %v5193_v49, %v5690_v56  ;;  %v5762_v56 = vld [vmem:[#allocation12] sm:$0xff]  }
 0x1b3   :  { %v678_v48 = vadd.f32 %v677_v47, %v399_v46  ;;  %8806 = vst [vmem:[#allocation34_spill] sm:$0xff] %v5762_v56  ;;  %v8568_v10 = vunpack.c.l.bf16 %v5762_v56  ;;  %v8567_v18 = vunpack.c.h.bf16 %v5762_v56  ;;  %v5834_v46 = vld [vmem:[#allocation12 + $0x30] sm:$0xff]   ;;  %v5836_v47 = vpop.permute.xlu1 %1451  ;;  %v6225_v56 = vld [vmem:[#allocation12 + $0xd8] sm:$0xff]  }
 0x1b4   :  { %8811 = vst [vmem:[#allocation39_spill] sm:$0xff] %v5834_v46  ;;  %v8535_v49 = vunpack.c.h.bf16 %v5834_v46  ;;  %8861 = vst [vmem:[#allocation89_spill] sm:$0xff] %v6225_v56 }
 0x1b5   :  { %5194 = vtanh.f32 %v678_v48  ;;  %v5838_v48 = vpop.permute.xlu0 %1455 }
 0x1bf   :  { %v5195_v51 = vpop.eup %5194 }
 0x1c0   :  { %v681_v53 = vmul.f32 %v5195_v51, %v680_v50 }
 0x1c2   :  { %v683_v54 = vadd.f32 %v682_v52, %v681_v53  ;;  %v8536_v53 = vunpack.c.l.bf16 %v5834_v46 }
 0x1c4   :  { %v685_v55 = vpack.c.bf16 %v683_v54, %v683_v54  ;;  %684 = vst [vmem:[#allocation19] sm:$0xff] %v683_v54  ;;  %v5848_v54 = vld [vmem:[#allocation12 + $0x38] sm:$0xff]  }
 0x1c5   :  { %8812 = vst [vmem:[#allocation40_spill] sm:$0xff] %v5848_v54 }
 0x1c6   :  { %686 = vst [vmem:[#allocation2] sm:$0xf] %v685_v55  ;;  %v8533_v55 = vunpack.c.h.bf16 %v5848_v54 }
 0x1cd   :  { %v947_v62 = vld [vmem:[#allocation2] sm:$0xf] }
 0x1ce   :  { %v4310_v2 = vld [vmem:[#allocation2] sm:$0xf]  ;;  %v948_v3 = vunpack.c.l.bf16 %v947_v62  ;;  %v8534_v62 = vunpack.c.l.bf16 %v5848_v54  ;;  %v6050_v54 = vld [vmem:[#allocation12 + $0xb0] sm:$0xff]  }
 0x1cf   :  { %5074 = vmatmul.mubr.bf16.vlgmr.msra.gmra.mrb[8].mxu1 %v4310_v2  ;;  %v5861_v2 = vld [vmem:[#allocation12 + $0x40] sm:$0xff]   ;;  %8830 = vst [vmem:[#allocation58_spill] sm:$0xff] %v6050_v54 }
 0x1d0   :  { %v950_v4 = vcombine.high %v948_v3, %v948_v3  ;;  %v957_v5 = vrot.slane %v948_v3, %v5757_v61  ;;  %8813 = vst [vmem:[#allocation41_spill] sm:$0xff] %v5861_v2  ;;  %v5863_v3 = vpop.permute.xlu1 %1459 }
 0x1d2   :  { %v964_v7 = vrot.slane %v950_v4, %v5757_v61  ;;  %v5766_v8 = vrot.slane %v957_v5, %v5757_v61  ;;  %v965_v50 = vcombine.high %v957_v5, %v957_v5  ;;  %v5865_v4 = vpop.permute.xlu0 %1463 }
 0x1d4   :  { %v966_v11 = vcombine.high %v964_v7, %v964_v7  ;;  %v5771_v12 = vrot.slane %v964_v7, %v5757_v61  ;;  %v5775_v13 = vrot.slane %v5766_v8, %v5659_v32  ;;  %v5852_v57 = vrot.slane %v965_v50, %v5757_v61 }
 0x1d6   :  { %v5778_v14 = vrot.slane %v966_v11, %v5757_v61  ;;  %v1041_v15 = vmul.f32 %v8566_v9, %v5775_v13  ;;  %v1039_v16 = vmul.f32 %v8568_v10, %v5775_v13  ;;  %v1042_v20 = vmul.f32 %v8563_v17, %v5775_v13  ;;  %v6012_v17 = vld [vmem:[#allocation12 + $0x98] sm:$0xff]   ;;  %v6026_v10 = vld [vmem:[#allocation12 + $0xa0] sm:$0xff]  }
 0x1d7   :  { %v1040_v21 = vmul.f32 %v8567_v18, %v5775_v13  ;;  %v1044_v28 = vmul.f32 %v8556_v23, %v5775_v13  ;;  %v1043_v29 = vmul.f32 %v8562_v24, %v5775_v13  ;;  %v1046_v34 = vmul.f32 %v8547_v30, %v5775_v13  ;;  %8824 = vst [vmem:[#allocation52_spill] sm:$0xff] %v6012_v17 }
 0x1d8   :  { %1171 = vadd.xlane.f32.xlu1 %v1041_v15  ;;  %1167 = vadd.xlane.f32.xlu0 %v1039_v16  ;;  %v1045_v35 = vmul.f32 %v8555_v31, %v5775_v13  ;;  %v1048_v42 = vmul.f32 %v8539_v36, %v5775_v13  ;;  %v1047_v43 = vmul.f32 %v8541_v37, %v5775_v13  ;;  %v8559_v61 = vunpack.c.h.bf16 %v5861_v2  ;;  %v5879_v16 = vld [vmem:[#allocation12 + $0x48] sm:$0xff]  }
 0x1d9   :  { %v1050_v51 = vmul.f32 %v8537_v44, %v5775_v13  ;;  %v1049_v52 = vmul.f32 %v8538_v45, %v5775_v13  ;;  %v1052_v58 = vmul.f32 %v8535_v49, %v5775_v13  ;;  %v1051_v59 = vmul.f32 %v8536_v53, %v5775_v13  ;;  %8814 = vst [vmem:[#allocation42_spill] sm:$0xff] %v5879_v16  ;;  %v5931_v45 = vld [vmem:[#allocation12 + $0x68] sm:$0xff]  }
 0x1da   :  { %v5870_v5 = vrot.slane %v5852_v57, %v5659_v32  ;;  %v1054_v7 = vmul.f32 %v8533_v55, %v5775_v13  ;;  %v1053_v11 = vmul.f32 %v8534_v62, %v5775_v13  ;;  %v8552_v15 = vunpack.c.l.bf16 %v5861_v2  ;;  %v5917_v55 = vld [vmem:[#allocation12 + $0x60] sm:$0xff]   ;;  %8818 = vst [vmem:[#allocation46_spill] sm:$0xff] %v5931_v45  ;;  %8826 = vst [vmem:[#allocation54_spill] sm:$0xff] %v6026_v10  ;;  %v6168_v2 = vld [vmem:[#allocation12 + $0x138] sm:$0xff]  }
 0x1db   :  { %v8550_v13 = vunpack.c.h.bf16 %v5879_v16  ;;  %8817 = vst [vmem:[#allocation45_spill] sm:$0xff] %v5917_v55  ;;  %v8544_v53 = vunpack.c.h.bf16 %v5917_v55  ;;  %v8545_v44 = vunpack.c.l.bf16 %v5917_v55  ;;  %v8548_v36 = vunpack.c.h.bf16 %v5931_v45  ;;  %8851 = vst [vmem:[#allocation79_spill] sm:$0xff] %v6168_v2 }
 0x1dc   :  { %1173 = vadd.xlane.f32.xlu1 %v1042_v20  ;;  %1169 = vadd.xlane.f32.xlu0 %v1040_v21  ;;  %v5881_v20 = vpop.permute.xlu1 %1467  ;;  %v5883_v21 = vpop.permute.xlu0 %1471 }
 0x1e0   :  { %1177 = vadd.xlane.f32.xlu1 %v1044_v28  ;;  %1175 = vadd.xlane.f32.xlu0 %v1043_v29  ;;  %v1056_v28 = vmul.f32 %v8559_v61, %v5870_v5  ;;  %v1055_v29 = vmul.f32 %v8552_v15, %v5870_v5 }
 0x1e4   :  { %1181 = vadd.xlane.f32.xlu1 %v1046_v34  ;;  %1179 = vadd.xlane.f32.xlu0 %v1045_v35  ;;  %v8551_v34 = vunpack.c.l.bf16 %v5879_v16  ;;  %v5893_v35 = vld [vmem:[#allocation12 + $0x50] sm:$0xff]   ;;  %v6144_v16 = vld [vmem:[#allocation12 + $0x128] sm:$0xff]  }
 0x1e5   :  { %8815 = vst [vmem:[#allocation43_spill] sm:$0xff] %v5893_v35  ;;  %v8543_v50 = vunpack.c.h.bf16 %v5893_v35  ;;  %8847 = vst [vmem:[#allocation75_spill] sm:$0xff] %v6144_v16 }
 0x1e8   :  { %1185 = vadd.xlane.f32.xlu1 %v1048_v42  ;;  %1183 = vadd.xlane.f32.xlu0 %v1047_v43  ;;  %v1058_v42 = vmul.f32 %v8550_v13, %v5870_v5  ;;  %v1057_v43 = vmul.f32 %v8551_v34, %v5870_v5 }
 0x1ec   :  { %1189 = vadd.xlane.f32.xlu1 %v1050_v51  ;;  %1187 = vadd.xlane.f32.xlu0 %v1049_v52  ;;  %v8546_v51 = vunpack.c.l.bf16 %v5893_v35  ;;  %v5903_v52 = vpop.permute.xlu1 %1475 }
 0x1f0   :  { %1193 = vadd.xlane.f32.xlu1 %v1052_v58  ;;  %1191 = vadd.xlane.f32.xlu0 %v1051_v59  ;;  %v5905_v58 = vpop.permute.xlu0 %1479  ;;  %v5907_v59 = vld [vmem:[#allocation12 + $0x58] sm:$0xff]   ;;  %v5919_v62 = vpop.permute.xlu1 %1483 }
 0x1f1   :  { %8816 = vst [vmem:[#allocation44_spill] sm:$0xff] %v5907_v59 }
 0x1f4   :  { %1197 = vadd.xlane.f32.xlu1 %v1054_v7  ;;  %1195 = vadd.xlane.f32.xlu0 %v1053_v11  ;;  %v1060_v7 = vmul.f32 %v8543_v50, %v5870_v5  ;;  %v1059_v11 = vmul.f32 %v8546_v51, %v5870_v5  ;;  %v5941_v37 = vpop.permute.xlu1 %1491  ;;  %v5945_v50 = vld [vmem:[#allocation12 + $0x70] sm:$0xff]   ;;  %v5955_v51 = vld [vmem:[#allocation12 + $0x78] sm:$0xff]  }
 0x1f5   :  { %8819 = vst [vmem:[#allocation47_spill] sm:$0xff] %v5945_v50  ;;  %8820 = vst [vmem:[#allocation48_spill] sm:$0xff] %v5955_v51 }
 0x1f8   :  { %1201 = vadd.xlane.f32.xlu1 %v1056_v28  ;;  %1199 = vadd.xlane.f32.xlu0 %v1055_v29  ;;  %v8540_v28 = vunpack.c.h.bf16 %v5907_v59  ;;  %v8542_v29 = vunpack.c.l.bf16 %v5907_v59  ;;  %v5957_v30 = vpop.permute.xlu1 %1499  ;;  %v8629_v59 = vunpack.c.l.bf16 %v6116_v33 }
 0x1fa   :  { %v1061_v49 = vmul.f32 %v8542_v29, %v5870_v5 }
 0x1fc   :  { %1205 = vadd.xlane.f32.xlu1 %v1058_v42  ;;  %1203 = vadd.xlane.f32.xlu0 %v1057_v43  ;;  %v5921_v42 = vpop.permute.xlu0 %1487  ;;  %v1062_v43 = vmul.f32 %v8540_v28, %v5870_v5  ;;  %v8549_v28 = vunpack.c.l.bf16 %v5931_v45  ;;  %v5984_v31 = vpop.permute.xlu1 %1510  ;;  %v6064_v45 = vld [vmem:[#allocation12 + $0xb8] sm:$0xff]  }
 0x1fd   :  { %8833 = vst [vmem:[#allocation61_spill] sm:$0xff] %v6064_v45 }
 0x200   :  { %1209 = vadd.xlane.f32.xlu1 %v1060_v7  ;;  %1207 = vadd.xlane.f32.xlu0 %v1059_v11  ;;  %v1064_v7 = vmul.f32 %v8544_v53, %v5870_v5  ;;  %v1063_v11 = vmul.f32 %v8545_v44, %v5870_v5  ;;  %v5943_v29 = vpop.permute.xlu0 %1495  ;;  %v8553_v53 = vunpack.c.h.bf16 %v5945_v50  ;;  %v8554_v44 = vunpack.c.l.bf16 %v5945_v50  ;;  %v6000_v61 = vpop.permute.xlu1 %1518 }
 0x202   :  { %v1067_v13 = vmul.f32 %v8554_v44, %v5870_v5 }
 0x204   :  { %1213 = vadd.xlane.f32.xlu1 %v1062_v43  ;;  %1211 = vadd.xlane.f32.xlu0 %v1061_v49  ;;  %v1066_v49 = vmul.f32 %v8548_v36, %v5870_v5  ;;  %v1065_v43 = vmul.f32 %v8549_v28, %v5870_v5  ;;  %v995_v36 = vcombine.high %v5766_v8, %v5766_v8  ;;  %v6022_v9 = vpop.permute.xlu1 %1526 }
 0x205   :  { %v1068_v28 = vmul.f32 %v8553_v53, %v5870_v5 }
 0x206   :  { %v5975_v15 = vrot.slane %v995_v36, %v5659_v32 }
 0x208   :  { %1217 = vadd.xlane.f32.xlu1 %v1064_v7  ;;  %1215 = vadd.xlane.f32.xlu0 %v1063_v11  ;;  %v5959_v7 = vpop.permute.xlu0 %1506  ;;  %v8557_v11 = vunpack.c.h.bf16 %v5955_v51  ;;  %v6038_v0 = vpop.permute.xlu1 %1534 }
 0x209   :  { %8828 = vst [vmem:[#allocation56_spill] sm:$0xff] %v6038_v0 }
 0x20a   :  { %v1070_v8 = vmul.f32 %v8557_v11, %v5870_v5 }
 0x20c   :  { %1221 = vadd.xlane.f32.xlu1 %v1066_v49  ;;  %1219 = vadd.xlane.f32.xlu0 %v1065_v43  ;;  %v8558_v49 = vunpack.c.l.bf16 %v5955_v51  ;;  %v5971_v43 = vld [vmem:[#allocation12 + $0x80] sm:$0xff]   ;;  %v5986_v23 = vpop.permute.xlu0 %1514  ;;  %v8589_v51 = vunpack.c.l.bf16 %v6036_v22  ;;  %v6060_v50 = vpop.permute.xlu1 %1542 }
 0x20d   :  { %8821 = vst [vmem:[#allocation49_spill] sm:$0xff] %v5971_v43  ;;  %v8560_v34 = vunpack.c.h.bf16 %v5971_v43  ;;  %v8561_v44 = vunpack.c.l.bf16 %v5971_v43  ;;  %8831 = vst [vmem:[#allocation59_spill] sm:$0xff] %v6060_v50 }
 0x20e   :  { %v1069_v53 = vmul.f32 %v8558_v49, %v5870_v5  ;;  %v5998_v49 = vld [vmem:[#allocation12 + $0x90] sm:$0xff]  }
 0x20f   :  { %v1072_v36 = vmul.f32 %v8560_v34, %v5975_v15  ;;  %8823 = vst [vmem:[#allocation51_spill] sm:$0xff] %v5998_v49  ;;  %v8570_v24 = vunpack.c.l.bf16 %v5998_v49 }
 0x210   :  { %1225 = vadd.xlane.f32.xlu1 %v1068_v28  ;;  %1223 = vadd.xlane.f32.xlu0 %v1067_v13  ;;  %v5988_v13 = vld [vmem:[#allocation12 + $0x88] sm:$0xff]   ;;  %v1071_v28 = vmul.f32 %v8561_v44, %v5975_v15  ;;  %v8569_v44 = vunpack.c.h.bf16 %v5998_v49 }
 0x211   :  { %8822 = vst [vmem:[#allocation50_spill] sm:$0xff] %v5988_v13  ;;  %v8564_v5 = vunpack.c.h.bf16 %v5988_v13  ;;  %v8565_v11 = vunpack.c.l.bf16 %v5988_v13  ;;  %v6130_v13 = vld [vmem:[#allocation12 + $0x120] sm:$0xff]  }
 0x212   :  { %8844 = vst [vmem:[#allocation72_spill] sm:$0xff] %v6130_v13 }
 0x213   :  { %v1073_v34 = vmul.f32 %v8565_v11, %v5975_v15  ;;  %v8575_v11 = vunpack.c.l.bf16 %v6012_v17 }
 0x214   :  { %1229 = vadd.xlane.f32.xlu1 %v1070_v8  ;;  %1227 = vadd.xlane.f32.xlu0 %v1069_v53  ;;  %v6002_v8 = vpop.permute.xlu0 %1522  ;;  %v1074_v53 = vmul.f32 %v8564_v5, %v5975_v15  ;;  %v8574_v5 = vunpack.c.h.bf16 %v6012_v17 }
 0x218   :  { %1233 = vadd.xlane.f32.xlu1 %v1072_v36  ;;  %1231 = vadd.xlane.f32.xlu0 %v1071_v28  ;;  %v1076_v36 = vmul.f32 %v8569_v44, %v5975_v15  ;;  %v1075_v28 = vmul.f32 %v8570_v24, %v5975_v15  ;;  %v6024_v18 = vpop.permute.xlu0 %1530  ;;  %v8580_v44 = vunpack.c.h.bf16 %v6026_v10  ;;  %v8581_v24 = vunpack.c.l.bf16 %v6026_v10  ;;  %v6076_v10 = vpop.permute.xlu1 %1550 }
 0x219   :  { %8825 = vst [vmem:[#allocation53_spill] sm:$0xff] %v6024_v18  ;;  %8835 = vst [vmem:[#allocation63_spill] sm:$0xff] %v6076_v10 }
 0x21c   :  { %1237 = vadd.xlane.f32.xlu1 %v1074_v53  ;;  %1235 = vadd.xlane.f32.xlu0 %v1073_v34  ;;  %v1078_v34 = vmul.f32 %v8574_v5, %v5975_v15  ;;  %v1077_v53 = vmul.f32 %v8575_v11, %v5975_v15  ;;  %v1079_v5 = vmul.f32 %v8581_v24, %v5975_v15  ;;  %v8588_v11 = vunpack.c.h.bf16 %v6036_v22  ;;  %v6074_v22 = vld [vmem:[#allocation12 + $0x100] sm:$0xff]  }
 0x21d   :  { %v8595_v24 = vunpack.c.l.bf16 %v6050_v54  ;;  %8834 = vst [vmem:[#allocation62_spill] sm:$0xff] %v6074_v22 }
 0x220   :  { %1241 = vadd.xlane.f32.xlu1 %v1076_v36  ;;  %1239 = vadd.xlane.f32.xlu0 %v1075_v28  ;;  %v6040_v36 = vpop.permute.xlu0 %1538  ;;  %v1080_v28 = vmul.f32 %v8580_v44, %v5975_v15  ;;  %v8594_v44 = vunpack.c.h.bf16 %v6050_v54 }
 0x221   :  { %8829 = vst [vmem:[#allocation57_spill] sm:$0xff] %v6040_v36 }
 0x224   :  { %1245 = vadd.xlane.f32.xlu1 %v1078_v34  ;;  %1243 = vadd.xlane.f32.xlu0 %v1077_v53  ;;  %v1082_v34 = vmul.f32 %v8588_v11, %v5975_v15  ;;  %v1081_v53 = vmul.f32 %v8589_v51, %v5975_v15  ;;  %v6062_v46 = vpop.permute.xlu0 %1546  ;;  %v8602_v11 = vunpack.c.h.bf16 %v6064_v45  ;;  %v8607_v51 = vunpack.c.l.bf16 %v6064_v45  ;;  %v6102_v45 = vpop.permute.xlu1 %1558 }
 0x225   :  { %8832 = vst [vmem:[#allocation60_spill] sm:$0xff] %v6062_v46  ;;  %8838 = vst [vmem:[#allocation66_spill] sm:$0xff] %v6102_v45  ;;  %v6393_v46 = vld [vmem:[#allocation12 + $0x178] sm:$0xff]  }
 0x226   :  { %v1085_v54 = vmul.f32 %v8607_v51, %v5975_v15  ;;  %v6106_v51 = vld [vmem:[#allocation12 + $0x110] sm:$0xff]   ;;  %8876 = vst [vmem:[#allocation103_spill] sm:$0xff] %v6393_v46 }
 0x227   :  { %8840 = vst [vmem:[#allocation68_spill] sm:$0xff] %v6106_v51 }
 0x228   :  { %1249 = vadd.xlane.f32.xlu1 %v1080_v28  ;;  %1247 = vadd.xlane.f32.xlu0 %v1079_v5  ;;  %v1084_v5 = vmul.f32 %v8594_v44, %v5975_v15  ;;  %v1083_v28 = vmul.f32 %v8595_v24, %v5975_v15  ;;  %v6083_v44 = vrot.slane %v5771_v12, %v5659_v32  ;;  %v6118_v49 = vpop.permute.xlu1 %1566 }
 0x229   :  { %v1086_v24 = vmul.f32 %v8602_v11, %v5975_v15  ;;  %8842 = vst [vmem:[#allocation70_spill] sm:$0xff] %v6118_v49 }
 0x22c   :  { %1253 = vadd.xlane.f32.xlu1 %v1082_v34  ;;  %1251 = vadd.xlane.f32.xlu0 %v1081_v53  ;;  %v6078_v34 = vpop.permute.xlu0 %1554  ;;  %v8609_v53 = vunpack.c.h.bf16 %v6074_v22  ;;  %v6140_v35 = vpop.permute.xlu1 %1577 }
 0x22d   :  { %8836 = vst [vmem:[#allocation64_spill] sm:$0xff] %v6078_v34  ;;  %8845 = vst [vmem:[#allocation73_spill] sm:$0xff] %v6140_v35  ;;  %v6379_v34 = vld [vmem:[#allocation12 + $0x170] sm:$0xff]  }
 0x22e   :  { %v1104_v40 = vmul.f32 %v8609_v53, %v6083_v44  ;;  %v8621_v53 = vunpack.c.l.bf16 %v6106_v51  ;;  %8875 = vst [vmem:[#allocation102_spill] sm:$0xff] %v6379_v34  ;;  %v8724_v10 = vunpack.c.l.bf16 %v6379_v34 }
 0x230   :  { %1257 = vadd.xlane.f32.xlu1 %v1084_v5  ;;  %1255 = vadd.xlane.f32.xlu0 %v1083_v28  ;;  %v8608_v5 = vunpack.c.l.bf16 %v6074_v22  ;;  %v6092_v28 = vld [vmem:[#allocation12 + $0x108] sm:$0xff]   ;;  %v6104_v15 = vpop.permute.xlu0 %1562  ;;  %v6156_v25 = vpop.permute.xlu1 %1585 }
 0x231   :  { %8837 = vst [vmem:[#allocation65_spill] sm:$0xff] %v6092_v28  ;;  %v8614_v11 = vunpack.c.h.bf16 %v6092_v28  ;;  %v8615_v17 = vunpack.c.l.bf16 %v6092_v28  ;;  %8839 = vst [vmem:[#allocation67_spill] sm:$0xff] %v6104_v15  ;;  %v6197_v28 = vld [vmem:[#allocation12 + $0xc8] sm:$0xff]  }
 0x232   :  { %v1103_v55 = vmul.f32 %v8608_v5, %v6083_v44  ;;  %v8620_v5 = vunpack.c.h.bf16 %v6106_v51  ;;  %8849 = vst [vmem:[#allocation77_spill] sm:$0xff] %v6156_v25  ;;  %v6180_v51 = vld [vmem:[#allocation12 + $0xc0] sm:$0xff]   ;;  %8855 = vst [vmem:[#allocation83_spill] sm:$0xff] %v6197_v28  ;;  %v6365_v15 = vld [vmem:[#allocation12 + $0x168] sm:$0xff]  }
 0x233   :  { %8852 = vst [vmem:[#allocation80_spill] sm:$0xff] %v6180_v51  ;;  %8874 = vst [vmem:[#allocation101_spill] sm:$0xff] %v6365_v15  ;;  %v8718_v45 = vunpack.c.l.bf16 %v6365_v15 }
 0x234   :  { %1261 = vadd.xlane.f32.xlu1 %v1086_v24  ;;  %1259 = vadd.xlane.f32.xlu0 %v1085_v54  ;;  %v1106_v24 = vmul.f32 %v8614_v11, %v6083_v44  ;;  %v1105_v54 = vmul.f32 %v8615_v17, %v6083_v44  ;;  %v1107_v11 = vmul.f32 %v8621_v53, %v6083_v44  ;;  %v8628_v17 = vunpack.c.h.bf16 %v6116_v33  ;;  %v6154_v33 = vld [vmem:[#allocation12 + $0x130] sm:$0xff]   ;;  %v6182_v19 = vpop.permute.xlu1 %1593 }
 0x235   :  { %v8635_v53 = vunpack.c.l.bf16 %v6130_v13  ;;  %8848 = vst [vmem:[#allocation76_spill] sm:$0xff] %v6154_v33  ;;  %8853 = vst [vmem:[#allocation81_spill] sm:$0xff] %v6182_v19 }
 0x238   :  { %1297 = vadd.xlane.f32.xlu1 %v1104_v40  ;;  %1295 = vadd.xlane.f32.xlu0 %v1103_v55  ;;  %v6120_v40 = vpop.permute.xlu0 %1573  ;;  %v1108_v55 = vmul.f32 %v8620_v5, %v6083_v44  ;;  %v8634_v5 = vunpack.c.h.bf16 %v6130_v13  ;;  %v8649_v13 = vunpack.c.l.bf16 %v6154_v33 }
 0x239   :  { %8843 = vst [vmem:[#allocation71_spill] sm:$0xff] %v6120_v40  ;;  %v6351_v40 = vld [vmem:[#allocation12 + $0x160] sm:$0xff]  }
 0x23a   :  { %8873 = vst [vmem:[#allocation100_spill] sm:$0xff] %v6351_v40  ;;  %v8714_v49 = vunpack.c.l.bf16 %v6351_v40 }
 0x23c   :  { %1301 = vadd.xlane.f32.xlu1 %v1106_v24  ;;  %1299 = vadd.xlane.f32.xlu0 %v1105_v54  ;;  %v1110_v24 = vmul.f32 %v8628_v17, %v6083_v44  ;;  %v1109_v54 = vmul.f32 %v8629_v59, %v6083_v44  ;;  %v6142_v43 = vpop.permute.xlu0 %1581  ;;  %v8640_v17 = vunpack.c.h.bf16 %v6144_v16  ;;  %v8641_v59 = vunpack.c.l.bf16 %v6144_v16 }
 0x23d   :  { %8846 = vst [vmem:[#allocation74_spill] sm:$0xff] %v6142_v43  ;;  %v8655_v16 = vunpack.c.l.bf16 %v6168_v2  ;;  %v6337_v43 = vld [vmem:[#allocation12 + $0x158] sm:$0xff]  }
 0x23e   :  { %8872 = vst [vmem:[#allocation99_spill] sm:$0xff] %v6337_v43  ;;  %v8710_v35 = vunpack.c.l.bf16 %v6337_v43 }
 0x240   :  { %1305 = vadd.xlane.f32.xlu1 %v1108_v55  ;;  %1303 = vadd.xlane.f32.xlu0 %v1107_v11  ;;  %v1112_v11 = vmul.f32 %v8634_v5, %v6083_v44  ;;  %v1111_v55 = vmul.f32 %v8635_v53, %v6083_v44  ;;  %v1113_v5 = vmul.f32 %v8641_v59, %v6083_v44  ;;  %v8648_v53 = vunpack.c.h.bf16 %v6154_v33 }
 0x241   :  { %v1115_v59 = vmul.f32 %v8649_v13, %v6083_v44  ;;  %v1117_v13 = vmul.f32 %v8655_v16, %v6083_v44  ;;  %v8659_v33 = vunpack.c.l.bf16 %v6180_v51  ;;  %v8667_v16 = vunpack.c.l.bf16 %v6197_v28 }
 0x244   :  { %1309 = vadd.xlane.f32.xlu1 %v1110_v24  ;;  %1307 = vadd.xlane.f32.xlu0 %v1109_v54  ;;  %v6158_v24 = vpop.permute.xlu0 %1589  ;;  %v1114_v54 = vmul.f32 %v8640_v17, %v6083_v44  ;;  %v1116_v17 = vmul.f32 %v8648_v53, %v6083_v44 }
 0x245   :  { %8850 = vst [vmem:[#allocation78_spill] sm:$0xff] %v6158_v24 }
 0x248   :  { %1313 = vadd.xlane.f32.xlu1 %v1112_v11  ;;  %1311 = vadd.xlane.f32.xlu0 %v1111_v55  ;;  %v8654_v11 = vunpack.c.h.bf16 %v6168_v2  ;;  %v997_v55 = vcombine.high %v5852_v57, %v5852_v57  ;;  %v8658_v57 = vunpack.c.h.bf16 %v6180_v51  ;;  %v6211_v2 = vld [vmem:[#allocation12 + $0xd0] sm:$0xff]  }
 0x249   :  { %8858 = vst [vmem:[#allocation86_spill] sm:$0xff] %v6211_v2 }
 0x24a   :  { %v1118_v53 = vmul.f32 %v8654_v11, %v6083_v44  ;;  %v8666_v44 = vunpack.c.h.bf16 %v6197_v28  ;;  %v6235_v28 = vld [vmem:[#allocation12 + $0xe0] sm:$0xff]  }
 0x24b   :  { %8862 = vst [vmem:[#allocation90_spill] sm:$0xff] %v6235_v28 }
 0x24c   :  { %1317 = vadd.xlane.f32.xlu1 %v1114_v54  ;;  %1315 = vadd.xlane.f32.xlu0 %v1113_v5  ;;  %v6184_v5 = vpop.permute.xlu0 %1597  ;;  %v6188_v54 = vrot.slane %v997_v55, %v5659_v32 }
 0x24d   :  { %8854 = vst [vmem:[#allocation82_spill] sm:$0xff] %v6184_v5 }
 0x24e   :  { %v1088_v55 = vmul.f32 %v8658_v57, %v6188_v54  ;;  %v1087_v11 = vmul.f32 %v8659_v33, %v6188_v54  ;;  %v8672_v57 = vunpack.c.h.bf16 %v6211_v2  ;;  %v8673_v33 = vunpack.c.l.bf16 %v6211_v2 }
 0x24f   :  { %v8683_v2 = vunpack.c.l.bf16 %v6235_v28 }
 0x250   :  { %1321 = vadd.xlane.f32.xlu1 %v1116_v17  ;;  %1319 = vadd.xlane.f32.xlu0 %v1115_v59  ;;  %v6199_v17 = vpop.permute.xlu1 %1601  ;;  %v6201_v59 = vpop.permute.xlu0 %1605 }
 0x251   :  { %8856 = vst [vmem:[#allocation84_spill] sm:$0xff] %v6199_v17  ;;  %8857 = vst [vmem:[#allocation85_spill] sm:$0xff] %v6201_v59  ;;  %v6291_v59 = vld [vmem:[#allocation12 + $0x140] sm:$0xff]  }
 0x252   :  { %8868 = vst [vmem:[#allocation96_spill] sm:$0xff] %v6291_v59  ;;  %v8870_v19 = vunpack.c.h.bf16 %v6291_v59 }
 0x254   :  { %1325 = vadd.xlane.f32.xlu1 %v1118_v53  ;;  %1323 = vadd.xlane.f32.xlu0 %v1117_v13  ;;  %v1090_v13 = vmul.f32 %v8666_v44, %v6188_v54  ;;  %v1089_v53 = vmul.f32 %v8667_v16, %v6188_v54  ;;  %v6221_v22 = vpop.permute.xlu1 %1609  ;;  %v6223_v6 = vpop.permute.xlu0 %1613  ;;  %v8677_v44 = vunpack.c.h.bf16 %v6225_v56  ;;  %v8678_v16 = vunpack.c.l.bf16 %v6225_v56 }
 0x255   :  { %8859 = vst [vmem:[#allocation87_spill] sm:$0xff] %v6221_v22  ;;  %8860 = vst [vmem:[#allocation88_spill] sm:$0xff] %v6223_v6  ;;  %v8686_v56 = vunpack.c.h.bf16 %v6249_v63  ;;  %v6277_v6 = vld [vmem:[#allocation12 + $0xf8] sm:$0xff]  }
 0x256   :  { %8867 = vst [vmem:[#allocation95_spill] sm:$0xff] %v6277_v6  ;;  %v8694_v63 = vunpack.c.h.bf16 %v6277_v6  ;;  %v8695_v22 = vunpack.c.l.bf16 %v6277_v6  ;;  %v6323_v6 = vld [vmem:[#allocation12 + $0x150] sm:$0xff]  }
 0x257   :  { %8871 = vst [vmem:[#allocation98_spill] sm:$0xff] %v6323_v6  ;;  %v8706_v25 = vunpack.c.l.bf16 %v6323_v6 }
 0x258   :  { %1265 = vadd.xlane.f32.xlu1 %v1088_v55  ;;  %1263 = vadd.xlane.f32.xlu0 %v1087_v11  ;;  %v1092_v11 = vmul.f32 %v8672_v57, %v6188_v54  ;;  %v1091_v55 = vmul.f32 %v8673_v33, %v6188_v54  ;;  %v6237_v51 = vpop.permute.xlu1 %1617  ;;  %v1093_v57 = vmul.f32 %v8678_v16, %v6188_v54  ;;  %v8682_v33 = vunpack.c.h.bf16 %v6235_v28 }
 0x259   :  { %8863 = vst [vmem:[#allocation91_spill] sm:$0xff] %v6237_v51  ;;  %v1095_v16 = vmul.f32 %v8683_v2, %v6188_v54  ;;  %v1097_v2 = vmul.f32 %v8687_v60, %v6188_v54 }
 0x25c   :  { %1269 = vadd.xlane.f32.xlu1 %v1090_v13  ;;  %1267 = vadd.xlane.f32.xlu0 %v1089_v53  ;;  %v6239_v13 = vpop.permute.xlu0 %1621  ;;  %v1094_v53 = vmul.f32 %v8677_v44, %v6188_v54  ;;  %v1096_v44 = vmul.f32 %v8682_v33, %v6188_v54  ;;  %v1098_v33 = vmul.f32 %v8686_v56, %v6188_v54 }
 0x25d   :  { %8864 = vst [vmem:[#allocation92_spill] sm:$0xff] %v6239_v13  ;;  %v6263_v13 = vld [vmem:[#allocation12 + $0xf0] sm:$0xff]  }
 0x25e   :  { %8866 = vst [vmem:[#allocation94_spill] sm:$0xff] %v6263_v13  ;;  %v8690_v28 = vunpack.c.h.bf16 %v6263_v13  ;;  %v8691_v51 = vunpack.c.l.bf16 %v6263_v13  ;;  %v1101_v13 = vmul.f32 %v8695_v22, %v6188_v54 }
 0x260   :  { %1273 = vadd.xlane.f32.xlu1 %v1092_v11  ;;  %1271 = vadd.xlane.f32.xlu0 %v1091_v55  ;;  %v1100_v56 = vmul.f32 %v8690_v28, %v6188_v54  ;;  %v1099_v60 = vmul.f32 %v8691_v51, %v6188_v54  ;;  %v6300_v28 = vrot.slane %v5778_v14, %v5659_v32 }
 0x261   :  { %v1102_v51 = vmul.f32 %v8694_v63, %v6188_v54 }
 0x262   :  { %v1120_v24 = vmul.f32 %v8870_v19, %v6300_v28 }
 0x264   :  { %1277 = vadd.xlane.f32.xlu1 %v1094_v53  ;;  %1275 = vadd.xlane.f32.xlu0 %v1093_v57 }
 0x265   :  { %v6251_v11 = vpop.xlane.xlu1 %1171  ;;  %v6253_v55 = vpop.xlane.xlu0 %1167 }
 0x268   :  { %1281 = vadd.xlane.f32.xlu1 %v1096_v44  ;;  %1279 = vadd.xlane.f32.xlu0 %v1095_v16 }
 0x269   :  { %v6265_v57 = vpop.xlane.xlu1 %1173  ;;  %v6267_v53 = vpop.xlane.xlu0 %1169 }
 0x26c   :  { %1285 = vadd.xlane.f32.xlu1 %v1098_v33  ;;  %1283 = vadd.xlane.f32.xlu0 %v1097_v2 }
 0x26d   :  { %v6279_v16 = vpop.xlane.xlu1 %1177  ;;  %v6281_v44 = vpop.xlane.xlu0 %1175 }
 0x270   :  { %1289 = vadd.xlane.f32.xlu1 %v1100_v56  ;;  %1287 = vadd.xlane.f32.xlu0 %v1099_v60  ;;  %v8698_v60 = vunpack.c.l.bf16 %v6291_v59  ;;  %v6309_v56 = vld [vmem:[#allocation12 + $0x148] sm:$0xff]   ;;  %v8705_v59 = vunpack.c.h.bf16 %v6323_v6  ;;  %v8713_v6 = vunpack.c.h.bf16 %v6351_v40  ;;  %v8721_v40 = vunpack.c.h.bf16 %v6379_v34 }
 0x271   :  { %v6293_v33 = vpop.xlane.xlu1 %1181  ;;  %v6295_v2 = vpop.xlane.xlu0 %1179  ;;  %8869 = vst [vmem:[#allocation97_spill] sm:$0xff] %v6309_v56  ;;  %v8701_v54 = vunpack.c.h.bf16 %v6309_v56  ;;  %v8702_v22 = vunpack.c.l.bf16 %v6309_v56  ;;  %v8709_v56 = vunpack.c.h.bf16 %v6337_v43  ;;  %v8717_v43 = vunpack.c.h.bf16 %v6365_v15 }
 0x272   :  { %v1119_v63 = vmul.f32 %v8698_v60, %v6300_v28  ;;  %v1131_v15 = vmul.f32 %v8724_v10, %v6300_v28 }
 0x273   :  { %v1122_v19 = vmul.f32 %v8701_v54, %v6300_v28  ;;  %v1121_v60 = vmul.f32 %v8702_v22, %v6300_v28  ;;  %v1124_v54 = vmul.f32 %v8705_v59, %v6300_v28  ;;  %v1123_v22 = vmul.f32 %v8706_v25, %v6300_v28 }
 0x274   :  { %1293 = vadd.xlane.f32.xlu1 %v1102_v51  ;;  %1291 = vadd.xlane.f32.xlu0 %v1101_v13  ;;  %v1126_v59 = vmul.f32 %v8709_v56, %v6300_v28  ;;  %v1125_v25 = vmul.f32 %v8710_v35, %v6300_v28  ;;  %v1128_v56 = vmul.f32 %v8713_v6, %v6300_v28 }
 0x275   :  { %v6311_v5 = vpop.xlane.xlu1 %1185  ;;  %v6313_v17 = vpop.xlane.xlu0 %1183  ;;  %v1127_v35 = vmul.f32 %v8714_v49, %v6300_v28  ;;  %v1130_v6 = vmul.f32 %v8717_v43, %v6300_v28  ;;  %v1129_v49 = vmul.f32 %v8718_v45, %v6300_v28  ;;  %v996_v43 = vcombine.high %v5771_v12, %v5771_v12 }
 0x276   :  { %v1132_v45 = vmul.f32 %v8721_v40, %v6300_v28  ;;  %v8880_v40 = vunpack.c.h.bf16 %v6393_v46 }
 0x277   :  { %v6417_v0 = vrot.slane %v996_v43, %v5659_v32 }
 0x278   :  { %1329 = vadd.xlane.f32.xlu1 %v1120_v24  ;;  %1327 = vadd.xlane.f32.xlu0 %v1119_v63  ;;  %v1134_v34 = vmul.f32 %v8880_v40, %v6300_v28 }
 0x279   :  { %v6325_v51 = vpop.xlane.xlu1 %1189  ;;  %v6327_v13 = vpop.xlane.xlu0 %1187 }
 0x27c   :  { %1333 = vadd.xlane.f32.xlu1 %v1122_v19  ;;  %1331 = vadd.xlane.f32.xlu0 %v1121_v60 }
 0x27d   :  { %v6339_v63 = vpop.xlane.xlu1 %1193  ;;  %v6341_v24 = vpop.xlane.xlu0 %1191 }
 0x280   :  { %1337 = vadd.xlane.f32.xlu1 %v1124_v54  ;;  %1335 = vadd.xlane.f32.xlu0 %v1123_v22 }
 0x281   :  { %v6353_v60 = vpop.xlane.xlu1 %1197  ;;  %v6355_v19 = vpop.xlane.xlu0 %1195 }
 0x284   :  { %1341 = vadd.xlane.f32.xlu1 %v1126_v59  ;;  %1339 = vadd.xlane.f32.xlu0 %v1125_v25 }
 0x285   :  { %v6367_v22 = vpop.xlane.xlu1 %1201  ;;  %v6369_v54 = vpop.xlane.xlu0 %1199 }
 0x288   :  { %1345 = vadd.xlane.f32.xlu1 %v1128_v56  ;;  %1343 = vadd.xlane.f32.xlu0 %v1127_v35 }
 0x289   :  { %v6381_v25 = vpop.xlane.xlu1 %1205  ;;  %v6383_v59 = vpop.xlane.xlu0 %1203 }
 0x28c   :  { %1349 = vadd.xlane.f32.xlu1 %v1130_v6  ;;  %1347 = vadd.xlane.f32.xlu0 %v1129_v49  ;;  %v8725_v6 = vunpack.c.l.bf16 %v6393_v46  ;;  %v6409_v49 = vld [vmem:[#allocation12 + $0x180] sm:$0xff]   ;;  %v6440_v46 = vld [vmem:[#allocation12 + $0x190] sm:$0xff]  }
 0x28d   :  { %v6395_v35 = vpop.xlane.xlu1 %1209  ;;  %v6397_v56 = vpop.xlane.xlu0 %1207  ;;  %8877 = vst [vmem:[#allocation104_spill] sm:$0xff] %v6409_v49  ;;  %v8884_v43 = vunpack.c.h.bf16 %v6409_v49  ;;  %8885 = vst [vmem:[#allocation110_spill] sm:$0xff] %v6440_v46 }
 0x28e   :  { %v1133_v10 = vmul.f32 %v8725_v6, %v6300_v28 }
 0x28f   :  { %v1136_v18 = vmul.f32 %v8884_v43, %v6417_v0 }
 0x290   :  { %1353 = vadd.xlane.f32.xlu1 %v1132_v45  ;;  %1351 = vadd.xlane.f32.xlu0 %v1131_v15  ;;  %v8728_v45 = vunpack.c.l.bf16 %v6409_v49  ;;  %v6426_v15 = vld [vmem:[#allocation12 + $0x188] sm:$0xff]   ;;  %v8735_v49 = vunpack.c.h.bf16 %v6440_v46 }
 0x291   :  { %v6411_v36 = vpop.xlane.xlu1 %1213  ;;  %v6413_v50 = vpop.xlane.xlu0 %1211  ;;  %8881 = vst [vmem:[#allocation107_spill] sm:$0xff] %v6426_v15  ;;  %v8731_v28 = vunpack.c.h.bf16 %v6426_v15  ;;  %v8732_v6 = vunpack.c.l.bf16 %v6426_v15 }
 0x292   :  { %8878 = vst [vmem:[#allocation105_spill] sm:$0xff] %v6411_v36  ;;  %8879 = vst [vmem:[#allocation106_spill] sm:$0xff] %v6413_v50  ;;  %v1135_v40 = vmul.f32 %v8728_v45, %v6417_v0  ;;  %v6484_v50 = vld [vmem:[#allocation12 + $0x1a8] sm:$0xff]  }
 0x293   :  { %v1138_v43 = vmul.f32 %v8731_v28, %v6417_v0  ;;  %v1137_v45 = vmul.f32 %v8732_v6, %v6417_v0  ;;  %v1140_v28 = vmul.f32 %v8735_v49, %v6417_v0  ;;  %8895 = vst [vmem:[#allocation120_spill] sm:$0xff] %v6484_v50 }
 0x294   :  { %1357 = vadd.xlane.f32.xlu1 %v1134_v34  ;;  %1355 = vadd.xlane.f32.xlu0 %v1133_v10 }
 0x295   :  { %v6428_v36 = vpop.xlane.xlu1 %1217  ;;  %v6430_v12 = vpop.xlane.xlu0 %1215 }
 0x296   :  { %8882 = vst [vmem:[#allocation108_spill] sm:$0xff] %v6428_v36  ;;  %8883 = vst [vmem:[#allocation109_spill] sm:$0xff] %v6430_v12  ;;  %v8736_v36 = vunpack.c.l.bf16 %v6440_v46  ;;  %v6454_v12 = vld [vmem:[#allocation12 + $0x198] sm:$0xff]  }
 0x297   :  { %8888 = vst [vmem:[#allocation113_spill] sm:$0xff] %v6454_v12  ;;  %v8739_v15 = vunpack.c.h.bf16 %v6454_v12 }
 0x298   :  { %1361 = vadd.xlane.f32.xlu1 %v1136_v18  ;;  %1359 = vadd.xlane.f32.xlu0 %v1135_v40  ;;  %v1139_v6 = vmul.f32 %v8736_v36, %v6417_v0 }
 0x299   :  { %v6442_v10 = vpop.xlane.xlu1 %1221  ;;  %v6444_v34 = vpop.xlane.xlu0 %1219  ;;  %v1142_v49 = vmul.f32 %v8739_v15, %v6417_v0 }
 0x29a   :  { %8886 = vst [vmem:[#allocation111_spill] sm:$0xff] %v6442_v10  ;;  %8887 = vst [vmem:[#allocation112_spill] sm:$0xff] %v6444_v34  ;;  %v8740_v10 = vunpack.c.l.bf16 %v6454_v12  ;;  %v6468_v34 = vld [vmem:[#allocation12 + $0x1a0] sm:$0xff]   ;;  %v8747_v12 = vunpack.c.h.bf16 %v6484_v50 }
 0x29b   :  { %8891 = vst [vmem:[#allocation116_spill] sm:$0xff] %v6468_v34  ;;  %v8743_v46 = vunpack.c.h.bf16 %v6468_v34 }
 0x29c   :  { %1365 = vadd.xlane.f32.xlu1 %v1138_v43  ;;  %1363 = vadd.xlane.f32.xlu0 %v1137_v45  ;;  %v1141_v36 = vmul.f32 %v8740_v10, %v6417_v0 }
 0x29d   :  { %v6456_v18 = vpop.xlane.xlu1 %1225  ;;  %v6458_v40 = vpop.xlane.xlu0 %1223  ;;  %v1144_v15 = vmul.f32 %v8743_v46, %v6417_v0 }
 0x29e   :  { %8889 = vst [vmem:[#allocation114_spill] sm:$0xff] %v6456_v18  ;;  %8890 = vst [vmem:[#allocation115_spill] sm:$0xff] %v6458_v40 }
 0x2a0   :  { %1369 = vadd.xlane.f32.xlu1 %v1140_v28  ;;  %1367 = vadd.xlane.f32.xlu0 %v1139_v6  ;;  %v8744_v28 = vunpack.c.l.bf16 %v6468_v34 }
 0x2a1   :  { %v6472_v43 = vpop.xlane.xlu1 %1229  ;;  %v6474_v18 = vpop.xlane.xlu0 %1227 }
 0x2a2   :  { %v6470_v45 = vpop.f32.mrb[8].mxu1  ;;  %8893 = vst [vmem:[#allocation118_spill] sm:$0xff] %v6472_v43  ;;  %8894 = vst [vmem:[#allocation119_spill] sm:$0xff] %v6474_v18  ;;  %v1143_v10 = vmul.f32 %v8744_v28, %v6417_v0  ;;  %v6498_v18 = vld [vmem:[#allocation12 + $0x1b0] sm:$0xff]  }
 0x2a3   :  { %8892 = vst [vmem:[#allocation117_spill] sm:$0xff] %v6470_v45  ;;  %v5075_v40 = vpop.f32.mrb[9].mxu1  ;;  %8897 = vst [vmem:[#allocation122_spill] sm:$0xff] %v6498_v18  ;;  %v8751_v28 = vunpack.c.h.bf16 %v6498_v18  ;;  %v8754_v34 = vunpack.c.l.bf16 %v6498_v18 }
 0x2a4   :  { %v4516_v6 = vpop.f32.mrb[10].mxu1  ;;  %1373 = vadd.xlane.f32.xlu1 %v1142_v49  ;;  %1371 = vadd.xlane.f32.xlu0 %v1141_v36 }
 0x2a5   :  { %v5076_v45 = vpop.f32.mrb[11].mxu1  ;;  %v6486_v43 = vpop.xlane.xlu1 %1233  ;;  %v8748_v6 = vunpack.c.l.bf16 %v6484_v50  ;;  %v1147_v50 = vmul.f32 %v8754_v34, %v6417_v0 }
 0x2a6   :  { %8896 = vst [vmem:[#allocation121_spill] sm:$0xff] %v6486_v43  ;;  %v6488_v40 = vpop.xlane.xlu0 %1231  ;;  %v1146_v45 = vmul.f32 %v8747_v12, %v6417_v0  ;;  %v6512_v43 = vld [vmem:[#allocation12 + $0x1b8] sm:$0xff]   ;;  %v998_v12 = vcombine.high %v5778_v14, %v5778_v14 }
 0x2a7   :  { %v1145_v46 = vmul.f32 %v8748_v6, %v6417_v0  ;;  %8899 = vst [vmem:[#allocation124_spill] sm:$0xff] %v6512_v43  ;;  %v1148_v6 = vmul.f32 %v8751_v28, %v6417_v0  ;;  %v8904_v28 = vunpack.c.h.bf16 %v6512_v43 }
 0x2a8   :  { %1377 = vadd.xlane.f32.xlu1 %v1144_v15  ;;  %1375 = vadd.xlane.f32.xlu0 %v1143_v10 }
 0x2a9   :  { %v6500_v36 = vpop.xlane.xlu1 %1237  ;;  %v1150_v18 = vmul.f32 %v8904_v28, %v6417_v0 }
 0x2aa   :  { %8898 = vst [vmem:[#allocation123_spill] sm:$0xff] %v6500_v36  ;;  %v6502_v49 = vpop.xlane.xlu0 %1235 }
 0x2ac   :  { %1381 = vadd.xlane.f32.xlu1 %v1146_v45  ;;  %1379 = vadd.xlane.f32.xlu0 %v1145_v46  ;;  %v8756_v45 = vunpack.c.l.bf16 %v6512_v43  ;;  %v6528_v46 = vld [vmem:[#allocation12 + $0x1c0] sm:$0xff]   ;;  %v6559_v43 = vld [vmem:[#allocation12 + $0x1d0] sm:$0xff]  }
 0x2ad   :  { %v6514_v15 = vpop.xlane.xlu1 %1241  ;;  %8902 = vst [vmem:[#allocation127_spill] sm:$0xff] %v6528_v46  ;;  %8909 = vst [vmem:[#allocation132_spill] sm:$0xff] %v6559_v43 }
 0x2ae   :  { %8900 = vst [vmem:[#allocation125_spill] sm:$0xff] %v6514_v15  ;;  %v6516_v10 = vpop.xlane.xlu0 %1239  ;;  %v1149_v34 = vmul.f32 %v8756_v45, %v6417_v0 }
 0x2af   :  { %8901 = vst [vmem:[#allocation126_spill] sm:$0xff] %v6516_v10  ;;  %v6536_v10 = vrot.slane %v998_v12, %v5659_v32  ;;  %v8908_v12 = vunpack.c.h.bf16 %v6528_v46 }
 0x2b0   :  { %1385 = vadd.xlane.f32.xlu1 %v1148_v6  ;;  %1383 = vadd.xlane.f32.xlu0 %v1147_v50  ;;  %v8759_v6 = vunpack.c.l.bf16 %v6528_v46  ;;  %v6545_v50 = vld [vmem:[#allocation12 + $0x1c8] sm:$0xff]   ;;  %v8766_v46 = vunpack.c.h.bf16 %v6559_v43 }
 0x2b1   :  { %v6530_v15 = vpop.xlane.xlu1 %1245  ;;  %8905 = vst [vmem:[#allocation129_spill] sm:$0xff] %v6545_v50  ;;  %v1152_v32 = vmul.f32 %v8908_v12, %v6536_v10  ;;  %v8762_v0 = vunpack.c.h.bf16 %v6545_v50  ;;  %v8763_v45 = vunpack.c.l.bf16 %v6545_v50 }
 0x2b2   :  { %8903 = vst [vmem:[#allocation128_spill] sm:$0xff] %v6530_v15  ;;  %v6532_v36 = vpop.xlane.xlu0 %1243  ;;  %v1151_v28 = vmul.f32 %v8759_v6, %v6536_v10 }
 0x2b3   :  { %v1154_v12 = vmul.f32 %v8762_v0, %v6536_v10  ;;  %v1153_v6 = vmul.f32 %v8763_v45, %v6536_v10  ;;  %v1156_v0 = vmul.f32 %v8766_v46, %v6536_v10 }
 0x2b4   :  { %1389 = vadd.xlane.f32.xlu1 %v1150_v18  ;;  %1387 = vadd.xlane.f32.xlu0 %v1149_v34 }
 0x2b5   :  { %v6547_v15 = vpop.xlane.xlu1 %1249 }
 0x2b6   :  { %8906 = vst [vmem:[#allocation130_spill] sm:$0xff] %v6547_v15  ;;  %v6549_v14 = vpop.xlane.xlu0 %1247  ;;  %v8767_v15 = vunpack.c.l.bf16 %v6559_v43 }
 0x2b7   :  { %8907 = vst [vmem:[#allocation131_spill] sm:$0xff] %v6549_v14  ;;  %v6573_v14 = vld [vmem:[#allocation12 + $0x1d8] sm:$0xff]  }
 0x2b8   :  { %1393 = vadd.xlane.f32.xlu1 %v1152_v32  ;;  %1391 = vadd.xlane.f32.xlu0 %v1151_v28  ;;  %8912 = vst [vmem:[#allocation135_spill] sm:$0xff] %v6573_v14  ;;  %v1155_v45 = vmul.f32 %v8767_v15, %v6536_v10  ;;  %v8770_v50 = vunpack.c.h.bf16 %v6573_v14 }
 0x2b9   :  { %v6561_v34 = vpop.xlane.xlu1 %1253 }
 0x2ba   :  { %8910 = vst [vmem:[#allocation133_spill] sm:$0xff] %v6561_v34  ;;  %v6563_v18 = vpop.xlane.xlu0 %1251  ;;  %v8771_v34 = vunpack.c.l.bf16 %v6573_v14  ;;  %v1158_v46 = vmul.f32 %v8770_v50, %v6536_v10 }
 0x2bb   :  { %8911 = vst [vmem:[#allocation134_spill] sm:$0xff] %v6563_v18  ;;  %v6587_v18 = vld [vmem:[#allocation12 + $0x1e0] sm:$0xff]  }
 0x2bc   :  { %1397 = vadd.xlane.f32.xlu1 %v1154_v12  ;;  %1395 = vadd.xlane.f32.xlu0 %v1153_v6  ;;  %8915 = vst [vmem:[#allocation138_spill] sm:$0xff] %v6587_v18  ;;  %v1157_v15 = vmul.f32 %v8771_v34, %v6536_v10  ;;  %v8774_v43 = vunpack.c.h.bf16 %v6587_v18 }
 0x2bd   :  { %v6575_v32 = vpop.xlane.xlu1 %1257 }
 0x2be   :  { %8913 = vst [vmem:[#allocation136_spill] sm:$0xff] %v6575_v32  ;;  %v6577_v28 = vpop.xlane.xlu0 %1255  ;;  %v8775_v32 = vunpack.c.l.bf16 %v6587_v18  ;;  %v1160_v50 = vmul.f32 %v8774_v43, %v6536_v10 }
 0x2bf   :  { %8914 = vst [vmem:[#allocation137_spill] sm:$0xff] %v6577_v28  ;;  %v6601_v28 = vld [vmem:[#allocation12 + $0x1e8] sm:$0xff]  }
 0x2c0   :  { %1401 = vadd.xlane.f32.xlu1 %v1156_v0  ;;  %1399 = vadd.xlane.f32.xlu0 %v1155_v45  ;;  %8918 = vst [vmem:[#allocation141_spill] sm:$0xff] %v6601_v28  ;;  %v1159_v34 = vmul.f32 %v8775_v32, %v6536_v10  ;;  %v8778_v14 = vunpack.c.h.bf16 %v6601_v28 }
 0x2c1   :  { %v6589_v6 = vpop.xlane.xlu1 %1261 }
 0x2c2   :  { %8916 = vst [vmem:[#allocation139_spill] sm:$0xff] %v6589_v6  ;;  %v6591_v12 = vpop.xlane.xlu0 %1259  ;;  %v8779_v6 = vunpack.c.l.bf16 %v6601_v28  ;;  %v1162_v43 = vmul.f32 %v8778_v14, %v6536_v10 }
 0x2c3   :  { %8917 = vst [vmem:[#allocation140_spill] sm:$0xff] %v6591_v12  ;;  %v6615_v12 = vld [vmem:[#allocation12 + $0x1f0] sm:$0xff]  }
 0x2c4   :  { %1405 = vadd.xlane.f32.xlu1 %v1158_v46  ;;  %1403 = vadd.xlane.f32.xlu0 %v1157_v15  ;;  %8921 = vst [vmem:[#allocation144_spill] sm:$0xff] %v6615_v12  ;;  %v1161_v32 = vmul.f32 %v8779_v6, %v6536_v10  ;;  %v8782_v18 = vunpack.c.h.bf16 %v6615_v12 }
 0x2c5   :  { %v6603_v45 = vpop.xlane.xlu1 %1297 }
 0x2c6   :  { %8919 = vst [vmem:[#allocation142_spill] sm:$0xff] %v6603_v45  ;;  %v6605_v0 = vpop.xlane.xlu0 %1295  ;;  %v8783_v45 = vunpack.c.l.bf16 %v6615_v12  ;;  %v1164_v14 = vmul.f32 %v8782_v18, %v6536_v10 }
 0x2c7   :  { %8920 = vst [vmem:[#allocation143_spill] sm:$0xff] %v6605_v0  ;;  %v6629_v0 = vld [vmem:[#allocation12 + $0x1f8] sm:$0xff]  }
 0x2c8   :  { %1409 = vadd.xlane.f32.xlu1 %v1160_v50  ;;  %1407 = vadd.xlane.f32.xlu0 %v1159_v34  ;;  %8924 = vst [vmem:[#allocation147_spill] sm:$0xff] %v6629_v0  ;;  %v1163_v6 = vmul.f32 %v8783_v45, %v6536_v10  ;;  %v8786_v28 = vunpack.c.h.bf16 %v6629_v0 }
 0x2c9   :  { %v6617_v15 = vpop.xlane.xlu1 %1301 }
 0x2ca   :  { %8922 = vst [vmem:[#allocation145_spill] sm:$0xff] %v6617_v15  ;;  %v6619_v46 = vpop.xlane.xlu0 %1299  ;;  %v8789_v15 = vunpack.c.l.bf16 %v6629_v0 }
 0x2cb   :  { %8923 = vst [vmem:[#allocation146_spill] sm:$0xff] %v6619_v46 }
 0x2cc   :  { %1413 = vadd.xlane.f32.xlu1 %v1162_v43  ;;  %1411 = vadd.xlane.f32.xlu0 %v1161_v32  ;;  %v1165_v18 = vmul.f32 %v8789_v15, %v6536_v10 }
 0x2cd   :  { %v6631_v50 = vpop.xlane.xlu1 %1305 }
 0x2ce   :  { %8925 = vst [vmem:[#allocation148_spill] sm:$0xff] %v6631_v50  ;;  %v6633_v34 = vpop.xlane.xlu0 %1303  ;;  %v1166_v50 = vmul.f32 %v8786_v28, %v6536_v10 }
 0x2cf   :  { %8926 = vst [vmem:[#allocation149_spill] sm:$0xff] %v6633_v34 }
 0x2d0   :  { %1417 = vadd.xlane.f32.xlu1 %v1164_v14  ;;  %1415 = vadd.xlane.f32.xlu0 %v1163_v6 }
 0x2d1   :  { %v6643_v43 = vpop.xlane.xlu1 %1309 }
 0x2d2   :  { %8927 = vst [vmem:[#allocation150_spill] sm:$0xff] %v6643_v43  ;;  %v6645_v32 = vpop.xlane.xlu0 %1307 }
 0x2d3   :  { %8928 = vst [vmem:[#allocation151_spill] sm:$0xff] %v6645_v32 }
 0x2d4   :  { %1421 = vadd.xlane.f32.xlu1 %v1166_v50  ;;  %1419 = vadd.xlane.f32.xlu0 %v1165_v18  ;;  %v8790_v18 = vsub.s32 3, %v5655_v27 }
 0x2d5   :  { %v6653_v45 = vpop.xlane.xlu1 %1313 }
 0x2d6   :  { %8929 = vst [vmem:[#allocation152_spill] sm:$0xff] %v6653_v45  ;;  %v6655_v12 = vpop.xlane.xlu0 %1311 }
 0x2d7   :  { %8930 = vst [vmem:[#allocation153_spill] sm:$0xff] %v6655_v12 }
 0x2d9   :  { %v6657_v14 = vpop.xlane.xlu1 %1317 }
 0x2da   :  { %8931 = vst [vmem:[#allocation154_spill] sm:$0xff] %v6657_v14  ;;  %v6659_v6 = vpop.xlane.xlu0 %1315 }
 0x2db   :  { %8932 = vst [vmem:[#allocation155_spill] sm:$0xff] %v6659_v6 }
 0x2dd   :  { %v6661_v43 = vpop.xlane.xlu1 %1321 }
 0x2de   :  { %8933 = vst [vmem:[#allocation156_spill] sm:$0xff] %v6661_v43  ;;  %v6663_v32 = vpop.xlane.xlu0 %1319 }
 0x2df   :  { %8934 = vst [vmem:[#allocation157_spill] sm:$0xff] %v6663_v32 }
 0x2e1   :  { %v6665_v34 = vpop.xlane.xlu1 %1325 }
 0x2e2   :  { %8935 = vst [vmem:[#allocation158_spill] sm:$0xff] %v6665_v34  ;;  %v6667_v28 = vpop.xlane.xlu0 %1323  ;;  %v1638_v34 = vrot.slane %v5669_v41, %v8790_v18 }
 0x2e3   :  { %8936 = vst [vmem:[#allocation159_spill] sm:$0xff] %v6667_v28 }
 0x2e5   :  { %v6669_v0 = vpop.xlane.xlu1 %1265  ;;  %1625 = vbcast.lane.b32.xlu1 %v5721_v1, 360 }
 0x2e6   :  { %v6671_v10 = vpop.xlane.xlu0 %1263 }
 0x2e9   :  { %v6675_v50 = vpop.xlane.xlu1 %1269  ;;  %1633 = vbcast.lane.b32.xlu1 %v5721_v1, 376 }
 0x2ea   :  { %8937 = vst [vmem:[#allocation160_spill] sm:$0xff] %v6675_v50  ;;  %v6677_v15 = vpop.xlane.xlu0 %1267  ;;  %1629 = vbcast.lane.b32.xlu0 %v5721_v1, 368 }
 0x2eb   :  { %8938 = vst [vmem:[#allocation161_spill] sm:$0xff] %v6677_v15 }
 0x2ed   :  { %v6684_v28 = vpop.xlane.xlu1 %1273  ;;  %1644 = vbcast.lane.b32.xlu1 %v1638_v34, 264 }
 0x2ee   :  { %8939 = vst [vmem:[#allocation162_spill] sm:$0xff] %v6684_v28  ;;  %v6686_v43 = vpop.xlane.xlu0 %1271  ;;  %1640 = vbcast.lane.b32.xlu0 %v1638_v34, 256 }
 0x2ef   :  { %8940 = vst [vmem:[#allocation163_spill] sm:$0xff] %v6686_v43 }
 0x2f1   :  { %v6688_v32 = vpop.xlane.xlu1 %1277  ;;  %1652 = vbcast.lane.b32.xlu1 %v1638_v34, 280 }
 0x2f2   :  { %8941 = vst [vmem:[#allocation164_spill] sm:$0xff] %v6688_v32  ;;  %v6690_v14 = vpop.xlane.xlu0 %1275  ;;  %1648 = vbcast.lane.b32.xlu0 %v1638_v34, 272 }
 0x2f3   :  { %8942 = vst [vmem:[#allocation165_spill] sm:$0xff] %v6690_v14 }
 0x2f5   :  { %v6692_v6 = vpop.xlane.xlu1 %1281  ;;  %1660 = vbcast.lane.b32.xlu1 %v1638_v34, 296 }
 0x2f6   :  { %8943 = vst [vmem:[#allocation166_spill] sm:$0xff] %v6692_v6  ;;  %v6694_v45 = vpop.xlane.xlu0 %1279  ;;  %1656 = vbcast.lane.b32.xlu0 %v1638_v34, 288 }
 0x2f7   :  { %8944 = vst [vmem:[#allocation167_spill] sm:$0xff] %v6694_v45 }
 0x2f9   :  { %v6696_v18 = vpop.xlane.xlu1 %1285  ;;  %1668 = vbcast.lane.b32.xlu1 %v1638_v34, 312 }
 0x2fa   :  { %8945 = vst [vmem:[#allocation168_spill] sm:$0xff] %v6696_v18  ;;  %v6698_v1 = vpop.xlane.xlu0 %1283  ;;  %1664 = vbcast.lane.b32.xlu0 %v1638_v34, 304  ;;  %v8791_v18 = vsub.s32 4, %v5655_v27 }
 0x2fb   :  { %8946 = vst [vmem:[#allocation169_spill] sm:$0xff] %v6698_v1 }
 0x2fd   :  { %v6700_v12 = vpop.xlane.xlu1 %1289  ;;  %1676 = vbcast.lane.b32.xlu1 %v1638_v34, 328 }
 0x2fe   :  { %8947 = vst [vmem:[#allocation170_spill] sm:$0xff] %v6700_v12  ;;  %v6702_v46 = vpop.xlane.xlu0 %1287  ;;  %1672 = vbcast.lane.b32.xlu0 %v1638_v34, 320 }
 0x2ff   :  { %8948 = vst [vmem:[#allocation171_spill] sm:$0xff] %v6702_v46 }
 0x301   :  { %v6704_v32 = vpop.xlane.xlu1 %1293  ;;  %1684 = vbcast.lane.b32.xlu1 %v1638_v34, 344 }
 0x302   :  { %8949 = vst [vmem:[#allocation172_spill] sm:$0xff] %v6704_v32  ;;  %v6706_v14 = vpop.xlane.xlu0 %1291  ;;  %1680 = vbcast.lane.b32.xlu0 %v1638_v34, 336  ;;  %v1705_v32 = vrot.slane %v5669_v41, %v8791_v18 }
 0x303   :  { %8950 = vst [vmem:[#allocation173_spill] sm:$0xff] %v6706_v14 }
 0x305   :  { %v6708_v6 = vpop.xlane.xlu1 %1329  ;;  %1692 = vbcast.lane.b32.xlu1 %v1638_v34, 360 }
 0x306   :  { %8951 = vst [vmem:[#allocation174_spill] sm:$0xff] %v6708_v6  ;;  %v6710_v45 = vpop.xlane.xlu0 %1327  ;;  %1688 = vbcast.lane.b32.xlu0 %v1638_v34, 352 }
 0x307   :  { %8952 = vst [vmem:[#allocation175_spill] sm:$0xff] %v6710_v45 }
 0x309   :  { %v6713_v1 = vpop.xlane.xlu1 %1333  ;;  %1700 = vbcast.lane.b32.xlu1 %v1638_v34, 376 }
 0x30a   :  { %8953 = vst [vmem:[#allocation176_spill] sm:$0xff] %v6713_v1  ;;  %v6715_v12 = vpop.xlane.xlu0 %1331  ;;  %1696 = vbcast.lane.b32.xlu0 %v1638_v34, 368 }
 0x30b   :  { %8954 = vst [vmem:[#allocation177_spill] sm:$0xff] %v6715_v12 }
 0x30d   :  { %v6720_v14 = vpop.xlane.xlu1 %1337  ;;  %1711 = vbcast.lane.b32.xlu1 %v1705_v32, 264 }
 0x30e   :  { %8955 = vst [vmem:[#allocation178_spill] sm:$0xff] %v6720_v14  ;;  %v6722_v46 = vpop.xlane.xlu0 %1335  ;;  %1707 = vbcast.lane.b32.xlu0 %v1705_v32, 256 }
 0x30f   :  { %8956 = vst [vmem:[#allocation179_spill] sm:$0xff] %v6722_v46 }
 0x311   :  { %v6724_v6 = vpop.xlane.xlu1 %1341  ;;  %1719 = vbcast.lane.b32.xlu1 %v1705_v32, 280 }
 0x312   :  { %8957 = vst [vmem:[#allocation180_spill] sm:$0xff] %v6724_v6  ;;  %v6726_v45 = vpop.xlane.xlu0 %1339  ;;  %1715 = vbcast.lane.b32.xlu0 %v1705_v32, 272 }
 0x313   :  { %8958 = vst [vmem:[#allocation181_spill] sm:$0xff] %v6726_v45 }
 0x315   :  { %v6728_v1 = vpop.xlane.xlu1 %1345  ;;  %1727 = vbcast.lane.b32.xlu1 %v1705_v32, 296 }
 0x316   :  { %8959 = vst [vmem:[#allocation182_spill] sm:$0xff] %v6728_v1  ;;  %v6730_v12 = vpop.xlane.xlu0 %1343  ;;  %1723 = vbcast.lane.b32.xlu0 %v1705_v32, 288 }
 0x317   :  { %8960 = vst [vmem:[#allocation183_spill] sm:$0xff] %v6730_v12 }
 0x319   :  { %v6732_v18 = vpop.xlane.xlu1 %1349  ;;  %1735 = vbcast.lane.b32.xlu1 %v1705_v32, 312 }
 0x31a   :  { %8961 = vst [vmem:[#allocation184_spill] sm:$0xff] %v6732_v18  ;;  %v6734_v34 = vpop.xlane.xlu0 %1347  ;;  %1731 = vbcast.lane.b32.xlu0 %v1705_v32, 304  ;;  %v8792_v18 = vsub.s32 5, %v5655_v27 }
 0x31b   :  { %8962 = vst [vmem:[#allocation185_spill] sm:$0xff] %v6734_v34 }
 0x31d   :  { %v6736_v14 = vpop.xlane.xlu1 %1353  ;;  %1743 = vbcast.lane.b32.xlu1 %v1705_v32, 328 }
 0x31e   :  { %8963 = vst [vmem:[#allocation186_spill] sm:$0xff] %v6736_v14  ;;  %v6738_v46 = vpop.xlane.xlu0 %1351  ;;  %1739 = vbcast.lane.b32.xlu0 %v1705_v32, 320 }
 0x31f   :  { %8964 = vst [vmem:[#allocation187_spill] sm:$0xff] %v6738_v46 }
 0x321   :  { %v6740_v6 = vpop.xlane.xlu1 %1357  ;;  %1751 = vbcast.lane.b32.xlu1 %v1705_v32, 344 }
 0x322   :  { %8965 = vst [vmem:[#allocation188_spill] sm:$0xff] %v6740_v6  ;;  %v6742_v45 = vpop.xlane.xlu0 %1355  ;;  %1747 = vbcast.lane.b32.xlu0 %v1705_v32, 336  ;;  %v1772_v6 = vrot.slane %v5669_v41, %v8792_v18 }
 0x323   :  { %8966 = vst [vmem:[#allocation189_spill] sm:$0xff] %v6742_v45 }
 0x325   :  { %v6744_v1 = vpop.xlane.xlu1 %1361  ;;  %1759 = vbcast.lane.b32.xlu1 %v1705_v32, 360 }
 0x326   :  { %8967 = vst [vmem:[#allocation190_spill] sm:$0xff] %v6744_v1  ;;  %v6746_v12 = vpop.xlane.xlu0 %1359  ;;  %1755 = vbcast.lane.b32.xlu0 %v1705_v32, 352 }
 0x327   :  { %8968 = vst [vmem:[#allocation191_spill] sm:$0xff] %v6746_v12 }
 0x329   :  { %v6749_v34 = vpop.xlane.xlu1 %1365  ;;  %1767 = vbcast.lane.b32.xlu1 %v1705_v32, 376 }
 0x32a   :  { %8969 = vst [vmem:[#allocation192_spill] sm:$0xff] %v6749_v34  ;;  %v6751_v14 = vpop.xlane.xlu0 %1363  ;;  %1763 = vbcast.lane.b32.xlu0 %v1705_v32, 368 }
 0x32b   :  { %8970 = vst [vmem:[#allocation193_spill] sm:$0xff] %v6751_v14 }
 0x32d   :  { %v6756_v45 = vpop.xlane.xlu1 %1369  ;;  %1778 = vbcast.lane.b32.xlu1 %v1772_v6, 264 }
 0x32e   :  { %8971 = vst [vmem:[#allocation194_spill] sm:$0xff] %v6756_v45  ;;  %v6758_v46 = vpop.xlane.xlu0 %1367  ;;  %1774 = vbcast.lane.b32.xlu0 %v1772_v6, 256 }
 0x32f   :  { %8972 = vst [vmem:[#allocation195_spill] sm:$0xff] %v6758_v46 }
 0x331   :  { %v6760_v1 = vpop.xlane.xlu1 %1373  ;;  %1786 = vbcast.lane.b32.xlu1 %v1772_v6, 280 }
 0x332   :  { %8973 = vst [vmem:[#allocation196_spill] sm:$0xff] %v6760_v1  ;;  %v6762_v12 = vpop.xlane.xlu0 %1371  ;;  %1782 = vbcast.lane.b32.xlu0 %v1772_v6, 272 }
 0x333   :  { %8974 = vst [vmem:[#allocation197_spill] sm:$0xff] %v6762_v12 }
 0x335   :  { %v6764_v34 = vpop.xlane.xlu1 %1377  ;;  %1794 = vbcast.lane.b32.xlu1 %v1772_v6, 296 }
 0x336   :  { %8975 = vst [vmem:[#allocation198_spill] sm:$0xff] %v6764_v34  ;;  %v6766_v14 = vpop.xlane.xlu0 %1375  ;;  %1790 = vbcast.lane.b32.xlu0 %v1772_v6, 288 }
 0x337   :  { %8976 = vst [vmem:[#allocation199_spill] sm:$0xff] %v6766_v14 }
 0x339   :  { %v6768_v18 = vpop.xlane.xlu1 %1381  ;;  %1802 = vbcast.lane.b32.xlu1 %v1772_v6, 312 }
 0x33a   :  { %8977 = vst [vmem:[#allocation200_spill] sm:$0xff] %v6768_v18  ;;  %v6770_v32 = vpop.xlane.xlu0 %1379  ;;  %1798 = vbcast.lane.b32.xlu0 %v1772_v6, 304 }
 0x33b   :  { %8978 = vst [vmem:[#allocation201_spill] sm:$0xff] %v6770_v32  ;;  %v8793_v32 = vsub.s32 6, %v5655_v27 }
 0x33d   :  { %v6772_v45 = vpop.xlane.xlu1 %1385  ;;  %1810 = vbcast.lane.b32.xlu1 %v1772_v6, 328 }
 0x33e   :  { %8979 = vst [vmem:[#allocation202_spill] sm:$0xff] %v6772_v45  ;;  %v6774_v46 = vpop.xlane.xlu0 %1383  ;;  %1806 = vbcast.lane.b32.xlu0 %v1772_v6, 320 }
 0x33f   :  { %8980 = vst [vmem:[#allocation203_spill] sm:$0xff] %v6774_v46 }
 0x341   :  { %v6776_v1 = vpop.xlane.xlu1 %1389  ;;  %1818 = vbcast.lane.b32.xlu1 %v1772_v6, 344 }
 0x342   :  { %8981 = vst [vmem:[#allocation204_spill] sm:$0xff] %v6776_v1  ;;  %v6778_v12 = vpop.xlane.xlu0 %1387  ;;  %1814 = vbcast.lane.b32.xlu0 %v1772_v6, 336  ;;  %v1839_v1 = vrot.slane %v5669_v41, %v8793_v32 }
 0x343   :  { %8982 = vst [vmem:[#allocation205_spill] sm:$0xff] %v6778_v12 }
 0x345   :  { %1826 = vbcast.lane.b32.xlu1 %v1772_v6, 360  ;;  %v6780_v34 = vpop.xlane.xlu1 %1393 }
 0x346   :  { %8983 = vst [vmem:[#allocation206_spill] sm:$0xff] %v6780_v34  ;;  %v6782_v18 = vpop.xlane.xlu0 %1391  ;;  %1822 = vbcast.lane.b32.xlu0 %v1772_v6, 352 }
 0x347   :  { %8984 = vst [vmem:[#allocation207_spill] sm:$0xff] %v6782_v18 }
 0x349   :  { %1834 = vbcast.lane.b32.xlu1 %v1772_v6, 376  ;;  %v6785_v45 = vpop.xlane.xlu1 %1397 }
 0x34a   :  { %8985 = vst [vmem:[#allocation208_spill] sm:$0xff] %v6785_v45  ;;  %v6787_v46 = vpop.xlane.xlu0 %1395  ;;  %1830 = vbcast.lane.b32.xlu0 %v1772_v6, 368 }
 0x34b   :  { %8986 = vst [vmem:[#allocation209_spill] sm:$0xff] %v6787_v46 }
 0x34d   :  { %1845 = vbcast.lane.b32.xlu1 %v1839_v1, 264  ;;  %v6792_v12 = vpop.xlane.xlu1 %1401 }
 0x34e   :  { %8987 = vst [vmem:[#allocation210_spill] sm:$0xff] %v6792_v12  ;;  %v6794_v14 = vpop.xlane.xlu0 %1399  ;;  %1841 = vbcast.lane.b32.xlu0 %v1839_v1, 256 }
 0x34f   :  { %8988 = vst [vmem:[#allocation211_spill] sm:$0xff] %v6794_v14 }
 0x351   :  { %1853 = vbcast.lane.b32.xlu1 %v1839_v1, 280  ;;  %v6796_v34 = vpop.xlane.xlu1 %1405 }
 0x352   :  { %8989 = vst [vmem:[#allocation212_spill] sm:$0xff] %v6796_v34  ;;  %v6798_v18 = vpop.xlane.xlu0 %1403  ;;  %1849 = vbcast.lane.b32.xlu0 %v1839_v1, 272 }
 0x353   :  { %8990 = vst [vmem:[#allocation213_spill] sm:$0xff] %v6798_v18 }
 0x355   :  { %1861 = vbcast.lane.b32.xlu1 %v1839_v1, 296  ;;  %v6800_v45 = vpop.xlane.xlu1 %1409 }
 0x356   :  { %8991 = vst [vmem:[#allocation214_spill] sm:$0xff] %v6800_v45  ;;  %v6802_v46 = vpop.xlane.xlu0 %1407  ;;  %1857 = vbcast.lane.b32.xlu0 %v1839_v1, 288 }
 0x357   :  { %8992 = vst [vmem:[#allocation215_spill] sm:$0xff] %v6802_v46 }
 0x359   :  { %1869 = vbcast.lane.b32.xlu1 %v1839_v1, 312  ;;  %v6804_v6 = vpop.xlane.xlu1 %1413 }
 0x35a   :  { %8993 = vst [vmem:[#allocation216_spill] sm:$0xff] %v6804_v6  ;;  %v6806_v32 = vpop.xlane.xlu0 %1411  ;;  %1865 = vbcast.lane.b32.xlu0 %v1839_v1, 304  ;;  %v8794_v6 = vsub.s32 7, %v5655_v27 }
 0x35b   :  { %8994 = vst [vmem:[#allocation217_spill] sm:$0xff] %v6806_v32 }
 0x35d   :  { %1877 = vbcast.lane.b32.xlu1 %v1839_v1, 328  ;;  %v6808_v12 = vpop.xlane.xlu1 %1417 }
 0x35e   :  { %8995 = vst [vmem:[#allocation218_spill] sm:$0xff] %v6808_v12  ;;  %v6810_v14 = vpop.xlane.xlu0 %1415  ;;  %1873 = vbcast.lane.b32.xlu0 %v1839_v1, 320 }
 0x35f   :  { %8996 = vst [vmem:[#allocation219_spill] sm:$0xff] %v6810_v14 }
 0x361   :  { %1885 = vbcast.lane.b32.xlu1 %v1839_v1, 344  ;;  %v6812_v34 = vpop.xlane.xlu1 %1421 }
 0x362   :  { %8997 = vst [vmem:[#allocation220_spill] sm:$0xff] %v6812_v34  ;;  %v6814_v18 = vpop.xlane.xlu0 %1419  ;;  %1881 = vbcast.lane.b32.xlu0 %v1839_v1, 336  ;;  %v1906_v34 = vrot.slane %v5669_v41, %v8794_v6 }
 0x363   :  { %8998 = vst [vmem:[#allocation221_spill] sm:$0xff] %v6814_v18 }
 0x365   :  { %1893 = vbcast.lane.b32.xlu1 %v1839_v1, 360  ;;  %v6816_v45 = vpop.permute.xlu1 %1625 }
 0x366   :  { %v6818_v46 = vpop.permute.xlu0 %1629  ;;  %1889 = vbcast.lane.b32.xlu0 %v1839_v1, 352 }
 0x369   :  { %1901 = vbcast.lane.b32.xlu1 %v1839_v1, 376  ;;  %v6821_v32 = vpop.permute.xlu1 %1633 }
 0x36a   :  { %v6823_v12 = vpop.permute.xlu0 %1640  ;;  %1897 = vbcast.lane.b32.xlu0 %v1839_v1, 368 }
 0x36d   :  { %1912 = vbcast.lane.b32.xlu1 %v1906_v34, 264  ;;  %v6828_v18 = vpop.permute.xlu1 %1644 }
 0x36e   :  { %v6830_v14 = vpop.permute.xlu0 %1648  ;;  %1908 = vbcast.lane.b32.xlu0 %v1906_v34, 256 }
 0x371   :  { %1920 = vbcast.lane.b32.xlu1 %v1906_v34, 280  ;;  %v6832_v28 = vpop.permute.xlu1 %1652 }
 0x372   :  { %8999 = vst [vmem:[#allocation222_spill] sm:$0xff] %v6832_v28  ;;  %v6834_v43 = vpop.permute.xlu0 %1656  ;;  %1916 = vbcast.lane.b32.xlu0 %v1906_v34, 272 }
 0x373   :  { %9000 = vst [vmem:[#allocation223_spill] sm:$0xff] %v6834_v43 }
 0x375   :  { %1928 = vbcast.lane.b32.xlu1 %v1906_v34, 296  ;;  %v6836_v50 = vpop.permute.xlu1 %1660 }
 0x376   :  { %9001 = vst [vmem:[#allocation224_spill] sm:$0xff] %v6836_v50  ;;  %v6838_v15 = vpop.permute.xlu0 %1664  ;;  %1924 = vbcast.lane.b32.xlu0 %v1906_v34, 288 }
 0x377   :  { %9002 = vst [vmem:[#allocation225_spill] sm:$0xff] %v6838_v15 }
 0x379   :  { %1936 = vbcast.lane.b32.xlu1 %v1906_v34, 312  ;;  %v6840_v41 = vpop.permute.xlu1 %1668 }
 0x37a   :  { %9003 = vst [vmem:[#allocation226_spill] sm:$0xff] %v6840_v41  ;;  %v6842_v1 = vpop.permute.xlu0 %1672  ;;  %1932 = vbcast.lane.b32.xlu0 %v1906_v34, 304 }
 0x37b   :  { %9004 = vst [vmem:[#allocation227_spill] sm:$0xff] %v6842_v1 }
 0x37d   :  { %1944 = vbcast.lane.b32.xlu1 %v1906_v34, 328  ;;  %v6844_v6 = vpop.permute.xlu1 %1676 }
 0x37e   :  { %9005 = vst [vmem:[#allocation228_spill] sm:$0xff] %v6844_v6  ;;  %v6846_v27 = vpop.permute.xlu0 %1680  ;;  %1940 = vbcast.lane.b32.xlu0 %v1906_v34, 320 }
 0x37f   :  { %9006 = vst [vmem:[#allocation229_spill] sm:$0xff] %v6846_v27  ;;  %v2099_v27 = vadd.f32 %v5800_v26, %v6267_v53  ;;  %v2103_v26 = vadd.f32 %v5863_v3, %v6279_v16  ;;  %v2107_v3 = vadd.f32 %v5903_v52, %v6311_v5  ;;  %v2111_v52 = vadd.f32 %v5941_v37, %v6339_v63 }
 0x380   :  { %v2114_v37 = vadd.f32 %v5959_v7, %v6369_v54  ;;  %v2119_v7 = vadd.f32 %v6022_v9, %v6395_v35  ;;  %v9017_v9 = vld [vmem:[#allocation57_spill] sm:$0xff] }
 0x381   :  { %1952 = vbcast.lane.b32.xlu1 %v1906_v34, 344  ;;  %v6848_v43 = vpop.permute.xlu1 %1684 }
 0x382   :  { %9007 = vst [vmem:[#allocation230_spill] sm:$0xff] %v6848_v43  ;;  %v6850_v28 = vpop.permute.xlu0 %1688  ;;  %1948 = vbcast.lane.b32.xlu0 %v1906_v34, 336  ;;  %v2098_v43 = vadd.f32 %v5822_v39, %v6253_v55 }
 0x383   :  { %9008 = vst [vmem:[#allocation231_spill] sm:$0xff] %v6850_v28 }
 0x385   :  { %1960 = vbcast.lane.b32.xlu1 %v1906_v34, 360  ;;  %v6852_v15 = vpop.permute.xlu1 %1692 }
 0x386   :  { %9009 = vst [vmem:[#allocation232_spill] sm:$0xff] %v6852_v15  ;;  %v6854_v50 = vpop.permute.xlu0 %1696  ;;  %1956 = vbcast.lane.b32.xlu0 %v1906_v34, 352 }
 0x387   :  { %9010 = vst [vmem:[#allocation233_spill] sm:$0xff] %v6854_v50  ;;  %v2100_v50 = vadd.f32 %v5820_v38, %v6251_v11  ;;  %v2104_v38 = vadd.f32 %v5865_v4, %v6295_v2  ;;  %v2108_v4 = vadd.f32 %v5905_v58, %v6327_v13  ;;  %v2113_v58 = vadd.f32 %v5957_v30, %v6353_v60 }
 0x388   :  { %v2116_v30 = vadd.f32 %v5986_v23, %v6383_v59  ;;  %v9012_v23 = vld [vmem:[#allocation106_spill] sm:$0xff]  ;;  %v9015_v59 = vld [vmem:[#allocation56_spill] sm:$0xff] }
 0x389   :  { %1968 = vbcast.lane.b32.xlu1 %v1906_v34, 376  ;;  %v6856_v1 = vpop.permute.xlu1 %1700 }
 0x38a   :  { %9011 = vst [vmem:[#allocation234_spill] sm:$0xff] %v6856_v1  ;;  %v6858_v41 = vpop.permute.xlu0 %1707  ;;  %1964 = vbcast.lane.b32.xlu0 %v1906_v34, 368  ;;  %v2101_v1 = vadd.f32 %v5836_v47, %v6265_v57  ;;  %v2105_v47 = vadd.f32 %v5881_v20, %v6293_v33  ;;  %v2109_v20 = vadd.f32 %v5919_v62, %v6325_v51 }
 0x38b   :  { %v2112_v62 = vadd.f32 %v5943_v29, %v6355_v19  ;;  %v2117_v29 = vadd.f32 %v6000_v61, %v6381_v25  ;;  %v9013_v61 = vld [vmem:[#allocation53_spill] sm:$0xff] }
 0x38c   :  { %v2120_v54 = vadd.f32 %v9013_v61, %v9012_v23  ;;  %v9014_v25 = vld [vmem:[#allocation105_spill] sm:$0xff] }
 0x38d   :  { %2358 = vperm.xlu1 %5105, %v2099_v27   ;;  %v6864_v28 = vpop.permute.xlu1 %1711  ;;  %v2102_v27 = vadd.f32 %v5838_v48, %v6281_v44  ;;  %v2106_v48 = vadd.f32 %v5883_v21, %v6313_v17  ;;  %v2110_v21 = vadd.f32 %v5921_v42, %v6341_v24  ;;  %v2115_v42 = vadd.f32 %v5984_v31, %v6367_v22 }
 0x38e   :  { %v6866_v6 = vpop.permute.xlu0 %1715  ;;  %2355 = vperm.xlu0 %5104, %v2098_v43   ;;  %v2118_v31 = vadd.f32 %v6002_v8, %v6397_v56  ;;  %v2121_v43 = vadd.f32 %v9015_v59, %v9014_v25  ;;  %v9016_v8 = vld [vmem:[#allocation109_spill] sm:$0xff]  ;;  %v9018_v56 = vld [vmem:[#allocation108_spill] sm:$0xff]  ;;  %v9030_v25 = vld [vmem:[#allocation67_spill] sm:$0xff] }
 0x38f   :  { %v2122_v35 = vadd.f32 %v9017_v9, %v9016_v8  ;;  %v9032_v8 = vld [vmem:[#allocation70_spill] sm:$0xff] }
 0x391   :  { %2361 = vperm.xlu1 %5105, %v2100_v50   ;;  %v6872_v34 = vpop.permute.xlu1 %1719 }
 0x392   :  { %v6874_v15 = vpop.permute.xlu0 %1723  ;;  %2364 = vperm.xlu0 %5104, %v2101_v1  }
 0x395   :  { %2367 = vperm.xlu1 %5105, %v2102_v27   ;;  %v6880_v39 = vpop.permute.xlu1 %1727  ;;  %v9019_v27 = vld [vmem:[#allocation59_spill] sm:$0xff] }
 0x396   :  { %v6882_v55 = vpop.permute.xlu0 %1731  ;;  %2370 = vperm.xlu0 %5104, %v2103_v26   ;;  %v2123_v26 = vadd.f32 %v9019_v27, %v9018_v56  ;;  %v9034_v27 = vld [vmem:[#allocation71_spill] sm:$0xff] }
 0x399   :  { %2373 = vperm.xlu1 %5105, %v2104_v38   ;;  %v6888_v11 = vpop.permute.xlu1 %1735 }
 0x39a   :  { %v6890_v57 = vpop.permute.xlu0 %1739  ;;  %2376 = vperm.xlu0 %5104, %v2105_v47  }
 0x39d   :  { %2379 = vperm.xlu1 %5105, %v2106_v48   ;;  %v6896_v53 = vpop.permute.xlu1 %1743  ;;  %v9020_v48 = vld [vmem:[#allocation112_spill] sm:$0xff] }
 0x39e   :  { %v6898_v16 = vpop.permute.xlu0 %1747  ;;  %2382 = vperm.xlu0 %5104, %v2107_v3   ;;  %v9021_v3 = vld [vmem:[#allocation60_spill] sm:$0xff] }
 0x3a1   :  { %2385 = vperm.xlu1 %5105, %v2108_v4   ;;  %v6904_v44 = vpop.permute.xlu1 %1751  ;;  %v2124_v4 = vadd.f32 %v9021_v3, %v9020_v48  ;;  %v9035_v48 = vld [vmem:[#allocation121_spill] sm:$0xff] }
 0x3a2   :  { %v6906_v33 = vpop.permute.xlu0 %1755  ;;  %2388 = vperm.xlu0 %5104, %v2109_v20   ;;  %v9022_v20 = vld [vmem:[#allocation111_spill] sm:$0xff]  ;;  %v9036_v3 = vld [vmem:[#allocation73_spill] sm:$0xff] }
 0x3a5   :  { %2391 = vperm.xlu1 %5105, %v2110_v21   ;;  %v6912_v5 = vpop.permute.xlu1 %1759  ;;  %v9023_v21 = vld [vmem:[#allocation63_spill] sm:$0xff] }
 0x3a6   :  { %v6914_v17 = vpop.permute.xlu0 %1763  ;;  %2394 = vperm.xlu0 %5104, %v2111_v52   ;;  %v2125_v52 = vadd.f32 %v9023_v21, %v9022_v20 }
 0x3a9   :  { %2397 = vperm.xlu1 %5105, %v2112_v62   ;;  %v6920_v2 = vpop.permute.xlu1 %1767 }
 0x3aa   :  { %v6922_v51 = vpop.permute.xlu0 %1774  ;;  %2400 = vperm.xlu0 %5104, %v2113_v58  }
 0x3ad   :  { %2403 = vperm.xlu1 %5105, %v2114_v37   ;;  %v6928_v13 = vpop.permute.xlu1 %1778  ;;  %v9024_v37 = vld [vmem:[#allocation115_spill] sm:$0xff] }
 0x3ae   :  { %v6930_v63 = vpop.permute.xlu0 %1782  ;;  %2406 = vperm.xlu0 %5104, %v2115_v42   ;;  %v9025_v42 = vld [vmem:[#allocation64_spill] sm:$0xff] }
 0x3b1   :  { %2409 = vperm.xlu1 %5105, %v2116_v30   ;;  %v6936_v24 = vpop.permute.xlu1 %1786  ;;  %v2126_v30 = vadd.f32 %v9025_v42, %v9024_v37  ;;  %v9038_v42 = vld [vmem:[#allocation123_spill] sm:$0xff] }
 0x3b2   :  { %v6938_v60 = vpop.permute.xlu0 %1790  ;;  %2412 = vperm.xlu0 %5104, %v2117_v29   ;;  %v9026_v29 = vld [vmem:[#allocation114_spill] sm:$0xff] }
 0x3b5   :  { %2415 = vperm.xlu1 %5105, %v2118_v31   ;;  %v6944_v19 = vpop.permute.xlu1 %1794  ;;  %v9027_v31 = vld [vmem:[#allocation66_spill] sm:$0xff] }
 0x3b6   :  { %v6946_v22 = vpop.permute.xlu0 %1798  ;;  %2418 = vperm.xlu0 %5104, %v2119_v7   ;;  %v2127_v7 = vadd.f32 %v9027_v31, %v9026_v29 }
 0x3b9   :  { %2421 = vperm.xlu1 %5105, %v2120_v54   ;;  %v6952_v50 = vpop.permute.xlu1 %1802  ;;  %v9029_v54 = vld [vmem:[#allocation119_spill] sm:$0xff] }
 0x3ba   :  { %v6954_v1 = vpop.permute.xlu0 %1806  ;;  %2424 = vperm.xlu0 %5104, %v2121_v43   ;;  %v2128_v59 = vadd.f32 %v9030_v25, %v9029_v54  ;;  %v9031_v43 = vld [vmem:[#allocation118_spill] sm:$0xff] }
 0x3bb   :  { %v2129_v9 = vadd.f32 %v9032_v8, %v9031_v43  ;;  %v9041_v54 = vld [vmem:[#allocation78_spill] sm:$0xff]  ;;  %v9043_v43 = vld [vmem:[#allocation81_spill] sm:$0xff] }
 0x3bd   :  { %2427 = vperm.xlu1 %5105, %v2122_v35   ;;  %v6960_v38 = vpop.permute.xlu1 %1810 }
 0x3be   :  { %v6962_v47 = vpop.permute.xlu0 %1814  ;;  %2430 = vperm.xlu0 %5104, %v2123_v26   ;;  %v2130_v26 = vadd.f32 %v9034_v27, %v6488_v40  ;;  %v9040_v40 = vld [vmem:[#allocation126_spill] sm:$0xff] }
 0x3bf   :  { %v2134_v25 = vadd.f32 %v9041_v54, %v9040_v40  ;;  %v9049_v40 = vld [vmem:[#allocation130_spill] sm:$0xff]  ;;  %v9050_v54 = vld [vmem:[#allocation87_spill] sm:$0xff] }
 0x3c1   :  { %2433 = vperm.xlu1 %5105, %v2124_v4   ;;  %v6968_v62 = vpop.permute.xlu1 %1818  ;;  %v2131_v4 = vadd.f32 %v9036_v3, %v9035_v48  ;;  %v9045_v48 = vld [vmem:[#allocation128_spill] sm:$0xff] }
 0x3c2   :  { %v6970_v58 = vpop.permute.xlu0 %1822  ;;  %2436 = vperm.xlu0 %5104, %v2125_v52   ;;  %v9037_v52 = vld [vmem:[#allocation74_spill] sm:$0xff]  ;;  %v9046_v3 = vld [vmem:[#allocation84_spill] sm:$0xff] }
 0x3c3   :  { %v2132_v37 = vadd.f32 %v9037_v52, %v6502_v49  ;;  %v9044_v49 = vld [vmem:[#allocation82_spill] sm:$0xff] }
 0x3c5   :  { %2439 = vperm.xlu1 %5105, %v2126_v30   ;;  %v6976_v23 = vpop.permute.xlu1 %1826  ;;  %v9039_v30 = vld [vmem:[#allocation77_spill] sm:$0xff] }
 0x3c6   :  { %v6978_v61 = vpop.permute.xlu0 %1830  ;;  %2442 = vperm.xlu0 %5104, %v2127_v7   ;;  %v2133_v29 = vadd.f32 %v9039_v30, %v9038_v42  ;;  %v9047_v42 = vld [vmem:[#allocation131_spill] sm:$0xff]  ;;  %v9048_v30 = vld [vmem:[#allocation85_spill] sm:$0xff] }
 0x3c7   :  { %9028 = vst [vmem:[#allocation106_spill] sm:$0xff] %v6978_v61 }
 0x3c9   :  { %2445 = vperm.xlu1 %5105, %v2128_v59   ;;  %v6984_v35 = vpop.permute.xlu1 %1834  ;;  %v9042_v59 = vld [vmem:[#allocation125_spill] sm:$0xff] }
 0x3ca   :  { %9033 = vst [vmem:[#allocation53_spill] sm:$0xff] %v6984_v35  ;;  %v6986_v56 = vpop.permute.xlu0 %1841  ;;  %2448 = vperm.xlu0 %5104, %v2129_v9   ;;  %v2135_v8 = vadd.f32 %v9043_v43, %v9042_v59 }
 0x3cd   :  { %2451 = vperm.xlu1 %5105, %v2130_v26   ;;  %v6992_v20 = vpop.permute.xlu1 %1845  ;;  %v2136_v26 = vadd.f32 %v9044_v49, %v6532_v36  ;;  %v9051_v36 = vld [vmem:[#allocation134_spill] sm:$0xff] }
 0x3ce   :  { %v6994_v21 = vpop.permute.xlu0 %1849  ;;  %2454 = vperm.xlu0 %5104, %v2131_v4   ;;  %v2137_v4 = vadd.f32 %v9046_v3, %v9045_v48  ;;  %v9054_v48 = vld [vmem:[#allocation91_spill] sm:$0xff] }
 0x3d1   :  { %2457 = vperm.xlu1 %5105, %v2132_v37   ;;  %v7000_v31 = vpop.permute.xlu1 %1853 }
 0x3d2   :  { %v7002_v7 = vpop.permute.xlu0 %1857  ;;  %2460 = vperm.xlu0 %5104, %v2133_v29   ;;  %v2138_v29 = vadd.f32 %v9048_v30, %v9047_v42  ;;  %v9055_v42 = vld [vmem:[#allocation137_spill] sm:$0xff]  ;;  %v9056_v30 = vld [vmem:[#allocation92_spill] sm:$0xff] }
 0x3d5   :  { %2463 = vperm.xlu1 %5105, %v2134_v25   ;;  %v7008_v9 = vpop.permute.xlu1 %1861  ;;  %v2139_v25 = vadd.f32 %v9050_v54, %v9049_v40  ;;  %v9057_v40 = vld [vmem:[#allocation136_spill] sm:$0xff] }
 0x3d6   :  { %v7010_v27 = vpop.permute.xlu0 %1865  ;;  %2466 = vperm.xlu0 %5104, %v2135_v8   ;;  %v9052_v8 = vld [vmem:[#allocation88_spill] sm:$0xff]  ;;  %v2143_v54 = vadd.f32 %v6816_v45, %v9057_v40  ;;  %v2146_v45 = vadd.f32 %v6823_v12, %v6671_v10  ;;  %v9064_v12 = vld [vmem:[#allocation163_spill] sm:$0xff] }
 0x3d7   :  { %v2140_v49 = vadd.f32 %v9052_v8, %v9051_v36  ;;  %v9058_v36 = vld [vmem:[#allocation140_spill] sm:$0xff]  ;;  %v9065_v10 = vld [vmem:[#allocation223_spill] sm:$0xff] }
 0x3d8   :  { %v2144_v8 = vadd.f32 %v6818_v46, %v9058_v36  ;;  %v9061_v46 = vld [vmem:[#allocation161_spill] sm:$0xff] }
 0x3d9   :  { %2469 = vperm.xlu1 %5105, %v2136_v26   ;;  %v7016_v52 = vpop.permute.xlu1 %1869  ;;  %v9053_v26 = vld [vmem:[#allocation133_spill] sm:$0xff]  ;;  %v2148_v40 = vadd.f32 %v6830_v14, %v9061_v46  ;;  %v9068_v14 = vld [vmem:[#allocation143_spill] sm:$0xff] }
 0x3da   :  { %v7018_v37 = vpop.permute.xlu0 %1873  ;;  %2472 = vperm.xlu0 %5104, %v2137_v4   ;;  %v2141_v3 = vadd.f32 %v9054_v48, %v9053_v26  ;;  %v2162_v46 = vadd.f32 %v6858_v41, %v9068_v14  ;;  %v9072_v41 = vld [vmem:[#allocation174_spill] sm:$0xff]  ;;  %v9073_v14 = vld [vmem:[#allocation145_spill] sm:$0xff] }
 0x3dd   :  { %2475 = vperm.xlu1 %5105, %v2138_v29   ;;  %v7024_v59 = vpop.permute.xlu1 %1877  ;;  %v2142_v29 = vadd.f32 %v9056_v30, %v9055_v42  ;;  %v2147_v42 = vadd.f32 %v6828_v18, %v6669_v0  ;;  %v2150_v0 = vadd.f32 %v9065_v10, %v9064_v12  ;;  %v9066_v18 = vld [vmem:[#allocation162_spill] sm:$0xff] }
 0x3de   :  { %v7026_v43 = vpop.permute.xlu0 %1881  ;;  %2478 = vperm.xlu0 %5104, %v2139_v25   ;;  %v9070_v12 = vld [vmem:[#allocation146_spill] sm:$0xff] }
 0x3df   :  { %v2164_v10 = vadd.f32 %v6866_v6, %v9070_v12  ;;  %v9074_v6 = vld [vmem:[#allocation177_spill] sm:$0xff]  ;;  %v9075_v12 = vld [vmem:[#allocation191_spill] sm:$0xff] }
 0x3e1   :  { %2481 = vperm.xlu1 %5105, %v2140_v49   ;;  %v7032_v4 = vpop.permute.xlu1 %1885  ;;  %v9059_v49 = vld [vmem:[#allocation139_spill] sm:$0xff] }
 0x3e2   :  { %v7034_v35 = vpop.permute.xlu0 %1889  ;;  %2484 = vperm.xlu0 %5104, %v2141_v3   ;;  %v2145_v26 = vadd.f32 %v6821_v32, %v9059_v49  ;;  %v9062_v32 = vld [vmem:[#allocation160_spill] sm:$0xff] }
 0x3e5   :  { %2487 = vperm.xlu1 %5105, %v2142_v29   ;;  %v7040_v25 = vpop.permute.xlu1 %1893 }
 0x3e6   :  { %v7042_v61 = vpop.permute.xlu0 %1897  ;;  %2490 = vperm.xlu0 %5104, %v2143_v54   ;;  %v9063_v54 = vld [vmem:[#allocation222_spill] sm:$0xff] }
 0x3e7   :  { %v2149_v36 = vadd.f32 %v9063_v54, %v9062_v32  ;;  %v9069_v32 = vld [vmem:[#allocation142_spill] sm:$0xff] }
 0x3e9   :  { %v7048_v48 = vpop.permute.xlu1 %1901  ;;  %2493 = vperm.xlu1 %5105, %v2144_v8  }
 0x3ea   :  { %9060 = vst [vmem:[#allocation105_spill] sm:$0xff] %v7048_v48  ;;  %v1909_v3 = vpop.permute.xlu0 %1908  ;;  %2496 = vperm.xlu0 %5104, %v2145_v26   ;;  %v9067_v26 = vld [vmem:[#allocation224_spill] sm:$0xff] }
 0x3ed   :  { %v1913_v30 = vpop.permute.xlu1 %1912  ;;  %2499 = vperm.xlu1 %5105, %v2146_v45   ;;  %v2151_v45 = vadd.f32 %v9067_v26, %v9066_v18  ;;  %v9071_v18 = vld [vmem:[#allocation175_spill] sm:$0xff] }
 0x3ee   :  { %v7054_v29 = vpop.permute.xlu0 %1916  ;;  %2502 = vperm.xlu0 %5104, %v2147_v42  }
 0x3f1   :  { %v7060_v8 = vpop.permute.xlu1 %1920  ;;  %2505 = vperm.xlu1 %5105, %v2148_v40   ;;  %v2163_v40 = vadd.f32 %v6864_v28, %v9069_v32  ;;  %v2179_v28 = vadd.f32 %v6928_v13, %v9072_v41  ;;  %v9076_v13 = vld [vmem:[#allocation190_spill] sm:$0xff] }
 0x3f2   :  { %v7062_v49 = vpop.permute.xlu0 %1924  ;;  %2508 = vperm.xlu0 %5104, %v2149_v36  }
 0x3f5   :  { %v7068_v48 = vpop.permute.xlu1 %1928  ;;  %2511 = vperm.xlu1 %5105, %v2150_v0   ;;  %v2178_v0 = vadd.f32 %v6922_v51, %v9071_v18 }
 0x3f6   :  { %v7070_v42 = vpop.permute.xlu0 %1932  ;;  %2514 = vperm.xlu0 %5104, %v2151_v45  }
 0x3f9   :  { %v7076_v54 = vpop.permute.xlu1 %1936  ;;  %2547 = vperm.xlu1 %5105, %v2162_v46   ;;  %v2165_v46 = vadd.f32 %v6872_v34, %v9073_v14  ;;  %v9077_v34 = vld [vmem:[#allocation149_spill] sm:$0xff] }
 0x3fa   :  { %v7078_v36 = vpop.permute.xlu0 %1940  ;;  %2550 = vperm.xlu0 %5104, %v2163_v40   ;;  %v2180_v40 = vadd.f32 %v6930_v63, %v9074_v6  ;;  %v2166_v41 = vadd.f32 %v6874_v15, %v9077_v34  ;;  %v9078_v63 = vld [vmem:[#allocation176_spill] sm:$0xff] }
 0x3fd   :  { %v7084_v26 = vpop.permute.xlu1 %1944  ;;  %2553 = vperm.xlu1 %5105, %v2164_v10   ;;  %v2194_v10 = vadd.f32 %v6986_v56, %v9075_v12  ;;  %v9079_v56 = vld [vmem:[#allocation193_spill] sm:$0xff] }
 0x3fe   :  { %v7086_v45 = vpop.permute.xlu0 %1948  ;;  %2595 = vperm.xlu0 %5104, %v2178_v0   ;;  %v2195_v0 = vadd.f32 %v6992_v20, %v9076_v13  ;;  %v2196_v6 = vadd.f32 %v6994_v21, %v9079_v56  ;;  %v9080_v20 = vld [vmem:[#allocation207_spill] sm:$0xff]  ;;  %v9084_v21 = vld [vmem:[#allocation148_spill] sm:$0xff] }
 0x3ff   :  { %v2210_v15 = vadd.f32 %v1909_v3, %v9080_v20  ;;  %v2167_v56 = vadd.f32 %v6880_v39, %v9084_v21  ;;  %v9086_v3 = vld [vmem:[#allocation179_spill] sm:$0xff]  ;;  %v9087_v20 = vld [vmem:[#allocation192_spill] sm:$0xff] }
 0x401   :  { %v7092_v32 = vpop.permute.xlu1 %1952  ;;  %2598 = vperm.xlu1 %5105, %v2179_v28  }
 0x402   :  { %2556 = vperm.xlu0 %5104, %v2165_v46   ;;  %v7096_v51 = vpop.permute.xlu0 %1956  ;;  %v2181_v46 = vadd.f32 %v6936_v24, %v9078_v63  ;;  %v9082_v24 = vld [vmem:[#allocation165_spill] sm:$0xff] }
 0x405   :  { %v7100_v18 = vpop.permute.xlu1 %1960  ;;  %2601 = vperm.xlu1 %5105, %v2180_v40  }
 0x406   :  { %2643 = vperm.xlu0 %5104, %v2194_v10   ;;  %v7106_v28 = vpop.permute.xlu0 %1964  ;;  %v9081_v10 = vld [vmem:[#allocation206_spill] sm:$0xff] }
 0x407   :  { %v2211_v13 = vadd.f32 %v1913_v30, %v9081_v10  ;;  %v2182_v30 = vadd.f32 %v6938_v60, %v9086_v3  ;;  %v9091_v60 = vld [vmem:[#allocation151_spill] sm:$0xff]  ;;  %v9092_v3 = vld [vmem:[#allocation178_spill] sm:$0xff] }
 0x409   :  { %v7108_v14 = vpop.permute.xlu1 %1968  ;;  %2646 = vperm.xlu1 %5105, %v2195_v0  }
 0x40a   :  { %2559 = vperm.xlu0 %5104, %v2166_v41   ;;  %v9083_v41 = vld [vmem:[#allocation225_spill] sm:$0xff] }
 0x40b   :  { %v2152_v63 = vadd.f32 %v9083_v41, %v9082_v24  ;;  %v9088_v24 = vld [vmem:[#allocation209_spill] sm:$0xff]  ;;  %v9089_v41 = vld [vmem:[#allocation164_spill] sm:$0xff] }
 0x40c   :  { %v2212_v39 = vadd.f32 %v7054_v29, %v9088_v24  ;;  %v9094_v29 = vld [vmem:[#allocation195_spill] sm:$0xff] }
 0x40d   :  { %v7114_v40 = vpop.permute.xlu1 %2358  ;;  %2604 = vperm.xlu1 %5105, %v2181_v46   ;;  %v7116_v12 = vpop.permute.xlu0 %2355  ;;  %v2198_v24 = vadd.f32 %v7002_v7, %v9094_v29  ;;  %v9102_v7 = vld [vmem:[#allocation181_spill] sm:$0xff]  ;;  %v9103_v29 = vld [vmem:[#allocation194_spill] sm:$0xff] }
 0x40e   :  { %2649 = vperm.xlu0 %5104, %v2196_v6  }
 0x411   :  { %v7120_v34 = vpop.permute.xlu1 %2361  ;;  %2691 = vperm.xlu1 %5105, %v2210_v15   ;;  %v7122_v0 = vpop.permute.xlu0 %2364  ;;  %v2197_v15 = vadd.f32 %v7000_v31, %v9087_v20  ;;  %v2168_v31 = vadd.f32 %v6882_v55, %v9091_v60  ;;  %v9097_v55 = vld [vmem:[#allocation167_spill] sm:$0xff] }
 0x412   :  { %2694 = vperm.xlu0 %5104, %v2211_v13  }
 0x415   :  { %v7128_v46 = vpop.permute.xlu1 %2367  ;;  %2517 = vperm.xlu1 %5105, %v2152_v63   ;;  %v7130_v6 = vpop.permute.xlu0 %2370  ;;  %v9090_v63 = vld [vmem:[#allocation226_spill] sm:$0xff] }
 0x416   :  { %9085 = vst [vmem:[#allocation56_spill] sm:$0xff] %v7130_v6  ;;  %2562 = vperm.xlu0 %5104, %v2167_v56   ;;  %v2153_v21 = vadd.f32 %v9090_v63, %v9089_v41  ;;  %v9095_v41 = vld [vmem:[#allocation208_spill] sm:$0xff] }
 0x419   :  { %v7136_v10 = vpop.permute.xlu1 %2373  ;;  %2607 = vperm.xlu1 %5105, %v2182_v30   ;;  %v7138_v13 = vpop.permute.xlu0 %2376  ;;  %v2183_v30 = vadd.f32 %v6944_v19, %v9092_v3  ;;  %v9098_v19 = vld [vmem:[#allocation227_spill] sm:$0xff]  ;;  %v9099_v3 = vld [vmem:[#allocation150_spill] sm:$0xff] }
 0x41a   :  { %2652 = vperm.xlu0 %5104, %v2197_v15   ;;  %v2154_v60 = vadd.f32 %v9098_v19, %v9097_v55  ;;  %v9104_v55 = vld [vmem:[#allocation211_spill] sm:$0xff]  ;;  %v9105_v19 = vld [vmem:[#allocation166_spill] sm:$0xff] }
 0x41d   :  { %v7144_v6 = vpop.permute.xlu1 %2379  ;;  %2697 = vperm.xlu1 %5105, %v2212_v39   ;;  %v7146_v56 = vpop.permute.xlu0 %2382  ;;  %v2213_v39 = vadd.f32 %v7060_v8, %v9095_v41  ;;  %v2184_v8 = vadd.f32 %v6946_v22, %v9102_v7  ;;  %v9107_v22 = vld [vmem:[#allocation153_spill] sm:$0xff]  ;;  %v9108_v7 = vld [vmem:[#allocation180_spill] sm:$0xff] }
 0x41e   :  { %2520 = vperm.xlu0 %5104, %v2153_v21  }
 0x421   :  { %v7152_v20 = vpop.permute.xlu1 %2385  ;;  %2565 = vperm.xlu1 %5105, %v2168_v31   ;;  %v7154_v15 = vpop.permute.xlu0 %2388  ;;  %v2169_v31 = vadd.f32 %v6888_v11, %v9099_v3  ;;  %v2214_v11 = vadd.f32 %v7062_v49, %v9104_v55  ;;  %v9109_v49 = vld [vmem:[#allocation197_spill] sm:$0xff] }
 0x422   :  { %9093 = vst [vmem:[#allocation109_spill] sm:$0xff] %v7154_v15  ;;  %2610 = vperm.xlu0 %5104, %v2183_v30   ;;  %v2200_v55 = vadd.f32 %v7010_v27, %v9109_v49  ;;  %v9114_v27 = vld [vmem:[#allocation183_spill] sm:$0xff]  ;;  %v9115_v49 = vld [vmem:[#allocation196_spill] sm:$0xff] }
 0x425   :  { %v7160_v63 = vpop.permute.xlu1 %2391  ;;  %2655 = vperm.xlu1 %5105, %v2198_v24   ;;  %v7162_v21 = vpop.permute.xlu0 %2394  ;;  %v2199_v24 = vadd.f32 %v7008_v9, %v9103_v29  ;;  %v2170_v9 = vadd.f32 %v6890_v57, %v9107_v22  ;;  %v9111_v57 = vld [vmem:[#allocation169_spill] sm:$0xff] }
 0x426   :  { %9096 = vst [vmem:[#allocation57_spill] sm:$0xff] %v7162_v21  ;;  %2700 = vperm.xlu0 %5104, %v2213_v39  }
 0x429   :  { %v7168_v15 = vpop.permute.xlu1 %2397  ;;  %2523 = vperm.xlu1 %5105, %v2154_v60   ;;  %v7170_v30 = vpop.permute.xlu0 %2400  ;;  %v9106_v60 = vld [vmem:[#allocation228_spill] sm:$0xff] }
 0x42a   :  { %9100 = vst [vmem:[#allocation108_spill] sm:$0xff] %v7168_v15  ;;  %9101 = vst [vmem:[#allocation59_spill] sm:$0xff] %v7170_v30  ;;  %2568 = vperm.xlu0 %5104, %v2169_v31   ;;  %v2155_v3 = vadd.f32 %v9106_v60, %v9105_v19  ;;  %v9110_v19 = vld [vmem:[#allocation210_spill] sm:$0xff] }
 0x42d   :  { %v7176_v41 = vpop.permute.xlu1 %2403  ;;  %2613 = vperm.xlu1 %5105, %v2184_v8   ;;  %v7178_v39 = vpop.permute.xlu0 %2406  ;;  %v2185_v8 = vadd.f32 %v6952_v50, %v9108_v7  ;;  %v9112_v50 = vld [vmem:[#allocation229_spill] sm:$0xff]  ;;  %v9113_v7 = vld [vmem:[#allocation152_spill] sm:$0xff] }
 0x42e   :  { %2658 = vperm.xlu0 %5104, %v2199_v24   ;;  %v2156_v22 = vadd.f32 %v9112_v50, %v9111_v57  ;;  %v9116_v57 = vld [vmem:[#allocation213_spill] sm:$0xff]  ;;  %v9117_v50 = vld [vmem:[#allocation168_spill] sm:$0xff] }
 0x431   :  { %v7184_v30 = vpop.permute.xlu1 %2409  ;;  %2703 = vperm.xlu1 %5105, %v2214_v11   ;;  %v7186_v31 = vpop.permute.xlu0 %2412  ;;  %v2215_v11 = vadd.f32 %v7068_v48, %v9110_v19  ;;  %v2186_v48 = vadd.f32 %v6954_v1, %v9114_v27  ;;  %v9120_v1 = vld [vmem:[#allocation155_spill] sm:$0xff]  ;;  %v9121_v27 = vld [vmem:[#allocation182_spill] sm:$0xff] }
 0x432   :  { %2526 = vperm.xlu0 %5104, %v2155_v3  }
 0x435   :  { %v7192_v29 = vpop.permute.xlu1 %2415  ;;  %2571 = vperm.xlu1 %5105, %v2170_v9   ;;  %v7194_v24 = vpop.permute.xlu0 %2418  ;;  %v2171_v9 = vadd.f32 %v6896_v53, %v9113_v7  ;;  %v2216_v53 = vadd.f32 %v7070_v42, %v9116_v57  ;;  %v9124_v42 = vld [vmem:[#allocation199_spill] sm:$0xff] }
 0x436   :  { %2616 = vperm.xlu0 %5104, %v2185_v8   ;;  %v2202_v57 = vadd.f32 %v7018_v37, %v9124_v42  ;;  %v9129_v37 = vld [vmem:[#allocation185_spill] sm:$0xff]  ;;  %v9130_v42 = vld [vmem:[#allocation198_spill] sm:$0xff] }
 0x439   :  { %v7200_v60 = vpop.permute.xlu1 %2421  ;;  %2661 = vperm.xlu1 %5105, %v2200_v55   ;;  %v7202_v3 = vpop.permute.xlu0 %2424  ;;  %v2201_v55 = vadd.f32 %v7016_v52, %v9115_v49  ;;  %v2172_v52 = vadd.f32 %v6898_v16, %v9120_v1  ;;  %v9126_v16 = vld [vmem:[#allocation171_spill] sm:$0xff] }
 0x43a   :  { %2706 = vperm.xlu0 %5104, %v2215_v11  }
 0x43d   :  { %v7208_v15 = vpop.permute.xlu1 %2427  ;;  %2529 = vperm.xlu1 %5105, %v2156_v22   ;;  %v7210_v8 = vpop.permute.xlu0 %2430  ;;  %v9118_v22 = vld [vmem:[#allocation230_spill] sm:$0xff] }
 0x43e   :  { %2574 = vperm.xlu0 %5104, %v2171_v9   ;;  %v2157_v7 = vadd.f32 %v9118_v22, %v9117_v50  ;;  %v9125_v50 = vld [vmem:[#allocation212_spill] sm:$0xff] }
 0x441   :  { %v7216_v19 = vpop.permute.xlu1 %2433  ;;  %2619 = vperm.xlu1 %5105, %v2186_v48   ;;  %v7218_v11 = vpop.permute.xlu0 %2436  ;;  %v2187_v48 = vadd.f32 %v6960_v38, %v9121_v27  ;;  %v9127_v38 = vld [vmem:[#allocation231_spill] sm:$0xff]  ;;  %v9128_v27 = vld [vmem:[#allocation154_spill] sm:$0xff] }
 0x442   :  { %2664 = vperm.xlu0 %5104, %v2201_v55   ;;  %v2158_v1 = vadd.f32 %v9127_v38, %v9126_v16  ;;  %v9131_v16 = vld [vmem:[#allocation215_spill] sm:$0xff]  ;;  %v9132_v38 = vld [vmem:[#allocation170_spill] sm:$0xff] }
 0x445   :  { %v7224_v21 = vpop.permute.xlu1 %2439  ;;  %2709 = vperm.xlu1 %5105, %v2216_v53   ;;  %v7226_v9 = vpop.permute.xlu0 %2442  ;;  %v2217_v53 = vadd.f32 %v7076_v54, %v9125_v50  ;;  %v2188_v54 = vadd.f32 %v6962_v47, %v9129_v37  ;;  %v9134_v47 = vld [vmem:[#allocation157_spill] sm:$0xff]  ;;  %v9135_v37 = vld [vmem:[#allocation184_spill] sm:$0xff] }
 0x446   :  { %9119 = vst [vmem:[#allocation112_spill] sm:$0xff] %v7226_v9  ;;  %2532 = vperm.xlu0 %5104, %v2157_v7  }
 0x449   :  { %v7232_v49 = vpop.permute.xlu1 %2445  ;;  %2577 = vperm.xlu1 %5105, %v2172_v52   ;;  %v7234_v55 = vpop.permute.xlu0 %2448  ;;  %v2173_v52 = vadd.f32 %v6904_v44, %v9128_v27  ;;  %v2218_v44 = vadd.f32 %v7078_v36, %v9131_v16  ;;  %v9136_v36 = vld [vmem:[#allocation201_spill] sm:$0xff] }
 0x44a   :  { %9122 = vst [vmem:[#allocation60_spill] sm:$0xff] %v7232_v49  ;;  %9123 = vst [vmem:[#allocation111_spill] sm:$0xff] %v7234_v55  ;;  %2622 = vperm.xlu0 %5104, %v2187_v48   ;;  %v2204_v16 = vadd.f32 %v7026_v43, %v9136_v36  ;;  %v9142_v43 = vld [vmem:[#allocation187_spill] sm:$0xff]  ;;  %v9143_v36 = vld [vmem:[#allocation200_spill] sm:$0xff] }
 0x44d   :  { %v7240_v22 = vpop.permute.xlu1 %2451  ;;  %2667 = vperm.xlu1 %5105, %v2202_v57   ;;  %v7242_v7 = vpop.permute.xlu0 %2454  ;;  %v2203_v57 = vadd.f32 %v7024_v59, %v9130_v42  ;;  %v2174_v59 = vadd.f32 %v6906_v33, %v9134_v47  ;;  %v9138_v33 = vld [vmem:[#allocation173_spill] sm:$0xff] }
 0x44e   :  { %2712 = vperm.xlu0 %5104, %v2217_v53  }
 0x451   :  { %v7248_v55 = vpop.permute.xlu1 %2457  ;;  %2535 = vperm.xlu1 %5105, %v2158_v1   ;;  %v7250_v48 = vpop.permute.xlu0 %2460  ;;  %v9133_v1 = vld [vmem:[#allocation232_spill] sm:$0xff] }
 0x452   :  { %2580 = vperm.xlu0 %5104, %v2173_v52   ;;  %v2159_v27 = vadd.f32 %v9133_v1, %v9132_v38  ;;  %v9137_v38 = vld [vmem:[#allocation214_spill] sm:$0xff] }
 0x455   :  { %v7256_v50 = vpop.permute.xlu1 %2463  ;;  %2625 = vperm.xlu1 %5105, %v2188_v54   ;;  %v7258_v53 = vpop.permute.xlu0 %2466  ;;  %v2189_v54 = vadd.f32 %v6968_v62, %v9135_v37  ;;  %v9139_v62 = vld [vmem:[#allocation233_spill] sm:$0xff]  ;;  %v9140_v37 = vld [vmem:[#allocation156_spill] sm:$0xff] }
 0x456   :  { %2670 = vperm.xlu0 %5104, %v2203_v57   ;;  %v2160_v47 = vadd.f32 %v9139_v62, %v9138_v33  ;;  %v9144_v33 = vld [vmem:[#allocation217_spill] sm:$0xff]  ;;  %v9145_v62 = vld [vmem:[#allocation172_spill] sm:$0xff] }
 0x459   :  { %v7264_v49 = vpop.permute.xlu1 %2469  ;;  %2715 = vperm.xlu1 %5105, %v2218_v44   ;;  %v7266_v52 = vpop.permute.xlu0 %2472  ;;  %v2219_v44 = vadd.f32 %v7084_v26, %v9137_v38  ;;  %v2190_v26 = vadd.f32 %v6970_v58, %v9142_v43  ;;  %v9147_v58 = vld [vmem:[#allocation159_spill] sm:$0xff]  ;;  %v9148_v43 = vld [vmem:[#allocation186_spill] sm:$0xff] }
 0x45a   :  { %2538 = vperm.xlu0 %5104, %v2159_v27  }
 0x45d   :  { %v7272_v42 = vpop.permute.xlu1 %2475  ;;  %2583 = vperm.xlu1 %5105, %v2174_v59   ;;  %v7274_v57 = vpop.permute.xlu0 %2478  ;;  %v2175_v59 = vadd.f32 %v6912_v5, %v9140_v37  ;;  %v2220_v5 = vadd.f32 %v7086_v45, %v9144_v33  ;;  %v9150_v45 = vld [vmem:[#allocation203_spill] sm:$0xff] }
 0x45e   :  { %2628 = vperm.xlu0 %5104, %v2189_v54   ;;  %v2206_v33 = vadd.f32 %v7034_v35, %v9150_v45  ;;  %v9156_v35 = vld [vmem:[#allocation202_spill] sm:$0xff]  ;;  %v9157_v45 = vld [vmem:[#allocation219_spill] sm:$0xff] }
 0x461   :  { %v7280_v1 = vpop.permute.xlu1 %2481  ;;  %2673 = vperm.xlu1 %5105, %v2204_v16   ;;  %v7282_v27 = vpop.permute.xlu0 %2484  ;;  %v2205_v16 = vadd.f32 %v7032_v4, %v9143_v36  ;;  %v2176_v4 = vadd.f32 %v6914_v17, %v9147_v58  ;;  %v9153_v17 = vld [vmem:[#allocation158_spill] sm:$0xff]  ;;  %v9154_v58 = vld [vmem:[#allocation189_spill] sm:$0xff] }
 0x462   :  { %2718 = vperm.xlu0 %5104, %v2219_v44  }
 0x465   :  { %v7288_v9 = vpop.permute.xlu1 %2487  ;;  %2541 = vperm.xlu1 %5105, %v2160_v47   ;;  %v7290_v54 = vpop.permute.xlu0 %2490  ;;  %v9146_v47 = vld [vmem:[#allocation234_spill] sm:$0xff] }
 0x466   :  { %9141 = vst [vmem:[#allocation63_spill] sm:$0xff] %v7290_v54  ;;  %2586 = vperm.xlu0 %5104, %v2175_v59   ;;  %v2161_v37 = vadd.f32 %v9146_v47, %v9145_v62  ;;  %v9151_v62 = vld [vmem:[#allocation216_spill] sm:$0xff] }
 0x469   :  { %v7296_v38 = vpop.permute.xlu1 %2493  ;;  %2631 = vperm.xlu1 %5105, %v2190_v26   ;;  %v7298_v44 = vpop.permute.xlu0 %2496  ;;  %v2191_v26 = vadd.f32 %v6976_v23, %v9148_v43  ;;  %v2177_v23 = vadd.f32 %v6920_v2, %v9153_v17  ;;  %v9159_v2 = vld [vmem:[#allocation188_spill] sm:$0xff]  ;;  %v9160_v17 = vld [vmem:[#allocation53_spill] sm:$0xff] }
 0x46a   :  { %2676 = vperm.xlu0 %5104, %v2205_v16  }
 0x46d   :  { %v7304_v54 = vpop.permute.xlu1 %2499  ;;  %2721 = vperm.xlu1 %5105, %v2220_v5   ;;  %v7306_v59 = vpop.permute.xlu0 %2502  ;;  %v2221_v5 = vadd.f32 %v7092_v32, %v9151_v62  ;;  %v2207_v32 = vadd.f32 %v7040_v25, %v9156_v35  ;;  %v9164_v25 = vld [vmem:[#allocation218_spill] sm:$0xff]  ;;  %v9165_v35 = vld [vmem:[#allocation204_spill] sm:$0xff] }
 0x46e   :  { %2544 = vperm.xlu0 %5104, %v2161_v37  }
 0x471   :  { %v7312_v36 = vpop.permute.xlu1 %2505  ;;  %2589 = vperm.xlu1 %5105, %v2176_v4   ;;  %v7314_v16 = vpop.permute.xlu0 %2508  ;;  %v9155_v4 = vld [vmem:[#allocation106_spill] sm:$0xff] }
 0x472   :  { %9149 = vst [vmem:[#allocation115_spill] sm:$0xff] %v7314_v16  ;;  %2634 = vperm.xlu0 %5104, %v2191_v26   ;;  %v2192_v43 = vadd.f32 %v9155_v4, %v9154_v58  ;;  %v2193_v58 = vadd.f32 %v9160_v17, %v9159_v2  ;;  %v9161_v4 = vld [vmem:[#allocation205_spill] sm:$0xff]  ;;  %v9170_v17 = vld [vmem:[#allocation220_spill] sm:$0xff] }
 0x473   :  { %v9169_v2 = vld [vmem:[#allocation221_spill] sm:$0xff] }
 0x475   :  { %v7320_v47 = vpop.permute.xlu1 %2511  ;;  %2679 = vperm.xlu1 %5105, %v2206_v33   ;;  %v7322_v37 = vpop.permute.xlu0 %2514  ;;  %v2222_v33 = vadd.f32 %v7096_v51, %v9157_v45  ;;  %v2223_v51 = vadd.f32 %v7100_v18, %v9164_v25 }
 0x476   :  { %9152 = vst [vmem:[#allocation64_spill] sm:$0xff] %v7322_v37  ;;  %2724 = vperm.xlu0 %5104, %v2221_v5  }
 0x479   :  { %v7328_v16 = vpop.permute.xlu1 %2547  ;;  %2592 = vperm.xlu1 %5105, %v2177_v23   ;;  %v7330_v26 = vpop.permute.xlu0 %2550  ;;  %v2208_v23 = vadd.f32 %v7042_v61, %v9161_v4  ;;  %v2224_v61 = vadd.f32 %v7106_v28, %v9169_v2  ;;  %v9177_v28 = vmov 0.0  }
 0x47a   :  { %2637 = vperm.xlu0 %5104, %v2192_v43   ;;  %689 = vst.msk [vmem:[#allocation4] sm:$0xff] %vm8797_vm1, %v9177_v28 }
 0x47d   :  { %v7336_v62 = vpop.permute.xlu1 %2553  ;;  %2682 = vperm.xlu1 %5105, %v2207_v32   ;;  %v7338_v5 = vpop.permute.xlu0 %2595  ;;  %v9166_v32 = vld [vmem:[#allocation105_spill] sm:$0xff] }
 0x47e   :  { %9158 = vst [vmem:[#allocation114_spill] sm:$0xff] %v7338_v5  ;;  %2727 = vperm.xlu0 %5104, %v2222_v33   ;;  %v2209_v45 = vadd.f32 %v9166_v32, %v9165_v35  ;;  %v5451_v32 = vmov -1e+30  }
 0x47f   :  { %688 = vst.msk [vmem:[#allocation3] sm:$0xff] %vm8797_vm1, %v5451_v32  ;;  %vm3400_vm1 = vcmask 1041409  }
 0x481   :  { %v7344_v37 = vpop.permute.xlu1 %2598  ;;  %2640 = vperm.xlu1 %5105, %v2193_v58   ;;  %v7346_v43 = vpop.permute.xlu0 %2556  ;;  %v2225_v58 = vadd.f32 %v7108_v14, %v9170_v17 }
 0x482   :  { %9162 = vst [vmem:[#allocation66_spill] sm:$0xff] %v7344_v37  ;;  %9163 = vst [vmem:[#allocation119_spill] sm:$0xff] %v7346_v43  ;;  %2685 = vperm.xlu0 %5104, %v2208_v23  }
 0x485   :  { %v7352_v5 = vpop.permute.xlu1 %2601  ;;  %2730 = vperm.xlu1 %5105, %v2223_v51   ;;  %v7354_v33 = vpop.permute.xlu0 %2643 }
 0x486   :  { %9167 = vst [vmem:[#allocation67_spill] sm:$0xff] %v7352_v5  ;;  %9168 = vst [vmem:[#allocation118_spill] sm:$0xff] %v7354_v33  ;;  %2688 = vperm.xlu0 %5104, %v2209_v45  }
 0x489   :  { %v7360_v4 = vpop.permute.xlu1 %2646  ;;  %2733 = vperm.xlu1 %5105, %v2224_v61   ;;  %v7362_v23 = vpop.permute.xlu0 %2559 }
 0x48a   :  { %9171 = vst [vmem:[#allocation70_spill] sm:$0xff] %v7360_v4  ;;  %9172 = vst [vmem:[#allocation71_spill] sm:$0xff] %v7362_v23  ;;  %2736 = vperm.xlu0 %5104, %v2225_v58  }
 0x48d   :  { %v7364_v18 = vpop.permute.xlu1 %2604  ;;  %v7366_v25 = vpop.permute.xlu0 %2649 }
 0x48e   :  { %9173 = vst [vmem:[#allocation121_spill] sm:$0xff] %v7364_v18  ;;  %9174 = vst [vmem:[#allocation73_spill] sm:$0xff] %v7366_v25 }
 0x491   :  { %v7368_v51 = vpop.permute.xlu1 %2691  ;;  %v7370_v35 = vpop.permute.xlu0 %2694 }
 0x492   :  { %9175 = vst [vmem:[#allocation74_spill] sm:$0xff] %v7368_v51  ;;  %9176 = vst [vmem:[#allocation123_spill] sm:$0xff] %v7370_v35 }
 0x495   :  { %v7375_v14 = vpop.permute.xlu1 %2517  ;;  %v7377_v45 = vpop.permute.xlu0 %2562 }
 0x496   :  { %9178 = vst [vmem:[#allocation77_spill] sm:$0xff] %v7375_v14  ;;  %9179 = vst [vmem:[#allocation126_spill] sm:$0xff] %v7377_v45 }
 0x499   :  { %v7379_v2 = vpop.permute.xlu1 %2607  ;;  %v7381_v61 = vpop.permute.xlu0 %2652 }
 0x49a   :  { %9180 = vst [vmem:[#allocation78_spill] sm:$0xff] %v7379_v2  ;;  %9181 = vst [vmem:[#allocation125_spill] sm:$0xff] %v7381_v61 }
 0x49d   :  { %v7383_v17 = vpop.permute.xlu1 %2697  ;;  %v7385_v58 = vpop.permute.xlu0 %2520 }
 0x49e   :  { %9182 = vst [vmem:[#allocation81_spill] sm:$0xff] %v7383_v17  ;;  %9183 = vst [vmem:[#allocation82_spill] sm:$0xff] %v7385_v58 }
 0x4a1   :  { %v7387_v51 = vpop.permute.xlu1 %2565  ;;  %v7389_v35 = vpop.permute.xlu0 %2610 }
 0x4a2   :  { %9184 = vst [vmem:[#allocation128_spill] sm:$0xff] %v7387_v51  ;;  %9185 = vst [vmem:[#allocation84_spill] sm:$0xff] %v7389_v35  ;;  %v9196_v35 = vlaneseq }
 0x4a5   :  { %v7391_v32 = vpop.permute.xlu1 %2655  ;;  %v7393_v25 = vpop.permute.xlu0 %2700 }
 0x4a6   :  { %9186 = vst [vmem:[#allocation131_spill] sm:$0xff] %v7391_v32  ;;  %9187 = vst [vmem:[#allocation85_spill] sm:$0xff] %v7393_v25  ;;  %v7412_v32 = vand.u32 127, %v9196_v35 }
 0x4a8   :  { %9197 = vst [vmem:[#allocation136_spill] sm:$0xff] %v7412_v32  ;;  %v2756_v35 = vadd.s32 4294967272, %v7412_v32 }
 0x4a9   :  { %v7395_v28 = vpop.permute.xlu1 %2523  ;;  %v7397_v14 = vpop.permute.xlu0 %2568 }
 0x4aa   :  { %9188 = vst [vmem:[#allocation130_spill] sm:$0xff] %v7395_v28  ;;  %9189 = vst [vmem:[#allocation87_spill] sm:$0xff] %v7397_v14  ;;  %v2742_v14 = vadd.s32 4294967288, %v7412_v32 }
 0x4ad   :  { %v7399_v45 = vpop.permute.xlu1 %2613  ;;  %v7401_v2 = vpop.permute.xlu0 %2658 }
 0x4ae   :  { %9190 = vst [vmem:[#allocation134_spill] sm:$0xff] %v7399_v45  ;;  %9191 = vst [vmem:[#allocation88_spill] sm:$0xff] %v7401_v2 }
 0x4b1   :  { %v7403_v61 = vpop.permute.xlu1 %2703  ;;  %v7405_v17 = vpop.permute.xlu0 %2526 }
 0x4b2   :  { %9192 = vst [vmem:[#allocation133_spill] sm:$0xff] %v7403_v61  ;;  %9193 = vst [vmem:[#allocation91_spill] sm:$0xff] %v7405_v17  ;;  %v2749_v61 = vadd.s32 4294967280, %v7412_v32  ;;  %v9202_v17 = vld [vmem:[#allocation29_spill] sm:$0xff] }
 0x4b3   :  { %v7425_v18 = vsub.s32 %v2742_v14, %v9202_v17  ;;  %v2770_v14 = vadd.s32 4294967256, %v7412_v32  ;;  %v7452_v4 = vsub.s32 %v2756_v35, %v9202_v17  ;;  %v2784_v35 = vadd.s32 4294967240, %v7412_v32 }
 0x4b5   :  { %v7407_v58 = vpop.permute.xlu1 %2571  ;;  %v7409_v51 = vpop.permute.xlu0 %2616  ;;  %v2854_v23 = vrot.slane %v7178_v39, %v7425_v18  ;;  %v7472_v43 = vsub.s32 %v2770_v14, %v9202_v17  ;;  %v2943_v37 = vrot.slane %v7250_v48, %v7452_v4  ;;  %v2791_v14 = vadd.s32 4294967232, %v7412_v32 }
 0x4b6   :  { %9194 = vst [vmem:[#allocation137_spill] sm:$0xff] %v7407_v58  ;;  %9195 = vst [vmem:[#allocation92_spill] sm:$0xff] %v7409_v51  ;;  %v7429_v51 = vsub.s32 %v7412_v32, %v9202_v17  ;;  %v7498_v48 = vsub.s32 %v2784_v35, %v9202_v17 }
 0x4b7   :  { %v2953_v35 = vrot.slane %v7258_v53, %v7472_v43 }
 0x4b9   :  { %v7414_v25 = vpop.permute.xlu1 %2661  ;;  %v7416_v28 = vpop.permute.xlu0 %2706 }
 0x4ba   :  { %9198 = vst [vmem:[#allocation140_spill] sm:$0xff] %v7414_v25  ;;  %9199 = vst [vmem:[#allocation139_spill] sm:$0xff] %v7416_v28  ;;  %v2763_v25 = vadd.s32 4294967264, %v7412_v32 }
 0x4bc   :  { %v7455_v33 = vsub.s32 %v2763_v25, %v9202_v17 }
 0x4bd   :  { %v7419_v45 = vpop.permute.xlu1 %2529  ;;  %v7421_v2 = vpop.permute.xlu0 %2574 }
 0x4be   :  { %9200 = vst [vmem:[#allocation161_spill] sm:$0xff] %v7419_v45  ;;  %9201 = vst [vmem:[#allocation160_spill] sm:$0xff] %v7421_v2  ;;  %v7438_v2 = vsub.s32 %v2749_v61, %v9202_v17  ;;  %v2850_v45 = vrot.slane %v7176_v41, %v7429_v51  ;;  %v2933_v61 = vrot.slane %v7242_v7, %v7425_v18  ;;  %v2777_v41 = vadd.s32 4294967248, %v7412_v32 }
 0x4bf   :  { %v2741_v7 = vrot.slane %v7116_v12, %v7429_v51  ;;  %v2869_v12 = vrot.slane %v7192_v29, %v7455_v33 }
 0x4c0   :  { %v2938_v39 = vrot.slane %v7248_v55, %v7438_v2  ;;  %v2753_v25 = vrot.slane %v7120_v34, %v7438_v2  ;;  %v2855_v55 = vsel %vm2747_vm2, %v2854_v23, %v2850_v45  ;;  %v7484_v34 = vsub.s32 %v2777_v41, %v9202_v17 }
 0x4c1   :  { %v7433_v28 = vpop.permute.xlu1 %2619  ;;  %v7435_v58 = vpop.permute.xlu0 %2664 }
 0x4c2   :  { %9203 = vst [vmem:[#allocation222_spill] sm:$0xff] %v7433_v28  ;;  %9204 = vst [vmem:[#allocation163_spill] sm:$0xff] %v7435_v58  ;;  %v2859_v28 = vrot.slane %v7184_v30, %v7438_v2  ;;  %v2929_v58 = vrot.slane %v7240_v22, %v7429_v51  ;;  %v2746_v22 = vrot.slane %v7114_v40, %v7425_v18 }
 0x4c4   :  { %v2860_v40 = vsel %vm2754_vm3, %v2859_v28, %v2855_v55  ;;  %v2748_v29 = vsel %vm2747_vm2, %v2746_v22, %v2741_v7 }
 0x4c5   :  { %v7460_v5 = vpop.permute.xlu1 %2709  ;;  %v7462_v30 = vpop.permute.xlu0 %2532 }
 0x4c6   :  { %9205 = vst [vmem:[#allocation223_spill] sm:$0xff] %v7460_v5  ;;  %9206 = vst [vmem:[#allocation162_spill] sm:$0xff] %v7462_v30  ;;  %v2864_v30 = vrot.slane %v7186_v31, %v7452_v4  ;;  %v2934_v5 = vsel %vm2747_vm2, %v2933_v61, %v2929_v58  ;;  %v2948_v31 = vrot.slane %v7256_v50, %v7455_v33  ;;  %v2798_v61 = vadd.s32 4294967224, %v7412_v32 }
 0x4c7   :  { %v2939_v23 = vsel %vm2754_vm3, %v2938_v39, %v2934_v5  ;;  %v2760_v58 = vrot.slane %v7122_v0, %v7452_v4  ;;  %v2755_v5 = vsel %vm2754_vm3, %v2753_v25, %v2748_v29  ;;  %v2767_v50 = vrot.slane %v7128_v46, %v7455_v33 }
 0x4c8   :  { %v2865_v41 = vsel %vm2761_vm4, %v2864_v30, %v2860_v40  ;;  %v2874_v39 = vrot.slane %v7194_v24, %v7472_v43  ;;  %v2879_v0 = vrot.slane %v7200_v60, %v7484_v34  ;;  %v2944_v7 = vsel %vm2761_vm4, %v2943_v37, %v2939_v23  ;;  %v9207_v37 = vld [vmem:[#allocation56_spill] sm:$0xff] }
 0x4c9   :  { %v7490_v45 = vpop.permute.xlu1 %2577  ;;  %v7492_v28 = vpop.permute.xlu0 %2622  ;;  %v2870_v22 = vsel %vm2768_vm5, %v2869_v12, %v2865_v41  ;;  %v7514_v25 = vsub.s32 %v2791_v14, %v9202_v17  ;;  %v2805_v46 = vadd.s32 4294967216, %v7412_v32  ;;  %v2949_v30 = vsel %vm2768_vm5, %v2948_v31, %v2944_v7 }
 0x4ca   :  { %v2958_v24 = vrot.slane %v7264_v49, %v7484_v34  ;;  %v2762_v60 = vsel %vm2761_vm4, %v2760_v58, %v2755_v5  ;;  %v2774_v12 = vrot.slane %v9207_v37, %v7472_v43  ;;  %v7528_v53 = vsub.s32 %v2798_v61, %v9202_v17 }
 0x4cb   :  { %v2769_v14 = vsel %vm2768_vm5, %v2767_v50, %v2762_v60  ;;  %v2781_v23 = vrot.slane %v7136_v10, %v7484_v34  ;;  %v2875_v49 = vsel %vm2775_vm6, %v2874_v39, %v2870_v22  ;;  %v2884_v31 = vrot.slane %v7202_v3, %v7498_v48 }
 0x4cc   :  { %v2880_v29 = vsel %vm2782_vm7, %v2879_v0, %v2875_v49  ;;  %v2889_v58 = vrot.slane %v7208_v15, %v7514_v25  ;;  %v2954_v61 = vsel %vm2775_vm6, %v2953_v35, %v2949_v30  ;;  %v2963_v5 = vrot.slane %v7266_v52, %v7498_v48 }
 0x4cd   :  { %v7520_v55 = vpop.permute.xlu1 %2667  ;;  %v7522_v40 = vpop.permute.xlu0 %2712  ;;  %v7543_v50 = vsub.s32 %v2805_v46, %v9202_v17  ;;  %v2812_v10 = vadd.s32 4294967208, %v7412_v32  ;;  %v2959_v41 = vsel %vm2782_vm7, %v2958_v24, %v2954_v61  ;;  %v2968_v3 = vrot.slane %v7272_v42, %v7514_v25 }
 0x4ce   :  { %v2776_v15 = vsel %vm2775_vm6, %v2774_v12, %v2769_v14  ;;  %v2788_v0 = vrot.slane %v7138_v13, %v7498_v48  ;;  %v2819_v52 = vadd.s32 4294967200, %v7412_v32  ;;  %v2795_v35 = vrot.slane %v7144_v6, %v7514_v25 }
 0x4cf   :  { %v2783_v7 = vsel %vm2782_vm7, %v2781_v23, %v2776_v15  ;;  %v2885_v46 = vsel %vm2789_vm8, %v2884_v31, %v2880_v29  ;;  %v2894_v42 = vrot.slane %v7210_v8, %v7528_v53  ;;  %v2899_v24 = vrot.slane %v7216_v19, %v7543_v50 }
 0x4d0   :  { %v2890_v30 = vsel %vm2796_vm9, %v2889_v58, %v2885_v46  ;;  %v2964_v13 = vsel %vm2789_vm8, %v2963_v5, %v2959_v41  ;;  %v2973_v60 = vrot.slane %v7274_v57, %v7528_v53  ;;  %v7570_v37 = vsub.s32 %v2812_v10, %v9202_v17 }
 0x4d1   :  { %v7549_v39 = vpop.permute.xlu1 %2535  ;;  %v7551_v22 = vpop.permute.xlu0 %2580  ;;  %v2826_v6 = vadd.s32 4294967192, %v7412_v32  ;;  %v2969_v12 = vsel %vm2796_vm9, %v2968_v3, %v2964_v13  ;;  %v2978_v8 = vrot.slane %v7280_v1, %v7543_v50  ;;  %v2790_v19 = vsel %vm2789_vm8, %v2788_v0, %v2783_v7 }
 0x4d2   :  { %v2802_v49 = vrot.slane %v7146_v56, %v7528_v53  ;;  %v7584_v57 = vsub.s32 %v2819_v52, %v9202_v17  ;;  %v2833_v31 = vadd.s32 4294967184, %v7412_v32  ;;  %v2797_v29 = vsel %vm2796_vm9, %v2795_v35, %v2790_v19  ;;  %v9208_v52 = vld [vmem:[#allocation109_spill] sm:$0xff] }
 0x4d3   :  { %v2809_v58 = vrot.slane %v7152_v20, %v7543_v50  ;;  %v2895_v1 = vsel %vm2803_vm10, %v2894_v42, %v2890_v30  ;;  %v2904_v61 = vrot.slane %v7218_v11, %v7570_v37  ;;  %v2974_v10 = vsel %vm2803_vm10, %v2973_v60, %v2969_v12  ;;  %v9209_v30 = vld [vmem:[#allocation112_spill] sm:$0xff] }
 0x4d4   :  { %v2900_v5 = vsel %vm2810_vm11, %v2899_v24, %v2895_v1  ;;  %v2909_v56 = vrot.slane %v7224_v21, %v7584_v57  ;;  %v2983_v41 = vrot.slane %v7282_v27, %v7570_v37  ;;  %v7600_v3 = vsub.s32 %v2826_v6, %v9202_v17  ;;  %v9210_v60 = vld [vmem:[#allocation60_spill] sm:$0xff] }
 0x4d5   :  { %v7576_v14 = vpop.permute.xlu1 %2625  ;;  %v7578_v23 = vpop.permute.xlu0 %2670  ;;  %v2979_v20 = vsel %vm2810_vm11, %v2978_v8, %v2974_v10  ;;  %v2988_v15 = vrot.slane %v7288_v9, %v7584_v57  ;;  %v2804_v21 = vsel %vm2803_vm10, %v2802_v49, %v2797_v29  ;;  %v2816_v7 = vrot.slane %v9208_v52, %v7570_v37  ;;  %v9211_v8 = vld [vmem:[#allocation63_spill] sm:$0xff] }
 0x4d6   :  { %v7613_v27 = vsub.s32 %v2833_v31, %v9202_v17  ;;  %v2840_v35 = vadd.s32 4294967176, %v7412_v32  ;;  %v2811_v46 = vsel %vm2810_vm11, %v2809_v58, %v2804_v21  ;;  %v2823_v42 = vrot.slane %v7160_v63, %v7584_v57 }
 0x4d7   :  { %v2905_v9 = vsel %vm2817_vm12, %v2904_v61, %v2900_v5  ;;  %v2914_v24 = vrot.slane %v9209_v30, %v7600_v3  ;;  %v2984_v12 = vsel %vm2817_vm12, %v2983_v41, %v2979_v20  ;;  %v2993_v19 = vrot.slane %v9211_v8, %v7600_v3  ;;  %v9212_v5 = vld [vmem:[#allocation57_spill] sm:$0xff] }
 0x4d8   :  { %v2910_v13 = vsel %vm8798_vm13, %v2909_v56, %v2905_v9  ;;  %v2919_v6 = vrot.slane %v9210_v60, %v7613_v27  ;;  %v2989_v49 = vsel %vm8798_vm13, %v2988_v15, %v2984_v12  ;;  %v2998_v63 = vrot.slane %v7296_v38, %v7613_v27  ;;  %v9214_v15 = vld [vmem:[#allocation111_spill] sm:$0xff] }
 0x4d9   :  { %v7605_v11 = vpop.permute.xlu1 %2715  ;;  %v7607_v0 = vpop.permute.xlu0 %2538  ;;  %v3008_v31 = vrot.slane %v7304_v54, %v7429_v51  ;;  %v3012_v29 = vrot.slane %v7306_v59, %v7425_v18  ;;  %v2818_v61 = vsel %vm2817_vm12, %v2816_v7, %v2811_v46  ;;  %v2830_v56 = vrot.slane %v9212_v5, %v7600_v3  ;;  %v9213_v59 = vld [vmem:[#allocation108_spill] sm:$0xff]  ;;  %v9216_v60 = vld [vmem:[#allocation59_spill] sm:$0xff] }
 0x4da   :  { %v7643_v10 = vsub.s32 %v2840_v35, %v9202_v17  ;;  %v3017_v38 = vrot.slane %v7312_v36, %v7438_v2  ;;  %v2825_v54 = vsel %vm8798_vm13, %v2823_v42, %v2818_v61  ;;  %v2837_v41 = vrot.slane %v9213_v59, %v7613_v27  ;;  %v9215_v42 = vld [vmem:[#allocation115_spill] sm:$0xff]  ;;  %v9217_v61 = vld [vmem:[#allocation64_spill] sm:$0xff] }
 0x4db   :  { %v2915_v20 = vsel %vm2831_vm14, %v2914_v24, %v2910_v13  ;;  %v2994_v52 = vsel %vm2831_vm14, %v2993_v19, %v2989_v49  ;;  %v3013_v46 = vsel %vm2747_vm2, %v3012_v29, %v3008_v31  ;;  %v3022_v9 = vrot.slane %v9215_v42, %v7452_v4  ;;  %v9221_v42 = vld [vmem:[#allocation67_spill] sm:$0xff] }
 0x4dc   :  { %v2924_v21 = vrot.slane %v9214_v15, %v7643_v10  ;;  %v3003_v7 = vrot.slane %v7298_v44, %v7643_v10  ;;  %v2920_v35 = vsel %vm2838_vm15, %v2919_v6, %v2915_v20  ;;  %v2999_v36 = vsel %vm2838_vm15, %v2998_v63, %v2994_v52 }
 0x4dd   :  { %v7635_v58 = vpop.permute.xlu1 %2583  ;;  %v7637_v1 = vpop.permute.xlu0 %2628  ;;  %v2832_v13 = vsel %vm2831_vm14, %v2830_v56, %v2825_v54  ;;  %v2844_v12 = vrot.slane %v9216_v60, %v7643_v10  ;;  %v3018_v44 = vsel %vm2754_vm3, %v3017_v38, %v3013_v46  ;;  %v3027_v6 = vrot.slane %v7320_v47, %v7455_v33  ;;  %v9218_v56 = vld [vmem:[#allocation66_spill] sm:$0xff] }
 0x4de   :  { %v2839_v8 = vsel %vm2838_vm15, %v2837_v41, %v2832_v13  ;;  %vm3402_vm13 = vcmask 1042434   ;;  %v2925_v19 = vsel %vm2845_vm0, %v2924_v21, %v2920_v35  ;;  %v3004_v49 = vsel %vm2845_vm0, %v3003_v7, %v2999_v36  ;;  %v9220_v21 = vld [vmem:[#allocation114_spill] sm:$0xff] }
 0x4df   :  { %v3087_v63 = vrot.slane %v7328_v16, %v7429_v51  ;;  %v3091_v31 = vrot.slane %v7330_v26, %v7425_v18  ;;  %v3023_v29 = vsel %vm2761_vm4, %v3022_v9, %v3018_v44  ;;  %v3032_v47 = vrot.slane %v9217_v61, %v7472_v43  ;;  %v9219_v26 = vld [vmem:[#allocation119_spill] sm:$0xff]  ;;  %v9222_v44 = vld [vmem:[#allocation118_spill] sm:$0xff]  ;;  %v9226_v61 = vld [vmem:[#allocation73_spill] sm:$0xff] }
 0x4e0   :  { %v3096_v5 = vrot.slane %v7336_v62, %v7438_v2  ;;  %v3170_v38 = vrot.slane %v9218_v56, %v7425_v18  ;;  %v2846_v16 = vsel %vm2845_vm0, %v2844_v12, %v2839_v8  ;;  %v3028_v41 = vsel %vm2768_vm5, %v3027_v6, %v3023_v29  ;;  %v9223_v8 = vld [vmem:[#allocation70_spill] sm:$0xff] }
 0x4e1   :  { %v7661_v30 = vpop.permute.xlu1 %2673  ;;  %v7663_v24 = vpop.permute.xlu0 %2718  ;;  %v3101_v20 = vrot.slane %v9219_v26, %v7452_v4  ;;  %v3401_v15 = vsel %vm3400_vm1, %v2925_v19, %v2846_v16  ;;  %v3166_v52 = vrot.slane %v9220_v21, %v7429_v51  ;;  %v3092_v7 = vsel %vm2747_vm2, %v3091_v31, %v3087_v63  ;;  %v9225_v31 = vld [vmem:[#allocation121_spill] sm:$0xff]  ;;  %v9231_v21 = vld [vmem:[#allocation78_spill] sm:$0xff] }
 0x4e2   :  { %v7697_v62 = vsel %vm3402_vm13, %v3004_v49, %v3401_v15  ;;  %v3033_v35 = vsel %vm2775_vm6, %v3032_v47, %v3028_v41  ;;  %v3097_v36 = vsel %vm2754_vm3, %v3096_v5, %v3092_v7  ;;  %v3175_v9 = vrot.slane %v9221_v42, %v7438_v2  ;;  %v9224_v49 = vld [vmem:[#allocation71_spill] sm:$0xff]  ;;  %v9227_v5 = vld [vmem:[#allocation74_spill] sm:$0xff]  ;;  %v9229_v41 = vld [vmem:[#allocation77_spill] sm:$0xff] }
 0x4e3   :  { %v3171_v46 = vsel %vm2747_vm2, %v3170_v38, %v3166_v52  ;;  %v3102_v12 = vsel %vm2761_vm4, %v3101_v20, %v3097_v36  ;;  %v3245_v6 = vrot.slane %v9222_v44, %v7429_v51  ;;  %v3249_v19 = vrot.slane %v9223_v8, %v7425_v18  ;;  %v9228_v38 = vld [vmem:[#allocation123_spill] sm:$0xff]  ;;  %v9230_v20 = vld [vmem:[#allocation126_spill] sm:$0xff]  ;;  %v9232_v7 = vld [vmem:[#allocation125_spill] sm:$0xff] }
 0x4e4   :  { %v3106_v63 = vrot.slane %v9224_v49, %v7455_v33  ;;  %v3180_v29 = vrot.slane %v9225_v31, %v7452_v4  ;;  %v3254_v47 = vrot.slane %v9226_v61, %v7438_v2  ;;  %v3324_v56 = vrot.slane %v9227_v5, %v7429_v51  ;;  %v9233_v44 = vld [vmem:[#allocation81_spill] sm:$0xff]  ;;  %v9234_v8 = vld [vmem:[#allocation82_spill] sm:$0xff]  ;;  %v9235_v49 = vld [vmem:[#allocation128_spill] sm:$0xff] }
 0x4e5   :  { %v7685_v54 = vpop.permute.xlu1 %2541  ;;  %v7687_v59 = vpop.permute.xlu0 %2586  ;;  %v3328_v16 = vrot.slane %v9228_v38, %v7425_v18  ;;  %v3037_v26 = vrot.slane %v9229_v41, %v7484_v34  ;;  %v3111_v15 = vrot.slane %v9230_v20, %v7472_v43  ;;  %v3185_v52 = vrot.slane %v9231_v21, %v7455_v33  ;;  %v9236_v20 = vld [vmem:[#allocation84_spill] sm:$0xff] }
 0x4e6   :  { %v3259_v36 = vrot.slane %v9232_v7, %v7452_v4  ;;  %v3176_v42 = vsel %vm2754_vm3, %v3175_v9, %v3171_v46  ;;  %v3333_v51 = vrot.slane %v9233_v44, %v7438_v2  ;;  %v3042_v18 = vrot.slane %v9234_v8, %v7498_v48  ;;  %v9237_v9 = vld [vmem:[#allocation131_spill] sm:$0xff]  ;;  %v9238_v8 = vld [vmem:[#allocation85_spill] sm:$0xff] }
 0x4e7   :  { %v3116_v31 = vrot.slane %v9235_v49, %v7484_v34  ;;  %v3250_v38 = vsel %vm2747_vm2, %v3249_v19, %v3245_v6  ;;  %v3107_v41 = vsel %vm2768_vm5, %v3106_v63, %v3102_v12  ;;  %v3190_v46 = vrot.slane %v9236_v20, %v7472_v43 }
 0x4e8   :  { %v3264_v2 = vrot.slane %v9237_v9, %v7455_v33  ;;  %v3181_v21 = vsel %vm2761_vm4, %v3180_v29, %v3176_v42  ;;  %v3255_v7 = vsel %vm2754_vm3, %v3254_v47, %v3250_v38  ;;  %v3329_v44 = vsel %vm2747_vm2, %v3328_v16, %v3324_v56  ;;  %v9239_v47 = vld [vmem:[#allocation130_spill] sm:$0xff] }
 0x4e9   :  { %v7705_v13 = vpop.permute.xlu1 %2631  ;;  %v7707_v60 = vpop.permute.xlu0 %2676  ;;  %v3338_v49 = vrot.slane %v9238_v8, %v7452_v4  ;;  %v3038_v17 = vsel %vm2782_vm7, %v3037_v26, %v3033_v35  ;;  %v3112_v6 = vsel %vm2775_vm6, %v3111_v15, %v3107_v41  ;;  %v3186_v12 = vsel %vm2768_vm5, %v3185_v52, %v3181_v21  ;;  %v9240_v15 = vld [vmem:[#allocation87_spill] sm:$0xff]  ;;  %v9246_v21 = vld [vmem:[#allocation92_spill] sm:$0xff] }
 0x4ea   :  { %v3260_v19 = vsel %vm2761_vm4, %v3259_v36, %v3255_v7  ;;  %v3334_v63 = vsel %vm2754_vm3, %v3333_v51, %v3329_v44  ;;  %v3043_v20 = vsel %vm2789_vm8, %v3042_v18, %v3038_v17  ;;  %v3117_v29 = vsel %vm2782_vm7, %v3116_v31, %v3112_v6  ;;  %v9241_v36 = vld [vmem:[#allocation134_spill] sm:$0xff]  ;;  %v9242_v51 = vld [vmem:[#allocation88_spill] sm:$0xff]  ;;  %v9243_v31 = vld [vmem:[#allocation133_spill] sm:$0xff] }
 0x4eb   :  { %v3047_v56 = vrot.slane %v9239_v47, %v7514_v25  ;;  %v3191_v35 = vsel %vm2775_vm6, %v3190_v46, %v3186_v12  ;;  %v3265_v26 = vsel %vm2768_vm5, %v3264_v2, %v3260_v19  ;;  %v3121_v52 = vrot.slane %v9240_v15, %v7498_v48  ;;  %v9244_v41 = vld [vmem:[#allocation91_spill] sm:$0xff]  ;;  %v9245_v46 = vld [vmem:[#allocation137_spill] sm:$0xff]  ;;  %v9247_v44 = vld [vmem:[#allocation140_spill] sm:$0xff] }
 0x4ec   :  { %v3195_v42 = vrot.slane %v9241_v36, %v7484_v34  ;;  %v3339_v17 = vsel %vm2761_vm4, %v3338_v49, %v3334_v63  ;;  %v3269_v18 = vrot.slane %v9242_v51, %v7472_v43  ;;  %v3343_v38 = vrot.slane %v9243_v31, %v7455_v33  ;;  %v9248_v49 = vld [vmem:[#allocation139_spill] sm:$0xff]  ;;  %v9249_v19 = vld [vmem:[#allocation161_spill] sm:$0xff]  ;;  %v9250_v63 = vld [vmem:[#allocation160_spill] sm:$0xff] }
 0x4ed   :  { %v7739_v61 = vpop.permute.xlu1 %2721  ;;  %v7741_v5 = vpop.permute.xlu0 %2544  ;;  %v3052_v9 = vrot.slane %v9244_v41, %v7528_v53  ;;  %v3126_v2 = vrot.slane %v9245_v46, %v7514_v25  ;;  %v3200_v7 = vrot.slane %v9246_v21, %v7498_v48  ;;  %v3274_v8 = vrot.slane %v9247_v44, %v7484_v34  ;;  %v9251_v15 = vld [vmem:[#allocation222_spill] sm:$0xff] }
 0x4ee   :  { %v3348_v6 = vrot.slane %v9248_v49, %v7472_v43  ;;  %v3048_v12 = vsel %vm2796_vm9, %v3047_v56, %v3043_v20  ;;  %v3057_v33 = vrot.slane %v9249_v19, %v7543_v50  ;;  %v3131_v47 = vrot.slane %v9250_v63, %v7528_v53  ;;  %v9252_v43 = vld [vmem:[#allocation163_spill] sm:$0xff]  ;;  %v9254_v63 = vld [vmem:[#allocation162_spill] sm:$0xff] }
 0x4ef   :  { %v3205_v36 = vrot.slane %v9251_v15, %v7514_v25  ;;  %v3122_v41 = vsel %vm2789_vm8, %v3121_v52, %v3117_v29  ;;  %v3196_v46 = vsel %vm2782_vm7, %v3195_v42, %v3191_v35  ;;  %v3279_v20 = vrot.slane %v9252_v43, %v7498_v48  ;;  %v9253_v56 = vld [vmem:[#allocation223_spill] sm:$0xff] }
 0x4f0   :  { %v3353_v21 = vrot.slane %v9253_v56, %v7484_v34  ;;  %v3270_v44 = vsel %vm2775_vm6, %v3269_v18, %v3265_v26  ;;  %v3344_v49 = vsel %vm2768_vm5, %v3343_v38, %v3339_v17  ;;  %v3053_v19 = vsel %vm2803_vm10, %v3052_v9, %v3048_v12 }
 0x4f1   :  { %v7763_v16 = vpop.permute.xlu1 %2589  ;;  %v7765_v4 = vpop.permute.xlu0 %2634  ;;  %v3062_v15 = vrot.slane %v9254_v63, %v7570_v37  ;;  %v3127_v32 = vsel %vm2796_vm9, %v3126_v2, %v3122_v41  ;;  %v3201_v29 = vsel %vm2789_vm8, %v3200_v7, %v3196_v46  ;;  %v3275_v35 = vsel %vm2782_vm7, %v3274_v8, %v3270_v44 }
 0x4f2   :  { %v3349_v52 = vsel %vm2775_vm6, %v3348_v6, %v3344_v49  ;;  %v3058_v42 = vsel %vm2810_vm11, %v3057_v33, %v3053_v19  ;;  %v3132_v34 = vsel %vm2803_vm10, %v3131_v47, %v3127_v32  ;;  %v3206_v26 = vsel %vm2796_vm9, %v3205_v36, %v3201_v29 }
 0x4f3   :  { %v3136_v17 = vrot.slane %v7490_v45, %v7543_v50  ;;  %v3280_v9 = vsel %vm2789_vm8, %v3279_v20, %v3275_v35  ;;  %v3354_v2 = vsel %vm2782_vm7, %v3353_v21, %v3349_v52  ;;  %v3210_v7 = vrot.slane %v7492_v28, %v7528_v53 }
 0x4f4   :  { %v3284_v8 = vrot.slane %v7520_v55, %v7514_v25  ;;  %v3063_v32 = vsel %vm2817_vm12, %v3062_v15, %v3058_v42  ;;  %v3358_v6 = vrot.slane %v7522_v40, %v7498_v48  ;;  %v3067_v45 = vrot.slane %v7549_v39, %v7584_v57 }
 0x4f5   :  { %v7795_v51 = vpop.permute.xlu1 %2679  ;;  %v7797_v31 = vpop.permute.xlu0 %2724  ;;  %v3141_v12 = vrot.slane %v7551_v22, %v7570_v37  ;;  %v3215_v33 = vrot.slane %v7576_v14, %v7543_v50  ;;  %v3289_v28 = vrot.slane %v7578_v23, %v7528_v53  ;;  %v3363_v55 = vrot.slane %v7605_v11, %v7514_v25 }
 0x4f6   :  { %v3072_v47 = vrot.slane %v7607_v0, %v7600_v3  ;;  %v3137_v48 = vsel %vm2810_vm11, %v3136_v17, %v3132_v34  ;;  %v3146_v40 = vrot.slane %v7635_v58, %v7584_v57  ;;  %v3220_v39 = vrot.slane %v7637_v1, %v7570_v37 }
 0x4f7   :  { %v3294_v22 = vrot.slane %v7661_v30, %v7543_v50  ;;  %v3211_v23 = vsel %vm2803_vm10, %v3210_v7, %v3206_v26  ;;  %v3285_v25 = vsel %vm2796_vm9, %v3284_v8, %v3280_v9  ;;  %v3368_v11 = vrot.slane %v7663_v24, %v7528_v53 }
 0x4f8   :  { %v3077_v0 = vrot.slane %v7685_v54, %v7613_v27  ;;  %vm3404_vm2 = vcmask 1043459   ;;  %v3359_v58 = vsel %vm2789_vm8, %v3358_v6, %v3354_v2  ;;  %vm9255_vm3 = vcmask 851712  }
 0x4f9   :  { %v7819_v18 = vpop.permute.xlu1 %2592  ;;  %v7821_v38 = vpop.permute.xlu0 %2637  ;;  %v3068_v1 = vsel %vm9255_vm3, %v3067_v45, %v3063_v32  ;;  %v3142_v41 = vsel %vm2817_vm12, %v3141_v12, %v3137_v48  ;;  %v3151_v30 = vrot.slane %v7687_v59, %v7600_v3  ;;  %v3216_v46 = vsel %vm2810_vm11, %v3215_v33, %v3211_v23  ;;  %vm9256_vm5 = vmmov %vm9255_vm3 }
 0x4fa   :  { %v3290_v43 = vsel %vm2803_vm10, %v3289_v28, %v3285_v25  ;;  %v3364_v20 = vsel %vm2796_vm9, %v3363_v55, %v3359_v58  ;;  %v3073_v53 = vsel %vm2831_vm14, %v3072_v47, %v3068_v1  ;;  %vm3406_vm4 = vcmask 1044484   ;;  %vm9257_vm8 = vmmov %vm9255_vm3 }
 0x4fb   :  { %v3147_v24 = vsel %vm9256_vm5, %v3146_v40, %v3142_v41  ;;  %v3221_v54 = vsel %vm2817_vm12, %v3220_v39, %v3216_v46  ;;  %v3295_v56 = vsel %vm2810_vm11, %v3294_v22, %v3290_v43  ;;  %v3225_v21 = vrot.slane %v7705_v13, %v7584_v57  ;;  %vm9258_vm9 = vmmov %vm9255_vm3 }
 0x4fc   :  { %vm3408_vm6 = vcmask 1045509   ;;  %v3369_v49 = vsel %vm2803_vm10, %v3368_v11, %v3364_v20  ;;  %v3078_v19 = vsel %vm2838_vm15, %v3077_v0, %v3073_v53  ;;  %v3299_v63 = vrot.slane %v7707_v60, %v7570_v37  ;;  %vm9259_vm10 = vmmov %vm9255_vm3  ;;  %v9262_v53 = vld [vmem:[#allocation30_spill] sm:$0xff] }
 0x4fd   :  { %v2683_v14 = vpop.permute.xlu1 %2682  ;;  %v2728_v36 = vpop.permute.xlu0 %2727  ;;  %v3082_v15 = vrot.slane %v7741_v5, %v7643_v10  ;;  %vm3410_vm7 = vcmask 1046534   ;;  %v3152_v29 = vsel %vm2831_vm14, %v3151_v30, %v3147_v24  ;;  %v3156_v35 = vrot.slane %v7763_v16, %v7613_v27 }
 0x4fe   :  { %v3230_v13 = vrot.slane %v7765_v4, %v7600_v3  ;;  %v3304_v52 = vrot.slane %v7795_v51, %v7584_v57  ;;  %v3373_v42 = vrot.slane %v7739_v61, %v7543_v50  ;;  %v3161_v60 = vrot.slane %v7819_v18, %v7643_v10 }
 0x4ff   :  { %v3235_v5 = vrot.slane %v7821_v38, %v7613_v27  ;;  %v3309_v34 = vrot.slane %v2683_v14, %v7600_v3  ;;  %v3226_v26 = vsel %vm9257_vm8, %v3225_v21, %v3221_v54  ;;  %v3378_v16 = vrot.slane %v7797_v31, %v7570_v37  ;;  %v9263_v54 = vld [vmem:[#allocation31_spill] sm:$0xff]  ;;  %v9264_v21 = vld [vmem:[#allocation32_spill] sm:$0xff] }
 0x500   :  { %v3300_v50 = vsel %vm2817_vm12, %v3299_v63, %v3295_v56  ;;  %v3083_v61 = vsel %vm2845_vm0, %v3082_v15, %v3078_v19  ;;  %v3383_v18 = vrot.slane %v2728_v36, %v7584_v57  ;;  %v3157_v2 = vsel %vm2838_vm15, %v3156_v35, %v3152_v29  ;;  %v9260_v36 = vld [vmem:[#allocation136_spill] sm:$0xff] }
 0x501   :  { %v2641_v44 = vpop.permute.xlu1 %2640  ;;  %v2686_v59 = vpop.permute.xlu0 %2685  ;;  %v3231_v7 = vsel %vm2831_vm14, %v3230_v13, %v3226_v26  ;;  %v3305_v37 = vsel %vm9258_vm9, %v3304_v52, %v3300_v50  ;;  %v3374_v8 = vsel %vm2810_vm11, %v3373_v42, %v3369_v49  ;;  %v3162_v32 = vsel %vm2845_vm0, %v3161_v60, %v3157_v2  ;;  %v3432_v50 = vld [vmem:[#allocation4] sm:$0xff] }
 0x502   :  { %v3240_v4 = vrot.slane %v2641_v44, %v7643_v10  ;;  %v3314_v51 = vrot.slane %v2686_v59, %v7613_v27  ;;  %v3236_v6 = vsel %vm2838_vm15, %v3235_v5, %v3231_v7  ;;  %v3310_v45 = vsel %vm2831_vm14, %v3309_v34, %v3305_v37  ;;  %v9265_v59 = vld [vmem:[#allocation29_spill] sm:$0xff] }
 0x503   :  { %v3405_v57 = vsel %vm3404_vm2, %v3083_v61, %v7697_v62  ;;  %v3379_v12 = vsel %vm2817_vm12, %v3378_v16, %v3374_v8  ;;  %vm3412_vm11 = vcmask 1047559   ;;  %vm1428_vm12 = vcmp.lt.s32.totalorder %v9260_v36, 8 }
 0x504   :  { %v3241_v33 = vsel %vm2845_vm0, %v3240_v4, %v3236_v6  ;;  %v3315_v28 = vsel %vm2838_vm15, %v3314_v51, %v3310_v45  ;;  %v3407_v22 = vsel %vm3406_vm4, %v3162_v32, %v3405_v57  ;;  %v9266_v49 = vsub.s32 3, %v9265_v59 }
 0x505   :  { %v2731_v17 = vpop.permute.xlu1 %2730  ;;  %v2689_v9 = vpop.permute.xlu0 %2688  ;;  %v3409_v23 = vsel %vm3408_vm6, %v3241_v33, %v3407_v22  ;;  %v9267_v63 = vsub.s32 4, %v9265_v59  ;;  %v9268_v29 = vsub.s32 5, %v9265_v59  ;;  %v9269_v13 = vsub.s32 6, %v9265_v59 }
 0x506   :  { %v3319_v38 = vrot.slane %v2689_v9, %v7643_v10  ;;  %v3388_v31 = vrot.slane %v2731_v17, %v7600_v3  ;;  %v3384_v3 = vsel %vm9259_vm10, %v3383_v18, %v3379_v12  ;;  %v9270_v42 = vsub.s32 7, %v9265_v59  ;;  %v9278_v59 = vld [vmem:[#allocation34_spill] sm:$0xff] }
 0x508   :  { %v3320_v48 = vsel %vm2845_vm0, %v3319_v38, %v3315_v28  ;;  %v3389_v62 = vsel %vm2831_vm14, %v3388_v31, %v3384_v3  ;;  %vm9261_vm14 = vcmask 7168  }
 0x509   :  { %v2734_v55 = vpop.permute.xlu1 %2733  ;;  %v2737_v47 = vpop.permute.xlu0 %2736  ;;  %v3411_v11 = vsel %vm3410_vm7, %v3320_v48, %v3409_v23 }
 0x50a   :  { %v3393_v40 = vrot.slane %v2734_v55, %v7613_v27  ;;  %v3398_v39 = vrot.slane %v2737_v47, %v7643_v10  ;;  %v7925_v10 = vld [vmem:[#allocation3] sm:$0xff] }
 0x50c   :  { %v3394_v14 = vsel %vm2838_vm15, %v3393_v40, %v3389_v62  ;;  %vm9271_vm15 = vmmov %vm9261_vm14 }
 0x50d   :  { %v3399_v25 = vsel %vm2845_vm0, %v3398_v39, %v3394_v14 }
 0x50e   :  { %v3413_v0 = vsel %vm3412_vm11, %v3399_v25, %v3411_v11  ;;  %v9272_v25 = vld [vmem:[#allocation80_spill] sm:$0xff] }
 0x50f   :  { %v3415_v27 = vsel %vm1428_vm12, %v3413_v0, -1e+30  ;;  %v9273_v11 = vunpack.c.l.bf16 %v9272_v25 }
 0x510   :  { %3418 = vmax.xlane.f32.xlu1 %v3415_v27  ;;  %3416 = vst [vmem:[#allocation22] sm:$0xff] %v3415_v27 }
 0x59d   :  { %v3419_v58 = vpop.xlane.xlu1 %3418 }
 0x59e   :  { %v7928_v1 = vmax.f32 %v7925_v10, %v3419_v58 }
 0x5a0   :  { %v3421_v41 = vsub.f32 %v7925_v10, %v7928_v1  ;;  %4296 = vst.msk [vmem:[#allocation3] sm:$0xff] %vm9261_vm14, %v7928_v1  ;;  %3426 = vperm.xlu0 %5104, %v7928_v1   ;;  %v9274_v10 = vunpack.c.h.bf16 %v9272_v25  ;;  %v9285_v25 = vld [vmem:[#allocation127_spill] sm:$0xff] }
 0x5a2   :  { %v3422_v26 = vmul.f32 1.442695, %v3421_v41 }
 0x61f   :  { %v3427_v30 = vpop.permute.xlu0 %3426 }
 0x620   :  { %v3429_v46 = vsub.f32 %v3415_v27, %v3427_v30 }
 0x622   :  { %v3430_v43 = vmul.f32 1.442695, %v3429_v46  ;;  %v9275_v46 = vld [vmem:[#allocation83_spill] sm:$0xff] }
 0x624   :  { %5196 = vpow2.f32 %v3430_v43  ;;  %v9276_v43 = vunpack.c.l.bf16 %v9275_v46 }
 0x625   :  { %5198 = vpow2.f32 %v3422_v26  ;;  %v9281_v26 = vld [vmem:[#allocation33_spill] sm:$0xff] }
 0x62e   :  { %v5197_v20 = vpop.eup %5196 }
 0x62f   :  { %3434 = vadd.xlane.f32.xlu0 %v5197_v20  ;;  %v7936_v24 = vrot.slane %v5197_v20, %v9262_v53  ;;  %v7940_v56 = vrot.slane %v5197_v20, %v9263_v54  ;;  %v7945_v44 = vrot.slane %v5197_v20, %v9264_v21  ;;  %v7951_v19 = vrot.slane %v5197_v20, %v9266_v49  ;;  %v8040_v9 = vpop.eup %5198 }
 0x630   :  { %v7957_v15 = vrot.slane %v5197_v20, %v9267_v63  ;;  %v7967_v35 = vrot.slane %v5197_v20, %v9268_v29  ;;  %v7975_v52 = vrot.slane %v5197_v20, %v9269_v13  ;;  %v7985_v60 = vrot.slane %v5197_v20, %v9270_v42 }
 0x631   :  { %3455 = vbcast.lane.b32.xlu1 %v7936_v24, 264  ;;  %v3433_v18 = vmul.f32 %v8040_v9, %v3432_v50  ;;  %v9277_v53 = vunpack.c.h.bf16 %v9275_v46  ;;  %v9279_v49 = vunpack.c.l.bf16 %v9278_v59  ;;  %v9280_v13 = vunpack.c.h.bf16 %v9278_v59 }
 0x635   :  { %3518 = vbcast.lane.b32.xlu1 %v7940_v56, 256 }
 0x639   :  { %3522 = vbcast.lane.b32.xlu1 %v7940_v56, 264 }
 0x63d   :  { %3589 = vbcast.lane.b32.xlu1 %v7945_v44, 264 }
 0x641   :  { %3526 = vbcast.lane.b32.xlu1 %v7940_v56, 272 }
 0x645   :  { %3656 = vbcast.lane.b32.xlu1 %v7951_v19, 264  ;;  %3451 = vbcast.lane.b32.xlu0 %v7936_v24, 256 }
 0x649   :  { %3719 = vbcast.lane.b32.xlu1 %v7957_v15, 256  ;;  %3585 = vbcast.lane.b32.xlu0 %v7945_v44, 256 }
 0x64d   :  { %3463 = vbcast.lane.b32.xlu1 %v7936_v24, 280  ;;  %3459 = vbcast.lane.b32.xlu0 %v7936_v24, 272 }
 0x651   :  { %3660 = vbcast.lane.b32.xlu1 %v7951_v19, 272  ;;  %3652 = vbcast.lane.b32.xlu0 %v7951_v19, 256 }
 0x655   :  { %3790 = vbcast.lane.b32.xlu1 %v7967_v35, 264  ;;  %3593 = vbcast.lane.b32.xlu0 %v7945_v44, 272 }
 0x659   :  { %3727 = vbcast.lane.b32.xlu1 %v7957_v15, 272  ;;  %3723 = vbcast.lane.b32.xlu0 %v7957_v15, 264 }
 0x65d   :  { %3857 = vbcast.lane.b32.xlu1 %v7975_v52, 264  ;;  %3530 = vbcast.lane.b32.xlu0 %v7940_v56, 280 }
 0x661   :  { %3534 = vbcast.lane.b32.xlu1 %v7940_v56, 288  ;;  %3786 = vbcast.lane.b32.xlu0 %v7967_v35, 256 }
 0x665   :  { %3794 = vbcast.lane.b32.xlu1 %v7967_v35, 272  ;;  %3597 = vbcast.lane.b32.xlu0 %v7945_v44, 280 }
 0x669   :  { %3924 = vbcast.lane.b32.xlu1 %v7985_v60, 264  ;;  %3853 = vbcast.lane.b32.xlu0 %v7975_v52, 256 }
 0x66d   :  { %3731 = vbcast.lane.b32.xlu1 %v7957_v15, 280  ;;  %3467 = vbcast.lane.b32.xlu0 %v7936_v24, 288 }
 0x671   :  { %3471 = vbcast.lane.b32.xlu1 %v7936_v24, 296  ;;  %3664 = vbcast.lane.b32.xlu0 %v7951_v19, 280 }
 0x675   :  { %3668 = vbcast.lane.b32.xlu1 %v7951_v19, 288  ;;  %3920 = vbcast.lane.b32.xlu0 %v7985_v60, 256 }
 0x679   :  { %3928 = vbcast.lane.b32.xlu1 %v7985_v60, 272  ;;  %3601 = vbcast.lane.b32.xlu0 %v7945_v44, 288 }
 0x67d   :  { %3735 = vbcast.lane.b32.xlu1 %v7957_v15, 288  ;;  %3861 = vbcast.lane.b32.xlu0 %v7975_v52, 272 }
 0x681   :  { %3475 = vbcast.lane.b32.xlu1 %v7936_v24, 304  ;;  %3538 = vbcast.lane.b32.xlu0 %v7940_v56, 296 }
 0x685   :  { %3672 = vbcast.lane.b32.xlu1 %v7951_v19, 296  ;;  %3798 = vbcast.lane.b32.xlu0 %v7967_v35, 280 }
 0x689   :  { %3932 = vbcast.lane.b32.xlu1 %v7985_v60, 280  ;;  %3605 = vbcast.lane.b32.xlu0 %v7945_v44, 296 }
 0x68d   :  { %3739 = vbcast.lane.b32.xlu1 %v7957_v15, 296  ;;  %3865 = vbcast.lane.b32.xlu0 %v7975_v52, 280 }
 0x691   :  { %3479 = vbcast.lane.b32.xlu1 %v7936_v24, 312  ;;  %3542 = vbcast.lane.b32.xlu0 %v7940_v56, 304 }
 0x695   :  { %3676 = vbcast.lane.b32.xlu1 %v7951_v19, 304  ;;  %3802 = vbcast.lane.b32.xlu0 %v7967_v35, 288 }
 0x699   :  { %3936 = vbcast.lane.b32.xlu1 %v7985_v60, 288  ;;  %3609 = vbcast.lane.b32.xlu0 %v7945_v44, 304 }
 0x69d   :  { %3743 = vbcast.lane.b32.xlu1 %v7957_v15, 304  ;;  %3869 = vbcast.lane.b32.xlu0 %v7975_v52, 288 }
 0x6a1   :  { %3483 = vbcast.lane.b32.xlu1 %v7936_v24, 320  ;;  %3546 = vbcast.lane.b32.xlu0 %v7940_v56, 312 }
 0x6a3   :  { %v8017_v5 = vpop.permute.xlu1 %3455 }
 0x6a4   :  { %v3983_v42 = vmul.f32 %v9280_v13, %v8017_v5  ;;  %v9293_v13 = vld [vmem:[#allocation65_spill] sm:$0xff] }
 0x6a5   :  { %3680 = vbcast.lane.b32.xlu1 %v7951_v19, 312  ;;  %3806 = vbcast.lane.b32.xlu0 %v7967_v35, 296 }
 0x6a7   :  { %v8021_v34 = vpop.permute.xlu1 %3518 }
 0x6a9   :  { %3940 = vbcast.lane.b32.xlu1 %v7985_v60, 296  ;;  %3613 = vbcast.lane.b32.xlu0 %v7945_v44, 312 }
 0x6ab   :  { %v8028_v16 = vpop.permute.xlu1 %3522 }
 0x6ad   :  { %3747 = vbcast.lane.b32.xlu1 %v7957_v15, 312  ;;  %3873 = vbcast.lane.b32.xlu0 %v7975_v52, 296 }
 0x6af   :  { %v8032_v4 = vpop.permute.xlu1 %3589 }
 0x6b1   :  { %3487 = vbcast.lane.b32.xlu1 %v7936_v24, 328  ;;  %3550 = vbcast.lane.b32.xlu0 %v7940_v56, 320 }
 0x6b3   :  { %v8036_v51 = vpop.permute.xlu1 %3526 }
 0x6b5   :  { %3684 = vbcast.lane.b32.xlu1 %v7951_v19, 320  ;;  %3810 = vbcast.lane.b32.xlu0 %v7967_v35, 304 }
 0x6b7   :  { %v3657_v17 = vpop.permute.xlu1 %3656 }
 0x6b8   :  { %v4031_v58 = vmul.f32 %v9274_v10, %v3657_v17  ;;  %v9282_v17 = vunpack.c.l.bf16 %v9281_v26 }
 0x6b9   :  { %3944 = vbcast.lane.b32.xlu1 %v7985_v60, 304  ;;  %3617 = vbcast.lane.b32.xlu0 %v7945_v44, 320 }
 0x6bb   :  { %v8044_v61 = vpop.permute.xlu1 %3719 }
 0x6bc   :  { %v3435_v38 = vpop.xlane.xlu0 %3434 }
 0x6bd   :  { %v3436_v2 = vadd.f32 %v3435_v38, %v3433_v18  ;;  %3751 = vbcast.lane.b32.xlu1 %v7957_v15, 320  ;;  %3877 = vbcast.lane.b32.xlu0 %v7975_v52, 304  ;;  %v9283_v38 = vld [vmem:[#allocation62_spill] sm:$0xff] }
 0x6be   :  { %v9287_v5 = vunpack.c.l.bf16 %v9283_v38 }
 0x6bf   :  { %3438 = vst.msk [vmem:[#allocation4] sm:$0xff] %vm9271_vm15, %v3436_v2  ;;  %v8050_v7 = vpop.permute.xlu1 %3463  ;;  %v9284_v2 = vunpack.c.h.bf16 %v9283_v38 }
 0x6c0   :  { %v3452_v37 = vpop.permute.xlu0 %3451 }
 0x6c1   :  { %3491 = vbcast.lane.b32.xlu1 %v7936_v24, 336  ;;  %3554 = vbcast.lane.b32.xlu0 %v7940_v56, 328  ;;  %v3982_v63 = vmul.f32 %v9279_v49, %v3452_v37 }
 0x6c3   :  { %v3661_v31 = vpop.permute.xlu1 %3660  ;;  %v4110_v10 = vadd.f32 %v3983_v42, %v3982_v63 }
 0x6c4   :  { %v8054_v8 = vpop.permute.xlu0 %3585  ;;  %v4032_v20 = vmul.f32 %v9276_v43, %v3661_v31 }
 0x6c5   :  { %3688 = vbcast.lane.b32.xlu1 %v7951_v19, 328  ;;  %3814 = vbcast.lane.b32.xlu0 %v7967_v35, 312 }
 0x6c7   :  { %v8058_v32 = vpop.permute.xlu1 %3790 }
 0x6c8   :  { %v3460_v6 = vpop.permute.xlu0 %3459 }
 0x6c9   :  { %3948 = vbcast.lane.b32.xlu1 %v7985_v60, 312  ;;  %3621 = vbcast.lane.b32.xlu0 %v7945_v44, 328  ;;  %v3984_v50 = vmul.f32 %v9282_v17, %v3460_v6  ;;  %v9288_v6 = vunpack.c.h.bf16 %v9285_v25 }
 0x6cb   :  { %v8062_v45 = vpop.permute.xlu1 %3727  ;;  %v4111_v43 = vadd.f32 %v4110_v10, %v3984_v50  ;;  %v9296_v50 = vld [vmem:[#allocation35_spill] sm:$0xff]  ;;  %v9300_v10 = vld [vmem:[#allocation68_spill] sm:$0xff] }
 0x6cc   :  { %v3653_v57 = vpop.permute.xlu0 %3652  ;;  %v9297_v38 = vunpack.c.l.bf16 %v9296_v50 }
 0x6cd   :  { %3755 = vbcast.lane.b32.xlu1 %v7957_v15, 328  ;;  %3881 = vbcast.lane.b32.xlu0 %v7975_v52, 312  ;;  %v4030_v0 = vmul.f32 %v9273_v11, %v3653_v57  ;;  %v9286_v11 = vunpack.c.l.bf16 %v9285_v25 }
 0x6cf   :  { %v8066_v12 = vpop.permute.xlu1 %3857  ;;  %v4173_v41 = vadd.f32 %v4031_v58, %v4030_v0  ;;  %v4046_v58 = vmul.f32 %v9287_v5, %v8044_v61  ;;  %v9301_v5 = vunpack.c.l.bf16 %v9300_v10 }
 0x6d0   :  { %v8068_v33 = vpop.permute.xlu0 %3593 }
 0x6d1   :  { %3495 = vbcast.lane.b32.xlu1 %v7936_v24, 344  ;;  %3558 = vbcast.lane.b32.xlu0 %v7940_v56, 336  ;;  %v4174_v29 = vadd.f32 %v4173_v41, %v4032_v20  ;;  %v9289_v41 = vld [vmem:[#allocation86_spill] sm:$0xff] }
 0x6d3   :  { %v8072_v28 = vpop.permute.xlu1 %3534 }
 0x6d4   :  { %v3724_v55 = vpop.permute.xlu0 %3723 }
 0x6d5   :  { %3692 = vbcast.lane.b32.xlu1 %v7951_v19, 336  ;;  %3818 = vbcast.lane.b32.xlu0 %v7967_v35, 320  ;;  %v4047_v31 = vmul.f32 %v9284_v2, %v3724_v55  ;;  %v9290_v55 = vunpack.c.l.bf16 %v9289_v41 }
 0x6d7   :  { %v8076_v47 = vpop.permute.xlu1 %3794 }
 0x6d8   :  { %v8078_v3 = vpop.permute.xlu0 %3530 }
 0x6d9   :  { %3952 = vbcast.lane.b32.xlu1 %v7985_v60, 320  ;;  %3625 = vbcast.lane.b32.xlu0 %v7945_v44, 336 }
 0x6db   :  { %v3925_v48 = vpop.permute.xlu1 %3924 }
 0x6dc   :  { %v8082_v40 = vpop.permute.xlu0 %3786 }
 0x6dd   :  { %3759 = vbcast.lane.b32.xlu1 %v7957_v15, 336  ;;  %3885 = vbcast.lane.b32.xlu0 %v7975_v52, 320 }
 0x6df   :  { %v3732_v39 = vpop.permute.xlu1 %3731 }
 0x6e0   :  { %v8086_v22 = vpop.permute.xlu0 %3597 }
 0x6e1   :  { %3499 = vbcast.lane.b32.xlu1 %v7936_v24, 352  ;;  %3562 = vbcast.lane.b32.xlu0 %v7940_v56, 344 }
 0x6e3   :  { %v8090_v62 = vpop.permute.xlu1 %3471 }
 0x6e4   :  { %v8092_v14 = vpop.permute.xlu0 %3853 }
 0x6e5   :  { %3696 = vbcast.lane.b32.xlu1 %v7951_v19, 344  ;;  %3822 = vbcast.lane.b32.xlu0 %v7967_v35, 328 }
 0x6e7   :  { %v3669_v36 = vpop.permute.xlu1 %3668 }
 0x6e8   :  { %v3468_v23 = vpop.permute.xlu0 %3467  ;;  %v4034_v46 = vmul.f32 %v9290_v55, %v3669_v36  ;;  %v9295_v36 = vunpack.c.h.bf16 %v9293_v13 }
 0x6e9   :  { %3956 = vbcast.lane.b32.xlu1 %v7985_v60, 328  ;;  %3629 = vbcast.lane.b32.xlu0 %v7945_v44, 344  ;;  %v3986_v2 = vmul.f32 %v9297_v38, %v3468_v23 }
 0x6ea   :  { %v4049_v17 = vmul.f32 %v9295_v36, %v3732_v39  ;;  %v9310_v36 = vld [vmem:[#allocation42_spill] sm:$0xff] }
 0x6eb   :  { %v3929_v27 = vpop.permute.xlu1 %3928 }
 0x6ec   :  { %v3665_v1 = vpop.permute.xlu0 %3664 }
 0x6ed   :  { %3763 = vbcast.lane.b32.xlu1 %v7957_v15, 344  ;;  %3889 = vbcast.lane.b32.xlu0 %v7975_v52, 328  ;;  %v4033_v54 = vmul.f32 %v9277_v53, %v3665_v1  ;;  %v4095_v1 = vmul.f32 %v9288_v6, %v3925_v48  ;;  %v4194_v53 = vadd.f32 %v4047_v31, %v4046_v58  ;;  %v9294_v48 = vunpack.c.l.bf16 %v9293_v13  ;;  %v9298_v31 = vld [vmem:[#allocation129_spill] sm:$0xff] }
 0x6ee   :  { %v9302_v58 = vunpack.c.h.bf16 %v9298_v31 }
 0x6ef   :  { %v3736_v30 = vpop.permute.xlu1 %3735  ;;  %v4175_v57 = vadd.f32 %v4174_v29, %v4033_v54  ;;  %v9292_v29 = vunpack.c.h.bf16 %v9281_v26  ;;  %v4048_v42 = vmul.f32 %v9294_v48, %v8062_v45 }
 0x6f0   :  { %v3921_v21 = vpop.permute.xlu0 %3920  ;;  %v4050_v45 = vmul.f32 %v9301_v5, %v3736_v30  ;;  %v9305_v30 = vunpack.c.h.bf16 %v9296_v50 }
 0x6f1   :  { %3503 = vbcast.lane.b32.xlu1 %v7936_v24, 360  ;;  %3566 = vbcast.lane.b32.xlu0 %v7940_v56, 352  ;;  %v4094_v37 = vmul.f32 %v9286_v11, %v3921_v21  ;;  %v9291_v21 = vunpack.c.h.bf16 %v9289_v41  ;;  %v4176_v49 = vadd.f32 %v4175_v57, %v4034_v46  ;;  %v3985_v61 = vmul.f32 %v9292_v29, %v8050_v7 }
 0x6f2   :  { %v9299_v57 = vunpack.c.l.bf16 %v9298_v31  ;;  %v9308_v29 = vunpack.c.h.bf16 %v9300_v10  ;;  %v9314_v10 = vld [vmem:[#allocation96_spill] sm:$0xff] }
 0x6f3   :  { %v3476_v18 = vpop.permute.xlu1 %3475  ;;  %v4257_v54 = vadd.f32 %v4095_v1, %v4094_v37  ;;  %v4112_v26 = vadd.f32 %v4111_v43, %v3985_v61  ;;  %v4195_v37 = vadd.f32 %v4194_v53, %v4048_v42  ;;  %v3987_v53 = vmul.f32 %v9305_v30, %v8090_v62  ;;  %v9321_v30 = vld [vmem:[#allocation43_spill] sm:$0xff] }
 0x6f4   :  { %v8121_v0 = vpop.permute.xlu0 %3601  ;;  %v4096_v25 = vmul.f32 %v9299_v57, %v3929_v27  ;;  %v9303_v27 = vld [vmem:[#allocation41_spill] sm:$0xff]  ;;  %v9315_v5 = vunpack.c.l.bf16 %v9314_v10 }
 0x6f5   :  { %3700 = vbcast.lane.b32.xlu1 %v7951_v19, 352  ;;  %3826 = vbcast.lane.b32.xlu0 %v7967_v35, 336  ;;  %v4196_v39 = vadd.f32 %v4195_v37, %v4049_v17  ;;  %v4113_v23 = vadd.f32 %v4112_v26, %v3986_v2  ;;  %v9304_v46 = vunpack.c.h.bf16 %v9303_v27  ;;  %v9309_v48 = vunpack.c.l.bf16 %v9303_v27 }
 0x6f6   :  { %v4258_v1 = vadd.f32 %v4257_v54, %v4096_v25 }
 0x6f7   :  { %v3673_v20 = vpop.permute.xlu1 %3672  ;;  %v3999_v43 = vmul.f32 %v9304_v46, %v8028_v16  ;;  %v3998_v42 = vmul.f32 %v9309_v48, %v8021_v34  ;;  %v9311_v16 = vunpack.c.l.bf16 %v9310_v36  ;;  %v4114_v62 = vadd.f32 %v4113_v23, %v3987_v53 }
 0x6f8   :  { %v4035_v59 = vmul.f32 %v9291_v21, %v3673_v20  ;;  %v8134_v63 = vpop.permute.xlu0 %3861  ;;  %v4197_v21 = vadd.f32 %v4196_v39, %v4050_v45  ;;  %v4062_v45 = vmul.f32 %v9315_v5, %v8082_v40  ;;  %v9318_v39 = vld [vmem:[#allocation89_spill] sm:$0xff]  ;;  %v9322_v53 = vunpack.c.l.bf16 %v9321_v30 }
 0x6f9   :  { %3960 = vbcast.lane.b32.xlu1 %v7985_v60, 336  ;;  %3633 = vbcast.lane.b32.xlu0 %v7945_v44, 352  ;;  %v4000_v17 = vmul.f32 %v9311_v16, %v8036_v51  ;;  %v4131_v38 = vadd.f32 %v3999_v43, %v3998_v42  ;;  %v9319_v23 = vunpack.c.l.bf16 %v9318_v39  ;;  %v9320_v43 = vunpack.c.h.bf16 %v9314_v10  ;;  %v9327_v16 = vld [vmem:[#allocation97_spill] sm:$0xff]  ;;  %v9335_v10 = vld [vmem:[#allocation51_spill] sm:$0xff] }
 0x6fa   :  { %v4177_v11 = vadd.f32 %v4176_v49, %v4035_v59  ;;  %v9306_v59 = vld [vmem:[#allocation36_spill] sm:$0xff] }
 0x6fb   :  { %v3933_v7 = vpop.permute.xlu1 %3932  ;;  %v9307_v54 = vunpack.c.l.bf16 %v9306_v59  ;;  %v9313_v25 = vunpack.c.h.bf16 %v9306_v59  ;;  %v9323_v59 = vunpack.c.h.bf16 %v9321_v30 }
 0x6fc   :  { %v4097_v6 = vmul.f32 %v9302_v58, %v3933_v7  ;;  %v3539_v41 = vpop.permute.xlu0 %3538  ;;  %v4132_v7 = vadd.f32 %v4131_v38, %v4000_v17 }
 0x6fd   :  { %3767 = vbcast.lane.b32.xlu1 %v7957_v15, 352  ;;  %3893 = vbcast.lane.b32.xlu0 %v7975_v52, 336  ;;  %v3988_v49 = vmul.f32 %v9307_v54, %v3476_v18  ;;  %v9312_v18 = vunpack.c.h.bf16 %v9310_v36  ;;  %v4003_v40 = vmul.f32 %v9323_v59, %v3539_v41  ;;  %v9328_v41 = vunpack.c.l.bf16 %v9327_v16  ;;  %v9342_v59 = vld [vmem:[#allocation98_spill] sm:$0xff] }
 0x6fe   :  { %v4259_v55 = vadd.f32 %v4258_v1, %v4097_v6 }
 0x6ff   :  { %v3740_v20 = vpop.permute.xlu1 %3739  ;;  %v4001_v2 = vmul.f32 %v9312_v18, %v8078_v3  ;;  %v4115_v57 = vadd.f32 %v4114_v62, %v3988_v49  ;;  %v9316_v3 = vld [vmem:[#allocation49_spill] sm:$0xff]  ;;  %v9325_v49 = vld [vmem:[#allocation50_spill] sm:$0xff]  ;;  %v4064_v17 = vmul.f32 %v9328_v41, %v8076_v47  ;;  %v9330_v18 = vld [vmem:[#allocation132_spill] sm:$0xff] }
 0x700   :  { %v4051_v61 = vmul.f32 %v9308_v29, %v3740_v20  ;;  %v3799_v13 = vpop.permute.xlu0 %3798  ;;  %v9317_v6 = vunpack.c.l.bf16 %v9316_v3  ;;  %v4063_v20 = vmul.f32 %v9320_v43, %v8058_v32  ;;  %v9326_v29 = vunpack.c.l.bf16 %v9325_v49 }
 0x701   :  { %3507 = vbcast.lane.b32.xlu1 %v7936_v24, 368  ;;  %3570 = vbcast.lane.b32.xlu0 %v7940_v56, 360  ;;  %v4133_v37 = vadd.f32 %v4132_v7, %v4001_v2  ;;  %v9329_v62 = vunpack.c.h.bf16 %v9325_v49  ;;  %v9331_v2 = vunpack.c.l.bf16 %v9330_v18 }
 0x702   :  { %v4198_v50 = vadd.f32 %v4197_v21, %v4051_v61  ;;  %v4014_v1 = vmul.f32 %v9317_v6, %v8054_v8  ;;  %v4002_v21 = vmul.f32 %v9322_v53, %v8072_v28  ;;  %v9324_v8 = vunpack.c.h.bf16 %v9316_v3 }
 0x703   :  { %v3480_v31 = vpop.permute.xlu1 %3479  ;;  %v4016_v61 = vmul.f32 %v9326_v29, %v8068_v33  ;;  %v4215_v48 = vadd.f32 %v4063_v20, %v4062_v45  ;;  %v4017_v38 = vmul.f32 %v9329_v62, %v8086_v22  ;;  %v9332_v33 = vunpack.c.h.bf16 %v9327_v16  ;;  %v9345_v29 = vld [vmem:[#allocation107_spill] sm:$0xff] }
 0x704   :  { %v3989_v34 = vmul.f32 %v9313_v25, %v3480_v31  ;;  %v3606_v26 = vpop.permute.xlu0 %3605  ;;  %v4015_v54 = vmul.f32 %v9324_v8, %v8032_v4  ;;  %v4134_v42 = vadd.f32 %v4133_v37, %v4002_v21  ;;  %v9333_v25 = vld [vmem:[#allocation44_spill] sm:$0xff]  ;;  %v9336_v22 = vunpack.c.l.bf16 %v9335_v10 }
 0x705   :  { %3704 = vbcast.lane.b32.xlu1 %v7951_v19, 360  ;;  %3830 = vbcast.lane.b32.xlu0 %v7967_v35, 344  ;;  %v4216_v45 = vadd.f32 %v4215_v48, %v4064_v17  ;;  %v9341_v21 = vunpack.c.h.bf16 %v9335_v10  ;;  %v9349_v62 = vunpack.c.h.bf16 %v9345_v29 }
 0x706   :  { %v4116_v51 = vadd.f32 %v4115_v57, %v3989_v34  ;;  %v4152_v28 = vadd.f32 %v4015_v54, %v4014_v1  ;;  %v4135_v57 = vadd.f32 %v4134_v42, %v4003_v40  ;;  %v9334_v34 = vunpack.c.l.bf16 %v9333_v25  ;;  %v9337_v1 = vld [vmem:[#allocation104_spill] sm:$0xff] }
 0x707   :  { %v3677_v58 = vpop.permute.xlu1 %3676  ;;  %v4018_v5 = vmul.f32 %v9336_v22, %v8121_v0  ;;  %v9343_v40 = vunpack.c.l.bf16 %v9342_v59  ;;  %v9344_v0 = vunpack.c.h.bf16 %v9337_v1 }
 0x708   :  { %v4036_v27 = vmul.f32 %v9319_v23, %v3677_v58  ;;  %v3866_v46 = vpop.permute.xlu0 %3865  ;;  %v4153_v47 = vadd.f32 %v4152_v28, %v4016_v61  ;;  %v9346_v61 = vunpack.c.l.bf16 %v9345_v29  ;;  %v9347_v28 = vld [vmem:[#allocation37_spill] sm:$0xff] }
 0x709   :  { %3964 = vbcast.lane.b32.xlu1 %v7985_v60, 344  ;;  %3637 = vbcast.lane.b32.xlu0 %v7945_v44, 360  ;;  %v4079_v54 = vmul.f32 %v9344_v0, %v8066_v12  ;;  %v9348_v16 = vunpack.c.l.bf16 %v9347_v28 }
 0x70a   :  { %v4178_v32 = vadd.f32 %v4177_v11, %v4036_v27  ;;  %v4065_v11 = vmul.f32 %v9332_v33, %v3799_v13  ;;  %v4154_v6 = vadd.f32 %v4153_v47, %v4017_v38  ;;  %v9338_v13 = vunpack.c.l.bf16 %v9337_v1  ;;  %v9339_v27 = vld [vmem:[#allocation69_spill] sm:$0xff]  ;;  %v9353_v47 = vld [vmem:[#allocation110_spill] sm:$0xff] }
 0x70b   :  { %v3937_v36 = vpop.permute.xlu1 %3936  ;;  %v9340_v43 = vunpack.c.l.bf16 %v9339_v27  ;;  %v4080_v48 = vmul.f32 %v9346_v61, %v8134_v63  ;;  %v4081_v38 = vmul.f32 %v9349_v62, %v3866_v46  ;;  %v9352_v33 = vunpack.c.h.bf16 %v9318_v39 }
 0x70c   :  { %v4098_v4 = vmul.f32 %v9331_v2, %v3937_v36  ;;  %v3543_v31 = vpop.permute.xlu0 %3542  ;;  %v4078_v23 = vmul.f32 %v9338_v13, %v8092_v14  ;;  %v4217_v53 = vadd.f32 %v4216_v45, %v4065_v11  ;;  %v4155_v49 = vadd.f32 %v4154_v6, %v4018_v5  ;;  %v9350_v2 = vld [vmem:[#allocation52_spill] sm:$0xff] }
 0x70d   :  { %v4004_v7 = vmul.f32 %v9334_v34, %v3543_v31  ;;  %3771 = vbcast.lane.b32.xlu1 %v7957_v15, 360  ;;  %3897 = vbcast.lane.b32.xlu0 %v7975_v52, 344  ;;  %v9354_v10 = vunpack.c.l.bf16 %v9353_v47  ;;  %v9356_v1 = vunpack.c.h.bf16 %v9333_v25  ;;  %v9363_v29 = vunpack.c.h.bf16 %v9353_v47  ;;  %v9372_v47 = vld [vmem:[#allocation38_spill] sm:$0xff] }
 0x70e   :  { %v4260_v37 = vadd.f32 %v4259_v55, %v4098_v4  ;;  %v4019_v55 = vmul.f32 %v9341_v21, %v3606_v26  ;;  %v4236_v26 = vadd.f32 %v4079_v54, %v4078_v23  ;;  %v9351_v4 = vunpack.c.l.bf16 %v9350_v2 }
 0x70f   :  { %v4136_v58 = vadd.f32 %v4135_v57, %v4004_v7  ;;  %v3744_v3 = vpop.permute.xlu1 %3743 }
 0x710   :  { %v4052_v20 = vmul.f32 %v9340_v43, %v3744_v3  ;;  %v3803_v30 = vpop.permute.xlu0 %3802  ;;  %v4237_v63 = vadd.f32 %v4236_v26, %v4080_v48  ;;  %v9364_v26 = vld [vmem:[#allocation135_spill] sm:$0xff] }
 0x711   :  { %v4066_v8 = vmul.f32 %v9343_v40, %v3803_v30  ;;  %3511 = vbcast.lane.b32.xlu1 %v7936_v24, 376  ;;  %3574 = vbcast.lane.b32.xlu0 %v7940_v56, 368  ;;  %v4156_v24 = vadd.f32 %v4155_v49, %v4019_v55  ;;  %v9359_v40 = vunpack.c.h.bf16 %v9347_v28  ;;  %v9365_v28 = vunpack.c.l.bf16 %v9364_v26 }
 0x712   :  { %v4199_v14 = vadd.f32 %v4198_v50, %v4052_v20  ;;  %v4238_v7 = vadd.f32 %v4237_v63, %v4081_v38  ;;  %v9357_v20 = vunpack.c.h.bf16 %v9339_v27 }
 0x713   :  { %v4218_v42 = vadd.f32 %v4217_v53, %v4066_v8  ;;  %v3484_v36 = vpop.permute.xlu1 %3483  ;;  %v9358_v53 = vunpack.c.h.bf16 %v9342_v59 }
 0x714   :  { %v3990_v41 = vmul.f32 %v9348_v16, %v3484_v36  ;;  %v3610_v17 = vpop.permute.xlu0 %3609 }
 0x715   :  { %v4020_v12 = vmul.f32 %v9351_v4, %v3610_v17  ;;  %3708 = vbcast.lane.b32.xlu1 %v7951_v19, 368  ;;  %3834 = vbcast.lane.b32.xlu0 %v7967_v35, 352  ;;  %v9366_v17 = vld [vmem:[#allocation45_spill] sm:$0xff] }
 0x716   :  { %v4117_v50 = vadd.f32 %v4116_v51, %v3990_v41  ;;  %v9355_v51 = vunpack.c.h.bf16 %v9330_v18 }
 0x717   :  { %v4157_v31 = vadd.f32 %v4156_v24, %v4020_v12  ;;  %v3681_v57 = vpop.permute.xlu1 %3680  ;;  %v9367_v24 = vunpack.c.l.bf16 %v9366_v17  ;;  %v9368_v12 = vld [vmem:[#allocation72_spill] sm:$0xff] }
 0x718   :  { %v4037_v11 = vmul.f32 %v9352_v33, %v3681_v57  ;;  %v3870_v34 = vpop.permute.xlu0 %3869 }
 0x719   :  { %v4082_v22 = vmul.f32 %v9354_v10, %v3870_v34  ;;  %3968 = vbcast.lane.b32.xlu1 %v7985_v60, 352  ;;  %3641 = vbcast.lane.b32.xlu0 %v7945_v44, 368  ;;  %v9373_v10 = vunpack.c.l.bf16 %v9372_v47 }
 0x71a   :  { %v4179_v46 = vadd.f32 %v4178_v32, %v4037_v11 }
 0x71b   :  { %v4239_v5 = vadd.f32 %v4238_v7, %v4082_v22  ;;  %v3941_v45 = vpop.permute.xlu1 %3940 }
 0x71c   :  { %v4099_v3 = vmul.f32 %v9355_v51, %v3941_v45  ;;  %v3547_v6 = vpop.permute.xlu0 %3546 }
 0x71d   :  { %v4005_v39 = vmul.f32 %v9356_v1, %v3547_v6  ;;  %3775 = vbcast.lane.b32.xlu1 %v7957_v15, 368  ;;  %3901 = vbcast.lane.b32.xlu0 %v7975_v52, 352 }
 0x71e   :  { %v4261_v13 = vadd.f32 %v4260_v37, %v4099_v3 }
 0x71f   :  { %v4137_v23 = vadd.f32 %v4136_v58, %v4005_v39  ;;  %v3748_v43 = vpop.permute.xlu1 %3747  ;;  %v9360_v58 = vunpack.c.h.bf16 %v9350_v2 }
 0x720   :  { %v4053_v30 = vmul.f32 %v9357_v20, %v3748_v43  ;;  %v3807_v32 = vpop.permute.xlu0 %3806 }
 0x721   :  { %v4067_v21 = vmul.f32 %v9358_v53, %v3807_v32  ;;  %3712 = vbcast.lane.b32.xlu1 %v7951_v19, 376  ;;  %3578 = vbcast.lane.b32.xlu0 %v7940_v56, 376  ;;  %v9361_v19 = vld [vmem:[#allocation90_spill] sm:$0xff] }
 0x722   :  { %v4200_v18 = vadd.f32 %v4199_v14, %v4053_v30  ;;  %v9362_v49 = vunpack.c.l.bf16 %v9361_v19 }
 0x723   :  { %v4219_v25 = vadd.f32 %v4218_v42, %v4067_v21  ;;  %v3488_v55 = vpop.permute.xlu1 %3487  ;;  %v9379_v21 = vunpack.c.h.bf16 %v9364_v26 }
 0x724   :  { %v3991_v8 = vmul.f32 %v9359_v40, %v3488_v55  ;;  %v3614_v37 = vpop.permute.xlu0 %3613 }
 0x725   :  { %v4021_v0 = vmul.f32 %v9360_v58, %v3614_v37  ;;  %3972 = vbcast.lane.b32.xlu1 %v7985_v60, 360  ;;  %3838 = vbcast.lane.b32.xlu0 %v7967_v35, 360  ;;  %v9381_v37 = vunpack.c.h.bf16 %v9368_v12 }
 0x726   :  { %v4118_v27 = vadd.f32 %v4117_v50, %v3991_v8  ;;  %v9369_v50 = vunpack.c.l.bf16 %v9368_v12 }
 0x727   :  { %v4158_v59 = vadd.f32 %v4157_v31, %v4021_v0  ;;  %v3685_v54 = vpop.permute.xlu1 %3684  ;;  %v9370_v31 = vld [vmem:[#allocation99_spill] sm:$0xff] }
 0x728   :  { %v4038_v56 = vmul.f32 %v9362_v49, %v3685_v54  ;;  %v3874_v14 = vpop.permute.xlu0 %3873  ;;  %v9371_v57 = vunpack.c.l.bf16 %v9370_v31  ;;  %v5178_v54 = vld [vmem:[#allocation18] sm:$0xff]  }
 0x729   :  { %v4083_v61 = vmul.f32 %v9363_v29, %v3874_v14  ;;  %3909 = vbcast.lane.b32.xlu1 %v7975_v52, 368  ;;  %3645 = vbcast.lane.b32.xlu0 %v7945_v44, 376  ;;  %v9383_v14 = vunpack.c.h.bf16 %v9372_v47 }
 0x72a   :  { %v4180_v48 = vadd.f32 %v4179_v46, %v4038_v56  ;;  %5038 = vmatpush3.bf16.msra.mxu0 %v5178_v54 }
 0x72b   :  { %v4240_v42 = vadd.f32 %v4239_v5, %v4083_v61  ;;  %v3945_v36 = vpop.permute.xlu1 %3944  ;;  %v9374_v5 = vld [vmem:[#allocation54_spill] sm:$0xff]  ;;  %v9384_v61 = vmov 0.0  }
 0x72c   :  { %v4100_v16 = vmul.f32 %v9365_v28, %v3945_v36  ;;  %v3551_v41 = vpop.permute.xlu0 %3550  ;;  %v9375_v45 = vunpack.c.l.bf16 %v9374_v5  ;;  %5039 = vmatprep.subr.bf16.mxu0 %v9384_v61  ;;  %v5179_v36 = vld [vmem:[#allocation18 + $0x8] sm:$0xff]  }
 0x72d   :  { %v4006_v62 = vmul.f32 %v9367_v24, %v3551_v41  ;;  %3976 = vbcast.lane.b32.xlu1 %v7985_v60, 368  ;;  %3905 = vbcast.lane.b32.xlu0 %v7975_v52, 360  ;;  %v9386_v41 = vld [vmem:[#allocation93_spill] sm:$0xff] }
 0x72e   :  { %v4262_v38 = vadd.f32 %v4261_v13, %v4100_v16  ;;  %5040 = vmatpush3.bf16.msra.mxu0 %v5179_v36 }
 0x72f   :  { %v4138_v2 = vadd.f32 %v4137_v23, %v4006_v62  ;;  %v3752_v4 = vpop.permute.xlu1 %3751  ;;  %v9377_v23 = vld [vmem:[#allocation113_spill] sm:$0xff]  ;;  %5041 = vmatprep.subr.bf16.mxu0 %v9384_v61 }
 0x730   :  { %v4054_v44 = vmul.f32 %v9369_v50, %v3752_v4  ;;  %v3811_v63 = vpop.permute.xlu0 %3810  ;;  %v9378_v43 = vunpack.c.l.bf16 %v9377_v23  ;;  %v5180_v4 = vld [vmem:[#allocation18 + $0x10] sm:$0xff]  }
 0x731   :  { %v4068_v33 = vmul.f32 %v9371_v57, %v3811_v63  ;;  %3980 = vbcast.lane.b32.xlu1 %v7985_v60, 376  ;;  %3842 = vbcast.lane.b32.xlu0 %v7967_v35, 368  ;;  %v9376_v60 = vunpack.c.h.bf16 %v9361_v19  ;;  %v5181_v63 = vld [vmem:[#allocation18 + $0x18] sm:$0xff]  }
 0x732   :  { %v4201_v11 = vadd.f32 %v4200_v18, %v4054_v44  ;;  %5042 = vmatpush3.bf16.msra.mxu0 %v5180_v4 }
 0x733   :  { %v4220_v34 = vadd.f32 %v4219_v25, %v4068_v33  ;;  %v3492_v7 = vpop.permute.xlu1 %3491  ;;  %5043 = vmatprep.subr.bf16.mxu0 %v9384_v61 }
 0x734   :  { %v3992_v22 = vmul.f32 %v9373_v10, %v3492_v7  ;;  %v3618_v46 = vpop.permute.xlu0 %3617 }
 0x735   :  { %v4022_v51 = vmul.f32 %v9375_v45, %v3618_v46  ;;  %3779 = vbcast.lane.b32.xlu0 %v7957_v15, 376  ;;  %3442 = vperm.xlu1 %5105, %v8040_v9   ;;  %v9380_v9 = vunpack.c.h.bf16 %v9366_v17  ;;  %v9387_v17 = vunpack.c.l.bf16 %v9386_v41  ;;  %v9393_v45 = vld [vmem:[#allocation75_spill] sm:$0xff] }
 0x736   :  { %v4119_v3 = vadd.f32 %v4118_v27, %v3992_v22  ;;  %v9382_v27 = vunpack.c.h.bf16 %v9370_v31  ;;  %v9389_v31 = vld [vmem:[#allocation138_spill] sm:$0xff]  ;;  %5044 = vmatpush3.bf16.msra.mxu0 %v5181_v63 }
 0x737   :  { %v4159_v6 = vadd.f32 %v4158_v59, %v4022_v51  ;;  %v3689_v1 = vpop.permute.xlu1 %3688  ;;  %v9390_v57 = vunpack.c.l.bf16 %v9389_v31  ;;  %v9394_v51 = vunpack.c.l.bf16 %v9393_v45  ;;  %5045 = vmatprep.subr.bf16.mxu0 %v9384_v61 }
 0x738   :  { %v4039_v39 = vmul.f32 %v9376_v60, %v3689_v1  ;;  %v3878_v13 = vpop.permute.xlu0 %3877  ;;  %v9395_v1 = vld [vmem:[#allocation100_spill] sm:$0xff] }
 0x739   :  { %v4084_v20 = vmul.f32 %v9378_v43, %v3878_v13  ;;  %3846 = vbcast.lane.b32.xlu0 %v7967_v35, 376  ;;  %v4301_v35 = vld [vmem:[#allocation4] sm:$0xff]  ;;  %v9396_v60 = vunpack.c.l.bf16 %v9395_v1 }
 0x73a   :  { %v4181_v30 = vadd.f32 %v4180_v48, %v4039_v39  ;;  %v9385_v48 = vunpack.c.h.bf16 %v9374_v5  ;;  %v5182_v5 = vld [vmem:[#allocation18 + $0x20] sm:$0xff]  }
 0x73b   :  { %v4241_v32 = vadd.f32 %v4240_v42, %v4084_v20  ;;  %v3949_v53 = vpop.permute.xlu1 %3948  ;;  %5046 = vmatpush3.bf16.msra.mxu0 %v5182_v5  ;;  %v5183_v20 = vld [vmem:[#allocation18 + $0x28] sm:$0xff]  }
 0x73c   :  { %v4101_v15 = vmul.f32 %v9379_v21, %v3949_v53  ;;  %v3555_v18 = vpop.permute.xlu0 %3554  ;;  %5047 = vmatprep.subr.bf16.mxu0 %v9384_v61 }
 0x73d   :  { %v4007_v25 = vmul.f32 %v9380_v9, %v3555_v18  ;;  %3913 = vbcast.lane.b32.xlu0 %v7975_v52, 376 }
 0x73e   :  { %v4263_v55 = vadd.f32 %v4262_v38, %v4101_v15  ;;  %v9388_v38 = vunpack.c.h.bf16 %v9377_v23  ;;  %v9399_v15 = vld [vmem:[#allocation55_spill] sm:$0xff] }
 0x73f   :  { %v4139_v40 = vadd.f32 %v4138_v2, %v4007_v25  ;;  %v3756_v8 = vpop.permute.xlu1 %3755  ;;  %v9400_v18 = vunpack.c.l.bf16 %v9399_v15  ;;  %5048 = vmatpush3.bf16.msra.mxu0 %v5183_v20 }
 0x740   :  { %v4055_v58 = vmul.f32 %v9381_v37, %v3756_v8  ;;  %v3815_v0 = vpop.permute.xlu0 %3814  ;;  %v5184_v8 = vld [vmem:[#allocation18 + $0x30] sm:$0xff]   ;;  %v9401_v37 = vunpack.c.h.bf16 %v9386_v41  ;;  %5049 = vmatprep.subr.bf16.mxu0 %v9384_v61 }
 0x741   :  { %v4069_v59 = vmul.f32 %v9382_v27, %v3815_v0  ;;  %4304 = vperm.xlu0 %5104, %v4301_v35   ;;  %v9402_v35 = vld [vmem:[#allocation116_spill] sm:$0xff] }
 0x742   :  { %v4202_v19 = vadd.f32 %v4201_v11, %v4055_v58  ;;  %v9403_v27 = vunpack.c.l.bf16 %v9402_v35  ;;  %v9407_v4 = vunpack.c.h.bf16 %v9402_v35 }
 0x743   :  { %v4221_v49 = vadd.f32 %v4220_v34, %v4069_v59  ;;  %v3496_v56 = vpop.permute.xlu1 %3495  ;;  %v9391_v34 = vld [vmem:[#allocation46_spill] sm:$0xff]  ;;  %5050 = vmatpush3.bf16.msra.mxu0 %v5184_v8 }
 0x744   :  { %v3993_v52 = vmul.f32 %v9383_v14, %v3496_v56  ;;  %v3622_v29 = vpop.permute.xlu0 %3621  ;;  %v9392_v7 = vunpack.c.l.bf16 %v9391_v34  ;;  %v5185_v56 = vld [vmem:[#allocation18 + $0x38] sm:$0xff]   ;;  %5051 = vmatprep.subr.bf16.mxu0 %v9384_v61 }
 0x745   :  { %v4023_v42 = vmul.f32 %v9385_v48, %v3622_v29 }
 0x746   :  { %v4120_v26 = vadd.f32 %v4119_v3, %v3993_v52  ;;  %v9404_v52 = vunpack.c.h.bf16 %v9391_v34 }
 0x747   :  { %v4160_v28 = vadd.f32 %v4159_v6, %v4023_v42  ;;  %v3693_v16 = vpop.permute.xlu1 %3692  ;;  %5052 = vmatpush3.bf16.msra.mxu0 %v5185_v56 }
 0x748   :  { %v4040_v24 = vmul.f32 %v9387_v17, %v3693_v16  ;;  %v3882_v62 = vpop.permute.xlu0 %3881 }
 0x749   :  { %v4085_v2 = vmul.f32 %v9388_v38, %v3882_v62 }
 0x74a   :  { %v4182_v12 = vadd.f32 %v4181_v30, %v4040_v24  ;;  %v9397_v30 = vld [vmem:[#allocation39_spill] sm:$0xff]  ;;  %v9406_v24 = vunpack.c.h.bf16 %v9399_v15 }
 0x74b   :  { %v4242_v50 = vadd.f32 %v4241_v32, %v4085_v2  ;;  %v3953_v44 = vpop.permute.xlu1 %3952  ;;  %v9398_v32 = vunpack.c.l.bf16 %v9397_v30 }
 0x74c   :  { %v4102_v33 = vmul.f32 %v9390_v57, %v3953_v44  ;;  %v3559_v11 = vpop.permute.xlu0 %3558  ;;  %v9408_v57 = vld [vmem:[#allocation47_spill] sm:$0xff] }
 0x74d   :  { %v4008_v47 = vmul.f32 %v9392_v7, %v3559_v11 }
 0x74e   :  { %v8324_v10 = vadd.f32 %v4263_v55, %v4102_v33  ;;  %v9409_v33 = vunpack.c.l.bf16 %v9408_v57 }
 0x74f   :  { %v4140_v22 = vadd.f32 %v4139_v40, %v4008_v47  ;;  %v3760_v46 = vpop.permute.xlu1 %3759 }
 0x750   :  { %v4056_v3 = vmul.f32 %v9394_v51, %v3760_v46  ;;  %v3819_v6 = vpop.permute.xlu0 %3818 }
 0x751   :  { %v4070_v39 = vmul.f32 %v9396_v60, %v3819_v6 }
 0x752   :  { %v8331_v13 = vadd.f32 %v4202_v19, %v4056_v3 }
 0x753   :  { %v4222_v23 = vadd.f32 %v4221_v49, %v4070_v39  ;;  %v3500_v43 = vpop.permute.xlu1 %3499 }
 0x754   :  { %v3994_v53 = vmul.f32 %v9398_v32, %v3500_v43  ;;  %v3626_v21 = vpop.permute.xlu0 %3625  ;;  %v9410_v32 = vunpack.c.h.bf16 %v9397_v30 }
 0x755   :  { %v4024_v9 = vmul.f32 %v9400_v18, %v3626_v21  ;;  %v9411_v18 = vld [vmem:[#allocation40_spill] sm:$0xff] }
 0x756   :  { %v4121_v25 = vadd.f32 %v4120_v26, %v3994_v53  ;;  %v9405_v26 = vunpack.c.h.bf16 %v9395_v1  ;;  %v9413_v8 = vunpack.c.h.bf16 %v9411_v18 }
 0x757   :  { %v4161_v55 = vadd.f32 %v4160_v28, %v4024_v9  ;;  %v3697_v40 = vpop.permute.xlu1 %3696  ;;  %v9412_v9 = vunpack.c.l.bf16 %v9411_v18 }
 0x758   :  { %v4041_v58 = vmul.f32 %v9401_v37, %v3697_v40  ;;  %v3886_v0 = vpop.permute.xlu0 %3885 }
 0x759   :  { %v4086_v59 = vmul.f32 %v9403_v27, %v3886_v0  ;;  %v9414_v27 = vld [vmem:[#allocation94_spill] sm:$0xff] }
 0x75a   :  { %v4183_v54 = vadd.f32 %v4182_v12, %v4041_v58 }
 0x75b   :  { %v4243_v19 = vadd.f32 %v4242_v50, %v4086_v59  ;;  %v8343_v49 = vpop.permute.xlu1 %3956  ;;  %v9415_v59 = vunpack.c.l.bf16 %v9414_v27 }
 0x75c   :  { %v3563_v14 = vpop.permute.xlu0 %3562 }
 0x75d   :  { %v4009_v29 = vmul.f32 %v9404_v52, %v3563_v14  ;;  %v9416_v14 = vunpack.c.h.bf16 %v9414_v27 }
 0x75f   :  { %v4141_v48 = vadd.f32 %v4140_v22, %v4009_v29  ;;  %v8348_v42 = vpop.permute.xlu1 %3763 }
 0x760   :  { %v3823_v36 = vpop.permute.xlu0 %3822 }
 0x761   :  { %v4071_v28 = vmul.f32 %v9405_v26, %v3823_v36  ;;  %v9417_v36 = vld [vmem:[#allocation95_spill] sm:$0xff] }
 0x763   :  { %v8352_v16 = vadd.f32 %v4222_v23, %v4071_v28  ;;  %v3504_v41 = vpop.permute.xlu1 %3503  ;;  %v9419_v28 = vunpack.c.h.bf16 %v9408_v57 }
 0x764   :  { %v3630_v17 = vpop.permute.xlu0 %3629  ;;  %v3995_v53 = vmul.f32 %v9410_v32, %v3504_v41 }
 0x765   :  { %v4025_v62 = vmul.f32 %v9406_v24, %v3630_v17 }
 0x766   :  { %v4122_v40 = vadd.f32 %v4121_v25, %v3995_v53  ;;  %v9418_v25 = vunpack.c.l.bf16 %v9417_v36 }
 0x767   :  { %v4162_v38 = vadd.f32 %v4161_v55, %v4025_v62  ;;  %v3701_v61 = vpop.permute.xlu1 %3700 }
 0x768   :  { %v3890_v2 = vpop.permute.xlu0 %3889 }
 0x769   :  { %v4087_v12 = vmul.f32 %v9407_v4, %v3890_v2  ;;  %v9420_v2 = vunpack.c.h.bf16 %v9417_v36 }
 0x76b   :  { %v8358_v50 = vadd.f32 %v4243_v19, %v4087_v12  ;;  %v3961_v44 = vpop.permute.xlu1 %3960  ;;  %v4042_v19 = vmul.f32 %v9415_v59, %v3701_v61  ;;  %v9421_v12 = vld [vmem:[#allocation48_spill] sm:$0xff] }
 0x76c   :  { %v3567_v63 = vpop.permute.xlu0 %3566  ;;  %v9425_v18 = vunpack.c.h.bf16 %v9421_v12 }
 0x76d   :  { %v4010_v11 = vmul.f32 %v9409_v33, %v3567_v63  ;;  %v9422_v63 = vunpack.c.l.bf16 %v9421_v12 }
 0x76f   :  { %v4142_v34 = vadd.f32 %v4141_v48, %v4010_v11  ;;  %v3768_v7 = vpop.permute.xlu1 %3767  ;;  %v4184_v48 = vadd.f32 %v4183_v54, %v4042_v19  ;;  %v9428_v19 = vld [vmem:[#allocation61_spill] sm:$0xff] }
 0x770   :  { %v8362_v47 = vpop.permute.xlu0 %3826 }
 0x773   :  { %v3508_v22 = vpop.permute.xlu1 %3507 }
 0x774   :  { %v3634_v46 = vpop.permute.xlu0 %3633  ;;  %v3996_v55 = vmul.f32 %v9412_v9, %v3508_v22 }
 0x776   :  { %v4123_v35 = vadd.f32 %v4122_v40, %v3996_v55 }
 0x777   :  { %v3705_v5 = vpop.permute.xlu1 %3704 }
 0x778   :  { %v8364_v51 = vpop.permute.xlu0 %3893  ;;  %v4043_v52 = vmul.f32 %v9416_v14, %v3705_v5  ;;  %v9430_v14 = vunpack.c.h.bf16 %v9393_v45  ;;  %v9436_v45 = vld [vmem:[#allocation101_spill] sm:$0xff] }
 0x77a   :  { %v4185_v62 = vadd.f32 %v4184_v48, %v4043_v52  ;;  %v4057_v52 = vmul.f32 %v9430_v14, %v8348_v42  ;;  %v9431_v48 = vld [vmem:[#allocation141_spill] sm:$0xff]  ;;  %v9437_v42 = vunpack.c.l.bf16 %v9436_v45 }
 0x77b   :  { %v3965_v3 = vpop.permute.xlu1 %3964  ;;  %v9432_v36 = vunpack.c.l.bf16 %v9431_v48 }
 0x77c   :  { %v3571_v6 = vpop.permute.xlu0 %3570  ;;  %v4072_v12 = vmul.f32 %v9437_v42, %v8362_v47 }
 0x77d   :  { %v4011_v41 = vmul.f32 %v9419_v28, %v3571_v6 }
 0x77f   :  { %v8366_v1 = vpop.permute.xlu1 %3771  ;;  %v4143_v22 = vadd.f32 %v4142_v34, %v4011_v41  ;;  %v9427_v34 = vunpack.c.h.bf16 %v9389_v31 }
 0x780   :  { %v8368_v60 = vpop.permute.xlu0 %3830 }
 0x783   :  { %v3512_v39 = vpop.permute.xlu1 %3511 }
 0x784   :  { %v3638_v23 = vpop.permute.xlu0 %3637  ;;  %v3997_v37 = vmul.f32 %v9413_v8, %v3512_v39 }
 0x786   :  { %v4124_v56 = vadd.f32 %v4123_v35, %v3997_v37 }
 0x787   :  { %v3709_v43 = vpop.permute.xlu1 %3708 }
 0x788   :  { %v8370_v20 = vpop.permute.xlu0 %3897  ;;  %v4044_v26 = vmul.f32 %v9418_v25, %v3709_v43  ;;  %v4125_v17 = vrot.slane %v4124_v56, 4  ;;  %v9423_v43 = vld [vmem:[#allocation58_spill] sm:$0xff]  ;;  %v4104_v25 = vmul.f32 %v9432_v36, %v3961_v44  ;;  %v9449_v36 = vld [vmem:[#allocation79_spill] sm:$0xff] }
 0x789   :  { %v9424_v32 = vunpack.c.l.bf16 %v9423_v43  ;;  %v9426_v40 = vunpack.c.h.bf16 %v9423_v43 }
 0x78a   :  { %v4186_v11 = vadd.f32 %v4185_v62, %v4044_v26  ;;  %v4126_v54 = vadd.f32 %v4125_v17, %v4124_v56  ;;  %v9435_v62 = vunpack.c.h.bf16 %v9431_v48 }
 0x78b   :  { %v3969_v21 = vpop.permute.xlu1 %3968  ;;  %v4026_v57 = vmul.f32 %v9424_v32, %v3634_v46  ;;  %v4027_v8 = vmul.f32 %v9426_v40, %v3638_v23  ;;  %v9429_v46 = vunpack.c.l.bf16 %v9428_v19  ;;  %v9442_v40 = vld [vmem:[#allocation120_spill] sm:$0xff] }
 0x78c   :  { %v3575_v15 = vpop.permute.xlu0 %3574  ;;  %v4127_v55 = vrot.slane %v4126_v54, 2  ;;  %v9448_v14 = vunpack.c.h.bf16 %v9442_v40 }
 0x78d   :  { %v4012_v33 = vmul.f32 %v9422_v63, %v3575_v15  ;;  %v4103_v15 = vmul.f32 %v9427_v34, %v8343_v49  ;;  %v4163_v59 = vadd.f32 %v4162_v38, %v4026_v57  ;;  %v9433_v49 = vld [vmem:[#allocation76_spill] sm:$0xff] }
 0x78e   :  { %v4128_v23 = vadd.f32 %v4127_v55, %v4126_v54  ;;  %v9434_v17 = vunpack.c.l.bf16 %v9433_v49  ;;  %v9439_v54 = vld [vmem:[#allocation144_spill] sm:$0xff]  ;;  %v4224_v55 = vadd.f32 %v8352_v16, %v4072_v12 }
 0x78f   :  { %v8378_v58 = vpop.permute.xlu1 %3775  ;;  %v4144_v6 = vadd.f32 %v4143_v22, %v4012_v33  ;;  %v4164_v26 = vadd.f32 %v4163_v59, %v4027_v8  ;;  %v4265_v31 = vadd.f32 %v8324_v10, %v4103_v15  ;;  %v9438_v33 = vunpack.c.h.bf16 %v9428_v19 }
 0x790   :  { %v8380_v0 = vpop.permute.xlu0 %3834  ;;  %v4058_v38 = vmul.f32 %v9434_v17, %v3768_v7  ;;  %v4204_v22 = vadd.f32 %v8331_v13, %v4057_v52  ;;  %v4129_v43 = vrot.slane %v4128_v23, 1  ;;  %v9443_v8 = vunpack.c.l.bf16 %v9442_v40 }
 0x791   :  { %v4266_v10 = vadd.f32 %v4265_v31, %v4104_v25  ;;  %v9445_v59 = vunpack.c.h.bf16 %v9436_v45  ;;  %v9450_v25 = vunpack.c.l.bf16 %v9449_v36 }
 0x792   :  { %v4088_v13 = vmul.f32 %v9443_v8, %v8364_v51  ;;  %v4130_v16 = vadd.f32 %v4129_v43, %v4128_v23  ;;  %v4089_v51 = vmul.f32 %v9448_v14, %v8370_v20  ;;  %v9452_v23 = vld [vmem:[#allocation102_spill] sm:$0xff]  ;;  %v9458_v43 = vld [vmem:[#allocation103_spill] sm:$0xff] }
 0x793   :  { %v3713_v30 = vpop.permute.xlu1 %3712  ;;  %v4073_v19 = vmul.f32 %v9445_v59, %v8368_v60 }
 0x794   :  { %v3642_v29 = vpop.permute.xlu0 %3641  ;;  %v4045_v4 = vmul.f32 %v9420_v2, %v3713_v30  ;;  %v4245_v17 = vadd.f32 %v8358_v50, %v4088_v13 }
 0x795   :  { %v4028_v56 = vmul.f32 %v9429_v46, %v3642_v29  ;;  %v4105_v29 = vmul.f32 %v9435_v62, %v3965_v3  ;;  %v4225_v42 = vadd.f32 %v4224_v55, %v4073_v19 }
 0x796   :  { %v4187_v5 = vadd.f32 %v4186_v11, %v4045_v4  ;;  %v4246_v12 = vadd.f32 %v4245_v17, %v4089_v51 }
 0x797   :  { %v3973_v24 = vpop.permute.xlu1 %3972  ;;  %v4165_v63 = vadd.f32 %v4164_v26, %v4028_v56  ;;  %v4267_v57 = vadd.f32 %v4266_v10, %v4105_v29  ;;  %v4060_v26 = vmul.f32 %v9450_v25, %v8378_v58 }
 0x798   :  { %v8392_v61 = vpop.permute.xlu0 %3901  ;;  %v4188_v35 = vrot.slane %v4187_v5, 4 }
 0x79a   :  { %v4189_v2 = vadd.f32 %v4188_v35, %v4187_v5  ;;  %v4205_v5 = vadd.f32 %v4204_v22, %v4058_v38 }
 0x79b   :  { %v8398_v53 = vpop.permute.xlu1 %3909 }
 0x79c   :  { %v3579_v39 = vpop.permute.xlu0 %3578 }
 0x79d   :  { %v4013_v9 = vmul.f32 %v9425_v18, %v3579_v39  ;;  %v9440_v39 = vunpack.c.l.bf16 %v9439_v54  ;;  %v9441_v18 = vunpack.c.h.bf16 %v9439_v54 }
 0x79f   :  { %v4145_v37 = vadd.f32 %v4144_v6, %v4013_v9  ;;  %v3977_v41 = vpop.permute.xlu1 %3976  ;;  %v4106_v7 = vmul.f32 %v9440_v39, %v3969_v21  ;;  %v4190_v6 = vrot.slane %v4189_v2, 2  ;;  %v4107_v47 = vmul.f32 %v9441_v18, %v3973_v24  ;;  %v9446_v24 = vld [vmem:[#allocation147_spill] sm:$0xff] }
 0x7a0   :  { %v3839_v27 = vpop.permute.xlu0 %3838  ;;  %v9444_v21 = vunpack.c.h.bf16 %v9433_v49  ;;  %v9447_v56 = vunpack.c.l.bf16 %v9446_v24  ;;  %v9451_v31 = vunpack.c.h.bf16 %v9446_v24 }
 0x7a1   :  { %v4146_v30 = vrot.slane %v4145_v37, 4  ;;  %v4268_v46 = vadd.f32 %v4267_v57, %v4106_v7 }
 0x7a2   :  { %v4059_v35 = vmul.f32 %v9444_v21, %v8366_v1  ;;  %v4191_v1 = vadd.f32 %v4190_v6, %v4189_v2 }
 0x7a3   :  { %v4147_v28 = vadd.f32 %v4146_v30, %v4145_v37  ;;  %v3981_v34 = vpop.permute.xlu1 %3980  ;;  %v4108_v30 = vmul.f32 %v9447_v56, %v3977_v41  ;;  %v9453_v41 = vunpack.c.l.bf16 %v9452_v23 }
 0x7a4   :  { %v3646_v4 = vpop.permute.xlu0 %3645  ;;  %v4109_v60 = vmul.f32 %v9451_v31, %v3981_v34  ;;  %v4206_v29 = vadd.f32 %v4205_v5, %v4059_v35  ;;  %v9461_v34 = vunpack.c.h.bf16 %v9458_v43  ;;  %v9462_v35 = vld [vmem:[#allocation124_spill] sm:$0xff] }
 0x7a5   :  { %v4148_v44 = vrot.slane %v4147_v28, 2  ;;  %v4029_v11 = vmul.f32 %v9438_v33, %v3646_v4  ;;  %v4074_v38 = vmul.f32 %v9453_v41, %v8380_v0  ;;  %v9454_v4 = vld [vmem:[#allocation122_spill] sm:$0xff]  ;;  %v9463_v59 = vunpack.c.l.bf16 %v9462_v35 }
 0x7a6   :  { %v9455_v45 = vunpack.c.l.bf16 %v9454_v4  ;;  %v4207_v50 = vadd.f32 %v4206_v29, %v4060_v26  ;;  %v9457_v0 = vunpack.c.h.bf16 %v9454_v4 }
 0x7a7   :  { %v4149_v32 = vadd.f32 %v4148_v44, %v4147_v28  ;;  %v4166_v3 = vadd.f32 %v4165_v63, %v4029_v11  ;;  %v4269_v28 = vadd.f32 %v4268_v46, %v4107_v47  ;;  %v9456_v63 = vunpack.c.h.bf16 %v9452_v23 }
 0x7a8   :  { %v3906_v9 = vpop.permute.xlu0 %3905  ;;  %v4090_v58 = vmul.f32 %v9455_v45, %v8392_v61  ;;  %v4192_v11 = vrot.slane %v4191_v1, 1  ;;  %v4226_v39 = vadd.f32 %v4225_v42, %v4074_v38  ;;  %v9460_v61 = vunpack.c.h.bf16 %v9449_v36 }
 0x7a9   :  { %v4150_v37 = vrot.slane %v4149_v32, 1  ;;  %v4167_v15 = vrot.slane %v4166_v3, 4  ;;  %v4270_v2 = vadd.f32 %v4269_v28, %v4108_v30  ;;  %v4075_v44 = vmul.f32 %v9456_v63, %v3839_v27 }
 0x7aa   :  { %v4091_v10 = vmul.f32 %v9457_v0, %v3906_v9  ;;  %v4247_v57 = vadd.f32 %v4246_v12, %v4090_v58  ;;  %v4193_v47 = vadd.f32 %v4192_v11, %v4191_v1  ;;  %v4092_v19 = vmul.f32 %v9463_v59, %v8398_v53 }
 0x7ab   :  { %v4151_v52 = vadd.f32 %v4150_v37, %v4149_v32  ;;  %v4168_v48 = vadd.f32 %v4167_v15, %v4166_v3  ;;  %v4271_v22 = vadd.f32 %v4270_v2, %v4109_v60  ;;  %v9459_v32 = vunpack.c.l.bf16 %v9458_v43 }
 0x7ac   :  { %v3843_v49 = vpop.permute.xlu0 %3842  ;;  %v4227_v6 = vadd.f32 %v4226_v39, %v4075_v44  ;;  %v4248_v40 = vadd.f32 %v4247_v57, %v4091_v10 }
 0x7ad   :  { %v4286_v20 = vsel %vm3400_vm1, %v4151_v52, %v4130_v16  ;;  %v4169_v62 = vrot.slane %v4168_v48, 2  ;;  %v4076_v3 = vmul.f32 %v9459_v32, %v3843_v49  ;;  %v4272_v55 = vrot.slane %v4271_v22, 4 }
 0x7ae   :  { %v4249_v51 = vadd.f32 %v4248_v40, %v4092_v19  ;;  %v9464_v52 = vunpack.c.h.bf16 %v9462_v35 }
 0x7af   :  { %v4170_v33 = vadd.f32 %v4169_v62, %v4168_v48  ;;  %v4228_v9 = vadd.f32 %v4227_v6, %v4076_v3  ;;  %v4273_v56 = vadd.f32 %v4272_v55, %v4271_v22 }
 0x7b0   :  { %v3780_v54 = vpop.permute.xlu0 %3779 }
 0x7b1   :  { %v4171_v7 = vrot.slane %v4170_v33, 1  ;;  %v4061_v5 = vmul.f32 %v9460_v61, %v3780_v54  ;;  %v4274_v1 = vrot.slane %v4273_v56, 2 }
 0x7b3   :  { %v4172_v18 = vadd.f32 %v4171_v7, %v4170_v33  ;;  %v4208_v27 = vadd.f32 %v4207_v50, %v4061_v5  ;;  %v4275_v23 = vadd.f32 %v4274_v1, %v4273_v56 }
 0x7b4   :  { %v3847_v8 = vpop.permute.xlu0 %3846  ;;  %v3443_v42 = vpop.permute.xlu1 %3442 }
 0x7b5   :  { %v4287_v13 = vsel %vm3402_vm13, %v4172_v18, %v4286_v20  ;;  %v4209_v37 = vrot.slane %v4208_v27, 4  ;;  %v4077_v15 = vmul.f32 %v9461_v34, %v3847_v8  ;;  %v4276_v45 = vrot.slane %v4275_v23, 1 }
 0x7b6   :  { %v4288_v21 = vsel %vm3404_vm2, %v4193_v47, %v4287_v13  ;;  %v3445_v44 = vmul.f32 0.0, %v3443_v42 }
 0x7b7   :  { %v4210_v46 = vadd.f32 %v4209_v37, %v4208_v27  ;;  %v4229_v24 = vadd.f32 %v4228_v9, %v4077_v15  ;;  %v4277_v63 = vadd.f32 %v4276_v45, %v4275_v23 }
 0x7b8   :  { %v3914_v30 = vpop.permute.xlu0 %3913 }
 0x7b9   :  { %v4211_v16 = vrot.slane %v4210_v46, 2  ;;  %v4230_v14 = vrot.slane %v4229_v24, 4  ;;  %v4093_v48 = vmul.f32 %v9464_v52, %v3914_v30 }
 0x7bb   :  { %v4212_v36 = vadd.f32 %v4211_v16, %v4210_v46  ;;  %v4231_v25 = vadd.f32 %v4230_v14, %v4229_v24  ;;  %v4250_v26 = vadd.f32 %v4249_v51, %v4093_v48 }
 0x7bd   :  { %v4213_v28 = vrot.slane %v4212_v36, 1  ;;  %v4232_v31 = vrot.slane %v4231_v25, 2  ;;  %v4251_v60 = vrot.slane %v4250_v26, 4 }
 0x7bf   :  { %v4214_v49 = vadd.f32 %v4213_v28, %v4212_v36  ;;  %v4233_v17 = vadd.f32 %v4232_v31, %v4231_v25  ;;  %v4252_v53 = vadd.f32 %v4251_v60, %v4250_v26 }
 0x7c0   :  { %v4305_v41 = vpop.permute.xlu0 %4304 }
 0x7c1   :  { %v4289_v38 = vsel %vm3406_vm4, %v4214_v49, %v4288_v21  ;;  %v4234_v20 = vrot.slane %v4233_v17, 1  ;;  %v4253_v62 = vrot.slane %v4252_v53, 2  ;;  %5200 = vrcp.f32 %v4305_v41 }
 0x7c3   :  { %v4235_v29 = vadd.f32 %v4234_v20, %v4233_v17  ;;  %v4254_v4 = vadd.f32 %v4253_v62, %v4252_v53 }
 0x7c5   :  { %v4290_v58 = vsel %vm3408_vm6, %v4235_v29, %v4289_v38  ;;  %v4255_v2 = vrot.slane %v4254_v4, 1 }
 0x7c7   :  { %v4256_v12 = vadd.f32 %v4255_v2, %v4254_v4 }
 0x7c9   :  { %v4291_v33 = vsel %vm3410_vm7, %v4256_v12, %v4290_v58 }
 0x7ca   :  { %v4292_v50 = vsel %vm3412_vm11, %v4277_v63, %v4291_v33 }
 0x7cb   :  { %v5201_v11 = vpop.eup %5200  ;;  %v4294_v22 = vadd.f32 %v4292_v50, %v3445_v44 }
 0x7cd   :  { %v4308_v0 = vmul.f32 %v5201_v11, %v4294_v22 }
 0x7cf   :  { %v4309_v10 = vpack.c.bf16 %v4308_v0, %v4308_v0 }
 0x7d1   :  { %5054 = vmatmul.mubr.bf16.vlgmr.msra.gmra.mrb[4].mxu0 %v4309_v10 }
 0x7d2   :  { %5369 = shalt.err (!%p5366_p4)
}
 0x7d3   :  { %s5370_s3 = scalar_lea.hbm %s8530_s12, 128 }
 0x7d4   :  { %p5371_p5 = scmp.ne.s32.totalorder %s8530_s12, %s5370_s3  ;;  %p5374_p6 = scmp.lt.u32.totalorder %s5370_s3, %s8530_s12 }
 0x7d6   :  { %p5376_p7 = pnand %p5374_p6, %p5371_p5 }
 0x7d8   :  { %5379 = shalt.err (!%p5376_p7)
}
 0x7d9   :  { %4539 = dma.vmem_to_hbm [thread:$0]  %s4537_s8, 128, %s8530_s12, [#allocation9]   ;;  %v4641_v39 = vld [vmem:[%s8529_s11] ss:$0 sm:$0xff]  ;;  %v9465_v7 = vld [vmem:[#allocation117_spill] sm:$0xff] }
 0x7da   :  { %s5453_s24 = smov [#allocation20]   ;;  %s5454_s21 = smov [#allocation22]  }
 0x7db   :  { %s4546_s19 = sshll.u32 %s5453_s24, 4  ;;  %s4556_s6 = sshll.u32 %s5454_s21, 4  ;;  %s4547_s19 = int_to_ptr.vmem [resolvable:$true] %s4546_s19  ;;  %s4557_s6 = int_to_ptr.vmem [resolvable:$true] %s4556_s6 }
 0x7dc   :  { %s5380_s12 = scalar_lea.vmem %s4547_s19, 64  ;;  %p5385_p9 = scmp.lt.s32.totalorder %s4547_s19, %s4547_s19 }
 0x7dd   :  { %p5381_p8 = scmp.ne.s32.totalorder %s4547_s19, %s5380_s12  ;;  %p5386_p10 = scmp.lt.s32.totalorder %s5380_s12, %s5380_s12 }
 0x7df   :  { %p5387_p11 = por %p5386_p10, %p5385_p9 }
 0x7e1   :  { %p5388_p12 = pnand %p5387_p11, %p5381_p8 }
 0x8a4   :  { %v4425_v54 = vpop.f32.mrb[4].mxu0 }
 0x8a5   :  { %v4514_v43 = vadd.f32 %v9465_v7, %v4425_v54  ;;  %v5055_v32 = vpop.f32.mrb[5].mxu0 }
 0x8a6   :  { %v4428_v3 = vpop.f32.mrb[6].mxu0 }
 0x8a7   :  { %v4526_v61 = vadd.f32 %v4641_v39, %v4514_v43  ;;  %v5056_v5 = vpop.f32.mrb[7].mxu0 }
 0x8a9   :  { %5202 = vtanh.f32 %v4526_v61 }
 0x8b3   :  { %v5203_v57 = vpop.eup %5202 }
 0x8b4   :  { %v4528_v6 = vpack.c.bf16 %v5203_v57, %v5203_v57 }
 0x8b6   :  { %4529 = vst [vmem:[#allocation20] sm:$0xf] %v4528_v6 }
 0x8b7   :  { %5391 = shalt.err (!%p5388_p12)
}
 0x8b8   :  { %s5392_s10 = scalar_lea.hbm %s8531_s13, 64 }
 0x8b9   :  { %p5393_p13 = scmp.ne.s32.totalorder %s8531_s13, %s5392_s10  ;;  %p5396_p0 = scmp.lt.u32.totalorder %s5392_s10, %s8531_s13 }
 0x8bb   :  { %p5398_p1 = pnand %p5396_p0, %p5393_p13 }
 0x8bd   :  { %5401 = shalt.err (!%p5398_p1)
}
 0x8be   :  { %4549 = dma.vmem_to_hbm [thread:$0]  %s4547_s19, 64, %s8531_s13, [#allocation21]  }
 0x8bf   :  { %s5402_s23 = scalar_lea.vmem %s4557_s6, 128  ;;  %p5407_p3 = scmp.lt.s32.totalorder %s4557_s6, %s4557_s6 }
 0x8c0   :  { %p5403_p2 = scmp.ne.s32.totalorder %s4557_s6, %s5402_s23  ;;  %p5408_p4 = scmp.lt.s32.totalorder %s5402_s23, %s5402_s23 }
 0x8c2   :  { %p5409_p5 = por %p5408_p4, %p5407_p3 }
 0x8c4   :  { %p5410_p6 = pnand %p5409_p5, %p5403_p2 }
 0x8c6   :  { %5413 = shalt.err (!%p5410_p6)
}
 0x8c7   :  { %s5414_s25 = scalar_lea.hbm %s8532_s14, 128 }
 0x8c8   :  { %p5415_p7 = scmp.ne.s32.totalorder %s8532_s14, %s5414_s25  ;;  %p5418_p8 = scmp.lt.u32.totalorder %s5414_s25, %s8532_s14 }
 0x8ca   :  { %p5420_p9 = pnand %p5418_p8, %p5415_p7 }
 0x8cc   :  { %5423 = shalt.err (!%p5420_p9)
}
 0x8cd   :  { %4559 = dma.vmem_to_hbm [thread:$0]  %s4557_s6, 128, %s8532_s14, [#allocation21]  }
 0x8ce   :  { %5432 = dma.done.wait [#allocation9], 128  }
 0x8cf   :  { %5433 = vsyncadd [#allocation9], 4294967168 }
 0x8d0   :  { %5434 = dma.done.wait [#allocation21], 192  }
 0x8d1   :  { %5435 = vsyncadd [#allocation21], 4294967104 }
 0x8d2   :  { %4569 = vsyncpa [#allocation8], 1 }
 0x8d3   :  { %4570 = vsyncpa [#allocation11], 1 }
 0x8d4   :  { %4571 = vsyncpa [#allocation14], 1 }
 0x8d5   :  { %4572 = vsyncpa [#allocation17], 1 }
 0x8d6   :  { %4573 = vsyncpa [#allocation9], 1 }
 0x8d7   :  { %4574 = vsyncpa [#allocation21], 1 }

</bundles_post_ra>
